<compile_context>
chip_gen: v7x
topology: tpu7x:2x2x1
jax: 0.10.0
libtpu: 0.0.40
codegen_flags: <defaults>
</compile_context>

<pallas_src>
import functools

import jax
import jax.numpy as jnp
from jax.experimental import pallas as pl
from jax.experimental.pallas import tpu as pltpu


# 3x3 window offsets (row, col), enumerated in the same order as the flattened
# PyTorch depthwise weight (3, 3, C) -> (9, C).
_OFFSETS = tuple((di, dj) for di in (-1, 0, 1) for dj in (-1, 0, 1))
_NEG = 3.0e38          # finite stand-in for -inf (maxpool out-of-image fill)


# ----------------------------------------------------------------------------
# In-kernel helpers — lane-dense (C, B*H*W) layout
# ----------------------------------------------------------------------------
def _shift_lanes(v, s, n):
    """y[:, p] = v[:, (p + s) % n]; wrap-around lanes are killed by masks/fills."""
    if s == 0:
        return v
    return pltpu.roll(v, shift=(-s) % n, axis=1)    # jnp.roll semantics


def _depthwise3x3(v, w, msk, W, L):
    """3x3 depthwise conv, zero padding, on a (C, L) slab (VPU + XLU only).

    w:   (C, 9) per-channel tap weights (already loaded).
    msk: (9, L) 0/1 border masks (already loaded; tiled per image).
    """
    acc = v * w[:, 4:5]                             # center tap: no mask needed
    for k, (di, dj) in enumerate(_OFFSETS):
        if di == 0 and dj == 0:
            continue
        t = _shift_lanes(v, di * W + dj, L) * msk[k:k + 1, :]
        acc = acc + t * w[:, k:k + 1]
    return acc


def _maxpool3x3_sep(v, fills, W, L):
    """Separable 3x3 stride-1 max with pad 1 on a (C, L) slab.

    fills: (4, L) additive fill (0 in-image, -3e38 out-of-image) for taps
           [di=-1, dj=-1, dj=+1, di=+1].  4 rolls instead of 8; 1 add per tap.
    """
    cm = jnp.maximum(v, _shift_lanes(v, -1, L) + fills[1:2, :])   # column pass (1x3)
    cm = jnp.maximum(cm, _shift_lanes(v, 1, L) + fills[2:3, :])
    out = jnp.maximum(cm, _shift_lanes(cm, -W, L) + fills[0:1, :])  # row pass (3x1)
    out = jnp.maximum(out, _shift_lanes(cm, W, L) + fills[3:4, :])
    return out


def _channel_mix(w, v, b):
    """(Cout, Cin) @ (Cin, L) + (Cout, 1) as unrolled broadcast-FMAs on the VPU.

    Cin is only 4/8 here, so this beats pushing a K<=8 matmul through the MXU.
    """
    acc = b + w[:, 0:1] * v[0:1, :]
    for i in range(1, v.shape[0]):
        acc = acc + w[:, i:i + 1] * v[i:i + 1, :]
    return acc


# ----------------------------------------------------------------------------
# Fused Block kernel: one grid step = B images, everything VMEM-resident.
# ----------------------------------------------------------------------------
def _block_kernel(x_ref, masks_ref, fills_ref, sel_ref,
                  wdw1_ref, wpt1_ref, b1_ref,
                  wdw2_ref, wpt2_ref, b2_ref,
                  wsk_ref, bs_ref, o_ref, *, W, L, Cout):
    x = x_ref[0]                                            # (Cin, L)

    # Hoist all small tables / weights once; reused across both convs + pool.
    msk = masks_ref[...]                                    # (9, L) 0/1
    fills = fills_ref[...]                                  # (4, L) 0 / -3e38
    wdw1, wpt1, b1 = wdw1_ref[...], wpt1_ref[...], b1_ref[...]
    wdw2, wpt2, b2 = wdw2_ref[...], wpt2_ref[...], b2_ref[...]
    wsk, bs = wsk_ref[...], bs_ref[...]

    # rep: ReLU -> SepConv(Cin->Cout) -> BN  (BN scale folded into wpt1, shift = b1)
    h = jnp.maximum(x, 0.0)
    h = _depthwise3x3(h, wdw1, msk, W, L)
    h = _channel_mix(wpt1, h, b1)                           # (Cout, L)

    # rep: ReLU -> SepConv(Cout->Cout) -> BN
    h = jnp.maximum(h, 0.0)
    h = _depthwise3x3(h, wdw2, msk, W, L)
    h = _channel_mix(wpt2, h, b2)

    # rep: MaxPool(3, stride=2, pad=1): separable stride-1 3x3 max ...
    m = _maxpool3x3_sep(h, fills, W, L)                     # (Cout, L)

    # ... then ONE fused stride-2 selection matmul for both the pooled path and
    # the skip-path subsample: (Cout+Cin, L) @ (L, B*HoWo) block-diag one-hot.
    cat = jnp.concatenate([m, x], axis=0)                   # (Cout+Cin, L)
    r = jnp.dot(cat, sel_ref[...], preferred_element_type=jnp.float32)
    pooled = r[:Cout, :]                                    # (Cout, B*HoWo)
    x_sub = r[Cout:, :]                                     # (Cin,  B*HoWo)

    # skip: 1x1 conv stride 2 + BN + residual add (lane-dense store, >=128 lanes)
    skip = _channel_mix(wsk, x_sub, bs)
    o_ref[0] = pooled + skip


# ----------------------------------------------------------------------------
# Trace-time constant tables (plain jnp in the wrapper)
# ----------------------------------------------------------------------------
def _make_border_masks(H, W):
    """(9, H*W) 0/1 masks: does tap k of the 3x3 window stay inside the image."""
    p = jnp.arange(H * W)
    row, col = p // W, p % W
    rows = []
    for di, dj in _OFFSETS:
        ok = (row + di >= 0) & (row + di < H) & (col + dj >= 0) & (col + dj < W)
        rows.append(ok.astype(jnp.float32))
    return jnp.stack(rows, axis=0)


def _make_pool_fills(H, W):
    """(4, H*W) additive pool fill (0 valid / -3e38 invalid) for the separable
    max taps, in order [di=-1, dj=-1, dj=+1, di=+1]."""
    p = jnp.arange(H * W)
    row, col = p // W, p % W
    rows = []
    for di, dj in ((-1, 0), (0, -1), (0, 1), (1, 0)):
        ok = (row + di >= 0) & (row + di < H) & (col + dj >= 0) & (col + dj < W)
        rows.append(jnp.where(ok, 0.0, -_NEG))
    return jnp.stack(rows, axis=0).astype(jnp.float32)


def _make_stride2_selector(H, W):
    """(H*W, Ho*Wo) one-hot columns picking the (2*ho, 2*wo) flat positions."""
    Ho, Wo = H // 2, W // 2
    p = jnp.arange(H * W)
    tgt = (2 * jnp.arange(Ho)[:, None] * W + 2 * jnp.arange(Wo)[None, :]).reshape(-1)
    return (p[:, None] == tgt[None, :]).astype(jnp.float32)


# ----------------------------------------------------------------------------
# Block forward (Pallas, fused, B images per grid step)
# ----------------------------------------------------------------------------
def block_forward(x_nchw, p, batch_per_step=4):
    N, Cin, H, W = x_nchw.shape
    Cout = p["pt1"].shape[1]
    Ho, Wo = H // 2, W // 2
    HW, HoWo = H * W, Ho * Wo

    B = min(batch_per_step, N)
    G = -(-N // B)                    # grid length (ceil)
    Npad = G * B
    x_f = x_nchw.astype(jnp.float32)
    if Npad != N:
        x_f = jnp.concatenate(
            [x_f, jnp.zeros((Npad - N, Cin, H, W), jnp.float32)], axis=0)

    L = B * HW                        # lanes per slab (images stacked along lanes)
    LOUT = B * HoWo

    # Lane-stacked input: slab[g, c, b*HW + p] = x[g*B + b, c, p]  (layout plumbing).
    x = (x_f.reshape(G, B, Cin, HW)
             .transpose(0, 2, 1, 3)
             .reshape(G, Cin, L))

    # Fold eval-mode BN scales into the pointwise / skip weights (trace time).
    # NOTE: depthwise weights consumed as (3,3,C)->(9,C); real PyTorch checkpoints
    # store (C,1,3,3) and would need an explicit reorder.
    wdw1 = p["dw1"].reshape(9, Cin).T                 # (Cin, 9)
    wdw2 = p["dw2"].reshape(9, Cout).T                # (Cout, 9)
    wpt1 = (p["pt1"] * p["s1"][None, :]).T            # (Cout, Cin)
    wpt2 = (p["pt2"] * p["s2"][None, :]).T            # (Cout, Cout)
    wsk = (p["wskip"] * p["ss"][None, :]).T           # (Cout, Cin)
    b1 = p["b1"].reshape(Cout, 1)
    b2 = p["b2"].reshape(Cout, 1)
    bs = p["bs"].reshape(Cout, 1)

    # Per-image tables, tiled/blocked across the B lane-stacked images.
    masks = jnp.tile(_make_border_masks(H, W), (1, B))        # (9, L)
    fills = jnp.tile(_make_pool_fills(H, W), (1, B))          # (4, L)
    sel = jnp.kron(jnp.eye(B, dtype=jnp.float32),
                   _make_stride2_selector(H, W))              # (L, LOUT) block-diag

    out = pl.pallas_call(
        functools.partial(_block_kernel, W=W, L=L, Cout=Cout),
        out_shape=jax.ShapeDtypeStruct((G, Cout, LOUT), jnp.float32),
        grid=(G,),
        in_specs=[
            pl.BlockSpec((1, Cin, L), lambda g: (g, 0, 0)),   # x (B images / step)
            pl.BlockSpec((9, L), lambda g: (0, 0)),           # conv border masks
            pl.BlockSpec((4, L), lambda g: (0, 0)),           # pool fills
            pl.BlockSpec((L, LOUT), lambda g: (0, 0)),        # stride-2 selector
            pl.BlockSpec((Cin, 9), lambda g: (0, 0)),         # depthwise 1
            pl.BlockSpec((Cout, Cin), lambda g: (0, 0)),      # pointwise 1 (BN-scaled)
            pl.BlockSpec((Cout, 1), lambda g: (0, 0)),        # BN1 shift
            pl.BlockSpec((Cout, 9), lambda g: (0, 0)),        # depthwise 2
            pl.BlockSpec((Cout, Cout), lambda g: (0, 0)),     # pointwise 2 (BN-scaled)
            pl.BlockSpec((Cout, 1), lambda g: (0, 0)),        # BN2 shift
            pl.BlockSpec((Cout, Cin), lambda g: (0, 0)),      # skip 1x1 (BN-scaled)
            pl.BlockSpec((Cout, 1), lambda g: (0, 0)),        # skip BN shift
        ],
        out_specs=pl.BlockSpec((1, Cout, LOUT), lambda g: (g, 0, 0)),
        compiler_params=pltpu.CompilerParams(
            dimension_semantics=("parallel",)),               # both v7x TCs get work
    )(x, masks, fills, sel, wdw1, wpt1, b1, wdw2, wpt2, b2, wsk, bs)

    # Un-stack the lane-packed output back to NCHW (layout plumbing in the wrapper).
    out = (out.reshape(G, Cout, B, Ho, Wo)
               .transpose(0, 2, 1, 3, 4)
               .reshape(Npad, Cout, Ho, Wo))
    return out[:N]


# ----------------------------------------------------------------------------
# Pure-JAX reference (same semantics) for verification
# ----------------------------------------------------------------------------
def block_forward_ref(x_nchw, p):
    x = jnp.transpose(x_nchw, (0, 2, 3, 1)).astype(jnp.float32)

    def sep_bn(h, dw, pt, s, b):
        h = jnp.maximum(h, 0.0)
        cin = h.shape[-1]
        w_hwio = dw.reshape(3, 3, 1, cin)
        h = jax.lax.conv_general_dilated(
            h, w_hwio, (1, 1), ((1, 1), (1, 1)),
            dimension_numbers=("NHWC", "HWIO", "NHWC"),
            feature_group_count=cin)
        h = jnp.einsum("nhwc,co->nhwo", h, pt)
        return h * s + b

    y = sep_bn(x, p["dw1"], p["pt1"], p["s1"], p["b1"])
    y = sep_bn(y, p["dw2"], p["pt2"], p["s2"], p["b2"])
    y = jax.lax.reduce_window(y, -jnp.inf, jax.lax.max,
                              (1, 3, 3, 1), (1, 2, 2, 1),
                              ((0, 0), (1, 1), (1, 1), (0, 0)))
    skip = jnp.einsum("nhwc,co->nhwo", x[:, ::2, ::2, :], p["wskip"])
    skip = skip * p["ss"] + p["bs"]
    return jnp.transpose(y + skip, (0, 3, 1, 2))


# ----------------------------------------------------------------------------
# Deterministic parameter construction
# ----------------------------------------------------------------------------
def make_params(cin, cout, key):
    ks = jax.random.split(key, 20)

    def nrm(k, shape, scale=0.3):
        return (scale * jax.random.normal(k, shape)).astype(jnp.float32)

    def bn(k, c):
        k1, k2, k3, k4 = jax.random.split(k, 4)
        gamma = 1.0 + 0.1 * jax.random.normal(k1, (c,))
        beta = 0.1 * jax.random.normal(k2, (c,))
        mean = 0.1 * jax.random.normal(k3, (c,))
        var = jnp.abs(jax.random.normal(k4, (c,))) + 0.5
        scale = gamma / jnp.sqrt(var + 1e-5)
        shift = beta - mean * scale
        return scale.astype(jnp.float32), shift.astype(jnp.float32)

    s1, b1 = bn(ks[4], cout)
    s2, b2 = bn(ks[5], cout)
    ss, bs = bn(ks[6], cout)
    return dict(
        dw1=nrm(ks[0], (3, 3, cin)),     # depthwise 3x3 weights (per-channel)
        pt1=nrm(ks[1], (cin, cout)),     # pointwise 1x1 weights
        dw2=nrm(ks[2], (3, 3, cout)),
        pt2=nrm(ks[3], (cout, cout)),
        wskip=nrm(ks[7], (cin, cout)),   # skip 1x1 conv weights
        s1=s1, b1=b1, s2=s2, b2=b2, ss=ss, bs=bs,
    )


if __name__ == "__main__":
    N, CIN, COUT, H, W = 8, 4, 8, 16, 16        # even H/W required for stride-2 paths
    key = jax.random.PRNGKey(0)
    kx, kp = jax.random.split(key)
    x = jax.random.normal(kx, (N, CIN, H, W), dtype=jnp.float32)   # NCHW, as PyTorch
    params = make_params(CIN, COUT, kp)

    out = jax.block_until_ready(block_forward(x, params, batch_per_step=4))
    ref = jax.block_until_ready(block_forward_ref(x, params))

    assert out.shape == (N, COUT, H // 2, W // 2), out.shape
    err = float(jnp.max(jnp.abs(out - ref)))
    assert err < 1e-3, f"max abs error too large: {err}"
    print("KERNEL_OK")
</pallas_src>

<mosaic_0001>
module attributes {stable_mosaic.version = 11 : i64} {
  func.func @_block_kernel(%arg0: i32, %arg1: memref<1x4x1024xf32, #tpu.memory_space<vmem>>, %arg2: memref<9x1024xf32, #tpu.memory_space<vmem>>, %arg3: memref<4x1024xf32, #tpu.memory_space<vmem>>, %arg4: memref<1024x256xf32, #tpu.memory_space<vmem>>, %arg5: memref<4x9xf32, #tpu.memory_space<vmem>>, %arg6: memref<8x4xf32, #tpu.memory_space<vmem>>, %arg7: memref<8x1xf32, #tpu.memory_space<vmem>>, %arg8: memref<8x9xf32, #tpu.memory_space<vmem>>, %arg9: memref<8x8xf32, #tpu.memory_space<vmem>>, %arg10: memref<8x1xf32, #tpu.memory_space<vmem>>, %arg11: memref<8x4xf32, #tpu.memory_space<vmem>>, %arg12: memref<8x1xf32, #tpu.memory_space<vmem>>, %arg13: memref<1x8x256xf32, #tpu.memory_space<vmem>>) attributes {dimension_semantics = [#tpu.dimension_semantics<parallel>], iteration_bounds = array<i64: 2>, scalar_prefetch = 0 : i64, scratch_operands = 0 : i64, tpu.core_type = #tpu.core_type<tc>, window_params = [{transform_indices = @transform_0, window_bounds = array<i64: 1, 4, 1024>}, {pipeline_mode = #tpu.pipeline_mode<synchronous>, transform_indices = @transform_1, window_bounds = array<i64: 9, 1024>}, {pipeline_mode = #tpu.pipeline_mode<synchronous>, transform_indices = @transform_2, window_bounds = array<i64: 4, 1024>}, {pipeline_mode = #tpu.pipeline_mode<synchronous>, transform_indices = @transform_3, window_bounds = array<i64: 1024, 256>}, {pipeline_mode = #tpu.pipeline_mode<synchronous>, transform_indices = @transform_4, window_bounds = array<i64: 4, 9>}, {pipeline_mode = #tpu.pipeline_mode<synchronous>, transform_indices = @transform_5, window_bounds = array<i64: 8, 4>}, {pipeline_mode = #tpu.pipeline_mode<synchronous>, transform_indices = @transform_6, window_bounds = array<i64: 8, 1>}, {pipeline_mode = #tpu.pipeline_mode<synchronous>, transform_indices = @transform_7, window_bounds = array<i64: 8, 9>}, {pipeline_mode = #tpu.pipeline_mode<synchronous>, transform_indices = @transform_8, window_bounds = array<i64: 8, 8>}, {pipeline_mode = #tpu.pipeline_mode<synchronous>, transform_indices = @transform_9, window_bounds = array<i64: 8, 1>}, {pipeline_mode = #tpu.pipeline_mode<synchronous>, transform_indices = @transform_10, window_bounds = array<i64: 8, 4>}, {pipeline_mode = #tpu.pipeline_mode<synchronous>, transform_indices = @transform_11, window_bounds = array<i64: 8, 1>}, {transform_indices = @transform_12, window_bounds = array<i64: 1, 8, 256>}]} {
    %c0 = arith.constant 0 : index
    %c0_0 = arith.constant 0 : index
    %c0_1 = arith.constant 0 : index
    %0 = vector.load %arg1[%c0, %c0_0, %c0_1] : memref<1x4x1024xf32, #tpu.memory_space<vmem>>, vector<1x4x1024xf32>
    %1 = vector.shape_cast %0 : vector<1x4x1024xf32> to vector<4x1024xf32>
    %c0_2 = arith.constant 0 : index
    %c0_3 = arith.constant 0 : index
    %2 = vector.load %arg2[%c0_2, %c0_3] : memref<9x1024xf32, #tpu.memory_space<vmem>>, vector<9x1024xf32>
    %c0_4 = arith.constant 0 : index
    %c0_5 = arith.constant 0 : index
    %3 = vector.load %arg3[%c0_4, %c0_5] : memref<4x1024xf32, #tpu.memory_space<vmem>>, vector<4x1024xf32>
    %c0_6 = arith.constant 0 : index
    %c0_7 = arith.constant 0 : index
    %4 = vector.load %arg5[%c0_6, %c0_7] : memref<4x9xf32, #tpu.memory_space<vmem>>, vector<4x9xf32>
    %c0_8 = arith.constant 0 : index
    %c0_9 = arith.constant 0 : index
    %5 = vector.load %arg6[%c0_8, %c0_9] : memref<8x4xf32, #tpu.memory_space<vmem>>, vector<8x4xf32>
    %c0_10 = arith.constant 0 : index
    %c0_11 = arith.constant 0 : index
    %6 = vector.load %arg7[%c0_10, %c0_11] : memref<8x1xf32, #tpu.memory_space<vmem>>, vector<8x1xf32>
    %c0_12 = arith.constant 0 : index
    %c0_13 = arith.constant 0 : index
    %7 = vector.load %arg8[%c0_12, %c0_13] : memref<8x9xf32, #tpu.memory_space<vmem>>, vector<8x9xf32>
    %c0_14 = arith.constant 0 : index
    %c0_15 = arith.constant 0 : index
    %8 = vector.load %arg9[%c0_14, %c0_15] : memref<8x8xf32, #tpu.memory_space<vmem>>, vector<8x8xf32>
    %c0_16 = arith.constant 0 : index
    %c0_17 = arith.constant 0 : index
    %9 = vector.load %arg10[%c0_16, %c0_17] : memref<8x1xf32, #tpu.memory_space<vmem>>, vector<8x1xf32>
    %c0_18 = arith.constant 0 : index
    %c0_19 = arith.constant 0 : index
    %10 = vector.load %arg11[%c0_18, %c0_19] : memref<8x4xf32, #tpu.memory_space<vmem>>, vector<8x4xf32>
    %c0_20 = arith.constant 0 : index
    %c0_21 = arith.constant 0 : index
    %11 = vector.load %arg12[%c0_20, %c0_21] : memref<8x1xf32, #tpu.memory_space<vmem>>, vector<8x1xf32>
    %cst = arith.constant 0.000000e+00 : f32
    %12 = vector.broadcast %cst : f32 to vector<4x1024xf32>
    %13 = arith.maximumf %1, %12 : vector<4x1024xf32>
    %14 = vector.extract_strided_slice %4 {offsets = [0, 4], sizes = [4, 1], strides = [1, 1]} : vector<4x9xf32> to vector<4x1xf32>
    %15 = vector.broadcast %14 : vector<4x1xf32> to vector<4x1024xf32>
    %16 = arith.mulf %13, %15 : vector<4x1024xf32>
    %c17_i32 = arith.constant 17 : i32
    %17 = tpu.dynamic_rotate %13 by %c17_i32 dim 1 : vector<4x1024xf32>, i32 -> vector<4x1024xf32>
    %18 = vector.extract_strided_slice %2 {offsets = [0, 0], sizes = [1, 1024], strides = [1, 1]} : vector<9x1024xf32> to vector<1x1024xf32>
    %19 = vector.broadcast %18 : vector<1x1024xf32> to vector<4x1024xf32>
    %20 = arith.mulf %17, %19 : vector<4x1024xf32>
    %21 = vector.extract_strided_slice %4 {offsets = [0, 0], sizes = [4, 1], strides = [1, 1]} : vector<4x9xf32> to vector<4x1xf32>
    %22 = vector.broadcast %21 : vector<4x1xf32> to vector<4x1024xf32>
    %23 = arith.mulf %20, %22 : vector<4x1024xf32>
    %24 = arith.addf %16, %23 : vector<4x1024xf32>
    %c16_i32 = arith.constant 16 : i32
    %25 = tpu.dynamic_rotate %13 by %c16_i32 dim 1 : vector<4x1024xf32>, i32 -> vector<4x1024xf32>
    %26 = vector.extract_strided_slice %2 {offsets = [1, 0], sizes = [1, 1024], strides = [1, 1]} : vector<9x1024xf32> to vector<1x1024xf32>
    %27 = vector.broadcast %26 : vector<1x1024xf32> to vector<4x1024xf32>
    %28 = arith.mulf %25, %27 : vector<4x1024xf32>
    %29 = vector.extract_strided_slice %4 {offsets = [0, 1], sizes = [4, 1], strides = [1, 1]} : vector<4x9xf32> to vector<4x1xf32>
    %30 = vector.broadcast %29 : vector<4x1xf32> to vector<4x1024xf32>
    %31 = arith.mulf %28, %30 : vector<4x1024xf32>
    %32 = arith.addf %24, %31 : vector<4x1024xf32>
    %c15_i32 = arith.constant 15 : i32
    %33 = tpu.dynamic_rotate %13 by %c15_i32 dim 1 : vector<4x1024xf32>, i32 -> vector<4x1024xf32>
    %34 = vector.extract_strided_slice %2 {offsets = [2, 0], sizes = [1, 1024], strides = [1, 1]} : vector<9x1024xf32> to vector<1x1024xf32>
    %35 = vector.broadcast %34 : vector<1x1024xf32> to vector<4x1024xf32>
    %36 = arith.mulf %33, %35 : vector<4x1024xf32>
    %37 = vector.extract_strided_slice %4 {offsets = [0, 2], sizes = [4, 1], strides = [1, 1]} : vector<4x9xf32> to vector<4x1xf32>
    %38 = vector.broadcast %37 : vector<4x1xf32> to vector<4x1024xf32>
    %39 = arith.mulf %36, %38 : vector<4x1024xf32>
    %40 = arith.addf %32, %39 : vector<4x1024xf32>
    %c1_i32 = arith.constant 1 : i32
    %41 = tpu.dynamic_rotate %13 by %c1_i32 dim 1 : vector<4x1024xf32>, i32 -> vector<4x1024xf32>
    %42 = vector.extract_strided_slice %2 {offsets = [3, 0], sizes = [1, 1024], strides = [1, 1]} : vector<9x1024xf32> to vector<1x1024xf32>
    %43 = vector.broadcast %42 : vector<1x1024xf32> to vector<4x1024xf32>
    %44 = arith.mulf %41, %43 : vector<4x1024xf32>
    %45 = vector.extract_strided_slice %4 {offsets = [0, 3], sizes = [4, 1], strides = [1, 1]} : vector<4x9xf32> to vector<4x1xf32>
    %46 = vector.broadcast %45 : vector<4x1xf32> to vector<4x1024xf32>
    %47 = arith.mulf %44, %46 : vector<4x1024xf32>
    %48 = arith.addf %40, %47 : vector<4x1024xf32>
    %c1023_i32 = arith.constant 1023 : i32
    %49 = tpu.dynamic_rotate %13 by %c1023_i32 dim 1 : vector<4x1024xf32>, i32 -> vector<4x1024xf32>
    %50 = vector.extract_strided_slice %2 {offsets = [5, 0], sizes = [1, 1024], strides = [1, 1]} : vector<9x1024xf32> to vector<1x1024xf32>
    %51 = vector.broadcast %50 : vector<1x1024xf32> to vector<4x1024xf32>
    %52 = arith.mulf %49, %51 : vector<4x1024xf32>
    %53 = vector.extract_strided_slice %4 {offsets = [0, 5], sizes = [4, 1], strides = [1, 1]} : vector<4x9xf32> to vector<4x1xf32>
    %54 = vector.broadcast %53 : vector<4x1xf32> to vector<4x1024xf32>
    %55 = arith.mulf %52, %54 : vector<4x1024xf32>
    %56 = arith.addf %48, %55 : vector<4x1024xf32>
    %c1009_i32 = arith.constant 1009 : i32
    %57 = tpu.dynamic_rotate %13 by %c1009_i32 dim 1 : vector<4x1024xf32>, i32 -> vector<4x1024xf32>
    %58 = vector.extract_strided_slice %2 {offsets = [6, 0], sizes = [1, 1024], strides = [1, 1]} : vector<9x1024xf32> to vector<1x1024xf32>
    %59 = vector.broadcast %58 : vector<1x1024xf32> to vector<4x1024xf32>
    %60 = arith.mulf %57, %59 : vector<4x1024xf32>
    %61 = vector.extract_strided_slice %4 {offsets = [0, 6], sizes = [4, 1], strides = [1, 1]} : vector<4x9xf32> to vector<4x1xf32>
    %62 = vector.broadcast %61 : vector<4x1xf32> to vector<4x1024xf32>
    %63 = arith.mulf %60, %62 : vector<4x1024xf32>
    %64 = arith.addf %56, %63 : vector<4x1024xf32>
    %c1008_i32 = arith.constant 1008 : i32
    %65 = tpu.dynamic_rotate %13 by %c1008_i32 dim 1 : vector<4x1024xf32>, i32 -> vector<4x1024xf32>
    %66 = vector.extract_strided_slice %2 {offsets = [7, 0], sizes = [1, 1024], strides = [1, 1]} : vector<9x1024xf32> to vector<1x1024xf32>
    %67 = vector.broadcast %66 : vector<1x1024xf32> to vector<4x1024xf32>
    %68 = arith.mulf %65, %67 : vector<4x1024xf32>
    %69 = vector.extract_strided_slice %4 {offsets = [0, 7], sizes = [4, 1], strides = [1, 1]} : vector<4x9xf32> to vector<4x1xf32>
    %70 = vector.broadcast %69 : vector<4x1xf32> to vector<4x1024xf32>
    %71 = arith.mulf %68, %70 : vector<4x1024xf32>
    %72 = arith.addf %64, %71 : vector<4x1024xf32>
    %c1007_i32 = arith.constant 1007 : i32
    %73 = tpu.dynamic_rotate %13 by %c1007_i32 dim 1 : vector<4x1024xf32>, i32 -> vector<4x1024xf32>
    %74 = vector.extract_strided_slice %2 {offsets = [8, 0], sizes = [1, 1024], strides = [1, 1]} : vector<9x1024xf32> to vector<1x1024xf32>
    %75 = vector.broadcast %74 : vector<1x1024xf32> to vector<4x1024xf32>
    %76 = arith.mulf %73, %75 : vector<4x1024xf32>
    %77 = vector.extract_strided_slice %4 {offsets = [0, 8], sizes = [4, 1], strides = [1, 1]} : vector<4x9xf32> to vector<4x1xf32>
    %78 = vector.broadcast %77 : vector<4x1xf32> to vector<4x1024xf32>
    %79 = arith.mulf %76, %78 : vector<4x1024xf32>
    %80 = arith.addf %72, %79 : vector<4x1024xf32>
    %81 = vector.extract_strided_slice %5 {offsets = [0, 0], sizes = [8, 1], strides = [1, 1]} : vector<8x4xf32> to vector<8x1xf32>
    %82 = vector.extract_strided_slice %80 {offsets = [0, 0], sizes = [1, 1024], strides = [1, 1]} : vector<4x1024xf32> to vector<1x1024xf32>
    %83 = vector.broadcast %81 : vector<8x1xf32> to vector<8x1024xf32>
    %84 = vector.broadcast %82 : vector<1x1024xf32> to vector<8x1024xf32>
    %85 = arith.mulf %83, %84 : vector<8x1024xf32>
    %86 = vector.broadcast %6 : vector<8x1xf32> to vector<8x1024xf32>
    %87 = arith.addf %86, %85 : vector<8x1024xf32>
    %88 = vector.extract_strided_slice %5 {offsets = [0, 1], sizes = [8, 1], strides = [1, 1]} : vector<8x4xf32> to vector<8x1xf32>
    %89 = vector.extract_strided_slice %80 {offsets = [1, 0], sizes = [1, 1024], strides = [1, 1]} : vector<4x1024xf32> to vector<1x1024xf32>
    %90 = vector.broadcast %88 : vector<8x1xf32> to vector<8x1024xf32>
    %91 = vector.broadcast %89 : vector<1x1024xf32> to vector<8x1024xf32>
    %92 = arith.mulf %90, %91 : vector<8x1024xf32>
    %93 = arith.addf %87, %92 : vector<8x1024xf32>
    %94 = vector.extract_strided_slice %5 {offsets = [0, 2], sizes = [8, 1], strides = [1, 1]} : vector<8x4xf32> to vector<8x1xf32>
    %95 = vector.extract_strided_slice %80 {offsets = [2, 0], sizes = [1, 1024], strides = [1, 1]} : vector<4x1024xf32> to vector<1x1024xf32>
    %96 = vector.broadcast %94 : vector<8x1xf32> to vector<8x1024xf32>
    %97 = vector.broadcast %95 : vector<1x1024xf32> to vector<8x1024xf32>
    %98 = arith.mulf %96, %97 : vector<8x1024xf32>
    %99 = arith.addf %93, %98 : vector<8x1024xf32>
    %100 = vector.extract_strided_slice %5 {offsets = [0, 3], sizes = [8, 1], strides = [1, 1]} : vector<8x4xf32> to vector<8x1xf32>
    %101 = vector.extract_strided_slice %80 {offsets = [3, 0], sizes = [1, 1024], strides = [1, 1]} : vector<4x1024xf32> to vector<1x1024xf32>
    %102 = vector.broadcast %100 : vector<8x1xf32> to vector<8x1024xf32>
    %103 = vector.broadcast %101 : vector<1x1024xf32> to vector<8x1024xf32>
    %104 = arith.mulf %102, %103 : vector<8x1024xf32>
    %105 = arith.addf %99, %104 : vector<8x1024xf32>
    %cst_22 = arith.constant 0.000000e+00 : f32
    %106 = vector.broadcast %cst_22 : f32 to vector<8x1024xf32>
    %107 = arith.maximumf %105, %106 : vector<8x1024xf32>
    %108 = vector.extract_strided_slice %7 {offsets = [0, 4], sizes = [8, 1], strides = [1, 1]} : vector<8x9xf32> to vector<8x1xf32>
    %109 = vector.broadcast %108 : vector<8x1xf32> to vector<8x1024xf32>
    %110 = arith.mulf %107, %109 : vector<8x1024xf32>
    %c17_i32_23 = arith.constant 17 : i32
    %111 = tpu.dynamic_rotate %107 by %c17_i32_23 dim 1 : vector<8x1024xf32>, i32 -> vector<8x1024xf32>
    %112 = vector.extract_strided_slice %2 {offsets = [0, 0], sizes = [1, 1024], strides = [1, 1]} : vector<9x1024xf32> to vector<1x1024xf32>
    %113 = vector.broadcast %112 : vector<1x1024xf32> to vector<8x1024xf32>
    %114 = arith.mulf %111, %113 : vector<8x1024xf32>
    %115 = vector.extract_strided_slice %7 {offsets = [0, 0], sizes = [8, 1], strides = [1, 1]} : vector<8x9xf32> to vector<8x1xf32>
    %116 = vector.broadcast %115 : vector<8x1xf32> to vector<8x1024xf32>
    %117 = arith.mulf %114, %116 : vector<8x1024xf32>
    %118 = arith.addf %110, %117 : vector<8x1024xf32>
    %c16_i32_24 = arith.constant 16 : i32
    %119 = tpu.dynamic_rotate %107 by %c16_i32_24 dim 1 : vector<8x1024xf32>, i32 -> vector<8x1024xf32>
    %120 = vector.extract_strided_slice %2 {offsets = [1, 0], sizes = [1, 1024], strides = [1, 1]} : vector<9x1024xf32> to vector<1x1024xf32>
    %121 = vector.broadcast %120 : vector<1x1024xf32> to vector<8x1024xf32>
    %122 = arith.mulf %119, %121 : vector<8x1024xf32>
    %123 = vector.extract_strided_slice %7 {offsets = [0, 1], sizes = [8, 1], strides = [1, 1]} : vector<8x9xf32> to vector<8x1xf32>
    %124 = vector.broadcast %123 : vector<8x1xf32> to vector<8x1024xf32>
    %125 = arith.mulf %122, %124 : vector<8x1024xf32>
    %126 = arith.addf %118, %125 : vector<8x1024xf32>
    %c15_i32_25 = arith.constant 15 : i32
    %127 = tpu.dynamic_rotate %107 by %c15_i32_25 dim 1 : vector<8x1024xf32>, i32 -> vector<8x1024xf32>
    %128 = vector.extract_strided_slice %2 {offsets = [2, 0], sizes = [1, 1024], strides = [1, 1]} : vector<9x1024xf32> to vector<1x1024xf32>
    %129 = vector.broadcast %128 : vector<1x1024xf32> to vector<8x1024xf32>
    %130 = arith.mulf %127, %129 : vector<8x1024xf32>
    %131 = vector.extract_strided_slice %7 {offsets = [0, 2], sizes = [8, 1], strides = [1, 1]} : vector<8x9xf32> to vector<8x1xf32>
    %132 = vector.broadcast %131 : vector<8x1xf32> to vector<8x1024xf32>
    %133 = arith.mulf %130, %132 : vector<8x1024xf32>
    %134 = arith.addf %126, %133 : vector<8x1024xf32>
    %c1_i32_26 = arith.constant 1 : i32
    %135 = tpu.dynamic_rotate %107 by %c1_i32_26 dim 1 : vector<8x1024xf32>, i32 -> vector<8x1024xf32>
    %136 = vector.extract_strided_slice %2 {offsets = [3, 0], sizes = [1, 1024], strides = [1, 1]} : vector<9x1024xf32> to vector<1x1024xf32>
    %137 = vector.broadcast %136 : vector<1x1024xf32> to vector<8x1024xf32>
    %138 = arith.mulf %135, %137 : vector<8x1024xf32>
    %139 = vector.extract_strided_slice %7 {offsets = [0, 3], sizes = [8, 1], strides = [1, 1]} : vector<8x9xf32> to vector<8x1xf32>
    %140 = vector.broadcast %139 : vector<8x1xf32> to vector<8x1024xf32>
    %141 = arith.mulf %138, %140 : vector<8x1024xf32>
    %142 = arith.addf %134, %141 : vector<8x1024xf32>
    %c1023_i32_27 = arith.constant 1023 : i32
    %143 = tpu.dynamic_rotate %107 by %c1023_i32_27 dim 1 : vector<8x1024xf32>, i32 -> vector<8x1024xf32>
    %144 = vector.extract_strided_slice %2 {offsets = [5, 0], sizes = [1, 1024], strides = [1, 1]} : vector<9x1024xf32> to vector<1x1024xf32>
    %145 = vector.broadcast %144 : vector<1x1024xf32> to vector<8x1024xf32>
    %146 = arith.mulf %143, %145 : vector<8x1024xf32>
    %147 = vector.extract_strided_slice %7 {offsets = [0, 5], sizes = [8, 1], strides = [1, 1]} : vector<8x9xf32> to vector<8x1xf32>
    %148 = vector.broadcast %147 : vector<8x1xf32> to vector<8x1024xf32>
    %149 = arith.mulf %146, %148 : vector<8x1024xf32>
    %150 = arith.addf %142, %149 : vector<8x1024xf32>
    %c1009_i32_28 = arith.constant 1009 : i32
    %151 = tpu.dynamic_rotate %107 by %c1009_i32_28 dim 1 : vector<8x1024xf32>, i32 -> vector<8x1024xf32>
    %152 = vector.extract_strided_slice %2 {offsets = [6, 0], sizes = [1, 1024], strides = [1, 1]} : vector<9x1024xf32> to vector<1x1024xf32>
    %153 = vector.broadcast %152 : vector<1x1024xf32> to vector<8x1024xf32>
    %154 = arith.mulf %151, %153 : vector<8x1024xf32>
    %155 = vector.extract_strided_slice %7 {offsets = [0, 6], sizes = [8, 1], strides = [1, 1]} : vector<8x9xf32> to vector<8x1xf32>
    %156 = vector.broadcast %155 : vector<8x1xf32> to vector<8x1024xf32>
    %157 = arith.mulf %154, %156 : vector<8x1024xf32>
    %158 = arith.addf %150, %157 : vector<8x1024xf32>
    %c1008_i32_29 = arith.constant 1008 : i32
    %159 = tpu.dynamic_rotate %107 by %c1008_i32_29 dim 1 : vector<8x1024xf32>, i32 -> vector<8x1024xf32>
    %160 = vector.extract_strided_slice %2 {offsets = [7, 0], sizes = [1, 1024], strides = [1, 1]} : vector<9x1024xf32> to vector<1x1024xf32>
    %161 = vector.broadcast %160 : vector<1x1024xf32> to vector<8x1024xf32>
    %162 = arith.mulf %159, %161 : vector<8x1024xf32>
    %163 = vector.extract_strided_slice %7 {offsets = [0, 7], sizes = [8, 1], strides = [1, 1]} : vector<8x9xf32> to vector<8x1xf32>
    %164 = vector.broadcast %163 : vector<8x1xf32> to vector<8x1024xf32>
    %165 = arith.mulf %162, %164 : vector<8x1024xf32>
    %166 = arith.addf %158, %165 : vector<8x1024xf32>
    %c1007_i32_30 = arith.constant 1007 : i32
    %167 = tpu.dynamic_rotate %107 by %c1007_i32_30 dim 1 : vector<8x1024xf32>, i32 -> vector<8x1024xf32>
    %168 = vector.extract_strided_slice %2 {offsets = [8, 0], sizes = [1, 1024], strides = [1, 1]} : vector<9x1024xf32> to vector<1x1024xf32>
    %169 = vector.broadcast %168 : vector<1x1024xf32> to vector<8x1024xf32>
    %170 = arith.mulf %167, %169 : vector<8x1024xf32>
    %171 = vector.extract_strided_slice %7 {offsets = [0, 8], sizes = [8, 1], strides = [1, 1]} : vector<8x9xf32> to vector<8x1xf32>
    %172 = vector.broadcast %171 : vector<8x1xf32> to vector<8x1024xf32>
    %173 = arith.mulf %170, %172 : vector<8x1024xf32>
    %174 = arith.addf %166, %173 : vector<8x1024xf32>
    %175 = vector.extract_strided_slice %8 {offsets = [0, 0], sizes = [8, 1], strides = [1, 1]} : vector<8x8xf32> to vector<8x1xf32>
    %176 = vector.extract_strided_slice %174 {offsets = [0, 0], sizes = [1, 1024], strides = [1, 1]} : vector<8x1024xf32> to vector<1x1024xf32>
    %177 = vector.broadcast %175 : vector<8x1xf32> to vector<8x1024xf32>
    %178 = vector.broadcast %176 : vector<1x1024xf32> to vector<8x1024xf32>
    %179 = arith.mulf %177, %178 : vector<8x1024xf32>
    %180 = vector.broadcast %9 : vector<8x1xf32> to vector<8x1024xf32>
    %181 = arith.addf %180, %179 : vector<8x1024xf32>
    %182 = vector.extract_strided_slice %8 {offsets = [0, 1], sizes = [8, 1], strides = [1, 1]} : vector<8x8xf32> to vector<8x1xf32>
    %183 = vector.extract_strided_slice %174 {offsets = [1, 0], sizes = [1, 1024], strides = [1, 1]} : vector<8x1024xf32> to vector<1x1024xf32>
    %184 = vector.broadcast %182 : vector<8x1xf32> to vector<8x1024xf32>
    %185 = vector.broadcast %183 : vector<1x1024xf32> to vector<8x1024xf32>
    %186 = arith.mulf %184, %185 : vector<8x1024xf32>
    %187 = arith.addf %181, %186 : vector<8x1024xf32>
    %188 = vector.extract_strided_slice %8 {offsets = [0, 2], sizes = [8, 1], strides = [1, 1]} : vector<8x8xf32> to vector<8x1xf32>
    %189 = vector.extract_strided_slice %174 {offsets = [2, 0], sizes = [1, 1024], strides = [1, 1]} : vector<8x1024xf32> to vector<1x1024xf32>
    %190 = vector.broadcast %188 : vector<8x1xf32> to vector<8x1024xf32>
    %191 = vector.broadcast %189 : vector<1x1024xf32> to vector<8x1024xf32>
    %192 = arith.mulf %190, %191 : vector<8x1024xf32>
    %193 = arith.addf %187, %192 : vector<8x1024xf32>
    %194 = vector.extract_strided_slice %8 {offsets = [0, 3], sizes = [8, 1], strides = [1, 1]} : vector<8x8xf32> to vector<8x1xf32>
    %195 = vector.extract_strided_slice %174 {offsets = [3, 0], sizes = [1, 1024], strides = [1, 1]} : vector<8x1024xf32> to vector<1x1024xf32>
    %196 = vector.broadcast %194 : vector<8x1xf32> to vector<8x1024xf32>
    %197 = vector.broadcast %195 : vector<1x1024xf32> to vector<8x1024xf32>
    %198 = arith.mulf %196, %197 : vector<8x1024xf32>
    %199 = arith.addf %193, %198 : vector<8x1024xf32>
    %200 = vector.extract_strided_slice %8 {offsets = [0, 4], sizes = [8, 1], strides = [1, 1]} : vector<8x8xf32> to vector<8x1xf32>
    %201 = vector.extract_strided_slice %174 {offsets = [4, 0], sizes = [1, 1024], strides = [1, 1]} : vector<8x1024xf32> to vector<1x1024xf32>
    %202 = vector.broadcast %200 : vector<8x1xf32> to vector<8x1024xf32>
    %203 = vector.broadcast %201 : vector<1x1024xf32> to vector<8x1024xf32>
    %204 = arith.mulf %202, %203 : vector<8x1024xf32>
    %205 = arith.addf %199, %204 : vector<8x1024xf32>
    %206 = vector.extract_strided_slice %8 {offsets = [0, 5], sizes = [8, 1], strides = [1, 1]} : vector<8x8xf32> to vector<8x1xf32>
    %207 = vector.extract_strided_slice %174 {offsets = [5, 0], sizes = [1, 1024], strides = [1, 1]} : vector<8x1024xf32> to vector<1x1024xf32>
    %208 = vector.broadcast %206 : vector<8x1xf32> to vector<8x1024xf32>
    %209 = vector.broadcast %207 : vector<1x1024xf32> to vector<8x1024xf32>
    %210 = arith.mulf %208, %209 : vector<8x1024xf32>
    %211 = arith.addf %205, %210 : vector<8x1024xf32>
    %212 = vector.extract_strided_slice %8 {offsets = [0, 6], sizes = [8, 1], strides = [1, 1]} : vector<8x8xf32> to vector<8x1xf32>
    %213 = vector.extract_strided_slice %174 {offsets = [6, 0], sizes = [1, 1024], strides = [1, 1]} : vector<8x1024xf32> to vector<1x1024xf32>
    %214 = vector.broadcast %212 : vector<8x1xf32> to vector<8x1024xf32>
    %215 = vector.broadcast %213 : vector<1x1024xf32> to vector<8x1024xf32>
    %216 = arith.mulf %214, %215 : vector<8x1024xf32>
    %217 = arith.addf %211, %216 : vector<8x1024xf32>
    %218 = vector.extract_strided_slice %8 {offsets = [0, 7], sizes = [8, 1], strides = [1, 1]} : vector<8x8xf32> to vector<8x1xf32>
    %219 = vector.extract_strided_slice %174 {offsets = [7, 0], sizes = [1, 1024], strides = [1, 1]} : vector<8x1024xf32> to vector<1x1024xf32>
    %220 = vector.broadcast %218 : vector<8x1xf32> to vector<8x1024xf32>
    %221 = vector.broadcast %219 : vector<1x1024xf32> to vector<8x1024xf32>
    %222 = arith.mulf %220, %221 : vector<8x1024xf32>
    %223 = arith.addf %217, %222 : vector<8x1024xf32>
    %c1_i32_31 = arith.constant 1 : i32
    %224 = tpu.dynamic_rotate %223 by %c1_i32_31 dim 1 : vector<8x1024xf32>, i32 -> vector<8x1024xf32>
    %225 = vector.extract_strided_slice %3 {offsets = [1, 0], sizes = [1, 1024], strides = [1, 1]} : vector<4x1024xf32> to vector<1x1024xf32>
    %226 = vector.broadcast %225 : vector<1x1024xf32> to vector<8x1024xf32>
    %227 = arith.addf %224, %226 : vector<8x1024xf32>
    %228 = arith.maximumf %223, %227 : vector<8x1024xf32>
    %c1023_i32_32 = arith.constant 1023 : i32
    %229 = tpu.dynamic_rotate %223 by %c1023_i32_32 dim 1 : vector<8x1024xf32>, i32 -> vector<8x1024xf32>
    %230 = vector.extract_strided_slice %3 {offsets = [2, 0], sizes = [1, 1024], strides = [1, 1]} : vector<4x1024xf32> to vector<1x1024xf32>
    %231 = vector.broadcast %230 : vector<1x1024xf32> to vector<8x1024xf32>
    %232 = arith.addf %229, %231 : vector<8x1024xf32>
    %233 = arith.maximumf %228, %232 : vector<8x1024xf32>
    %c16_i32_33 = arith.constant 16 : i32
    %234 = tpu.dynamic_rotate %233 by %c16_i32_33 dim 1 : vector<8x1024xf32>, i32 -> vector<8x1024xf32>
    %235 = vector.extract_strided_slice %3 {offsets = [0, 0], sizes = [1, 1024], strides = [1, 1]} : vector<4x1024xf32> to vector<1x1024xf32>
    %236 = vector.broadcast %235 : vector<1x1024xf32> to vector<8x1024xf32>
    %237 = arith.addf %234, %236 : vector<8x1024xf32>
    %238 = arith.maximumf %233, %237 : vector<8x1024xf32>
    %c1008_i32_34 = arith.constant 1008 : i32
    %239 = tpu.dynamic_rotate %233 by %c1008_i32_34 dim 1 : vector<8x1024xf32>, i32 -> vector<8x1024xf32>
    %240 = vector.extract_strided_slice %3 {offsets = [3, 0], sizes = [1, 1024], strides = [1, 1]} : vector<4x1024xf32> to vector<1x1024xf32>
    %241 = vector.broadcast %240 : vector<1x1024xf32> to vector<8x1024xf32>
    %242 = arith.addf %239, %241 : vector<8x1024xf32>
    %243 = arith.maximumf %238, %242 : vector<8x1024xf32>
    %244 = tpu.concatenate %243, %1 in 0 : vector<8x1024xf32>, vector<4x1024xf32> -> vector<12x1024xf32>
    %c0_35 = arith.constant 0 : index
    %c0_36 = arith.constant 0 : index
    %245 = vector.load %arg4[%c0_35, %c0_36] : memref<1024x256xf32, #tpu.memory_space<vmem>>, vector<1024x256xf32>
    %cst_37 = arith.constant dense<0.000000e+00> : vector<12x256xf32>
    %246 = tpu.matmul %244, %245, %cst_37 {dimension_numbers = #tpu.dot_dimension_numbers<[1], [0], [0], [1], [0, 0, 1, 1], [], []>} : vector<12x1024xf32>, vector<1024x256xf32>, vector<12x256xf32> -> vector<12x256xf32>
    %247 = vector.extract_strided_slice %246 {offsets = [0, 0], sizes = [8, 256], strides = [1, 1]} : vector<12x256xf32> to vector<8x256xf32>
    %248 = vector.extract_strided_slice %246 {offsets = [8, 0], sizes = [4, 256], strides = [1, 1]} : vector<12x256xf32> to vector<4x256xf32>
    %249 = vector.extract_strided_slice %10 {offsets = [0, 0], sizes = [8, 1], strides = [1, 1]} : vector<8x4xf32> to vector<8x1xf32>
    %250 = vector.extract_strided_slice %248 {offsets = [0, 0], sizes = [1, 256], strides = [1, 1]} : vector<4x256xf32> to vector<1x256xf32>
    %251 = vector.broadcast %249 : vector<8x1xf32> to vector<8x256xf32>
    %252 = vector.broadcast %250 : vector<1x256xf32> to vector<8x256xf32>
    %253 = arith.mulf %251, %252 : vector<8x256xf32>
    %254 = vector.broadcast %11 : vector<8x1xf32> to vector<8x256xf32>
    %255 = arith.addf %254, %253 : vector<8x256xf32>
    %256 = vector.extract_strided_slice %10 {offsets = [0, 1], sizes = [8, 1], strides = [1, 1]} : vector<8x4xf32> to vector<8x1xf32>
    %257 = vector.extract_strided_slice %248 {offsets = [1, 0], sizes = [1, 256], strides = [1, 1]} : vector<4x256xf32> to vector<1x256xf32>
    %258 = vector.broadcast %256 : vector<8x1xf32> to vector<8x256xf32>
    %259 = vector.broadcast %257 : vector<1x256xf32> to vector<8x256xf32>
    %260 = arith.mulf %258, %259 : vector<8x256xf32>
    %261 = arith.addf %255, %260 : vector<8x256xf32>
    %262 = vector.extract_strided_slice %10 {offsets = [0, 2], sizes = [8, 1], strides = [1, 1]} : vector<8x4xf32> to vector<8x1xf32>
    %263 = vector.extract_strided_slice %248 {offsets = [2, 0], sizes = [1, 256], strides = [1, 1]} : vector<4x256xf32> to vector<1x256xf32>
    %264 = vector.broadcast %262 : vector<8x1xf32> to vector<8x256xf32>
    %265 = vector.broadcast %263 : vector<1x256xf32> to vector<8x256xf32>
    %266 = arith.mulf %264, %265 : vector<8x256xf32>
    %267 = arith.addf %261, %266 : vector<8x256xf32>
    %268 = vector.extract_strided_slice %10 {offsets = [0, 3], sizes = [8, 1], strides = [1, 1]} : vector<8x4xf32> to vector<8x1xf32>
    %269 = vector.extract_strided_slice %248 {offsets = [3, 0], sizes = [1, 256], strides = [1, 1]} : vector<4x256xf32> to vector<1x256xf32>
    %270 = vector.broadcast %268 : vector<8x1xf32> to vector<8x256xf32>
    %271 = vector.broadcast %269 : vector<1x256xf32> to vector<8x256xf32>
    %272 = arith.mulf %270, %271 : vector<8x256xf32>
    %273 = arith.addf %267, %272 : vector<8x256xf32>
    %274 = arith.addf %247, %273 : vector<8x256xf32>
    %c0_38 = arith.constant 0 : index
    %c0_39 = arith.constant 0 : index
    %c0_40 = arith.constant 0 : index
    %275 = vector.load %arg13[%c0_38, %c0_39, %c0_40] : memref<1x8x256xf32, #tpu.memory_space<vmem>>, vector<1x8x256xf32>
    %276 = vector.shape_cast %275 : vector<1x8x256xf32> to vector<8x256xf32>
    %277 = vector.shape_cast %274 : vector<8x256xf32> to vector<1x8x256xf32>
    tpu.vector_store %arg13[%c0_38, %c0_39, %c0_40], %277 {strides = array<i32>} : memref<1x8x256xf32, #tpu.memory_space<vmem>>, vector<1x8x256xf32>,
    return
  }
  func.func @transform_0(%arg0: i32) -> (i32, i32, i32) {
    %c0_i32 = arith.constant 0 : i32
    %c0_i32_0 = arith.constant 0 : i32
    %c0_i32_1 = arith.constant 0 : i32
    return %arg0, %c0_i32, %c0_i32_0 : i32, i32, i32
  }
  func.func @transform_1(%arg0: i32) -> (i32, i32) {
    %c0_i32 = arith.constant 0 : i32
    %c0_i32_0 = arith.constant 0 : i32
    %c0_i32_1 = arith.constant 0 : i32
    return %c0_i32, %c0_i32_0 : i32, i32
  }
  func.func @transform_2(%arg0: i32) -> (i32, i32) {
    %c0_i32 = arith.constant 0 : i32
    %c0_i32_0 = arith.constant 0 : i32
    %c0_i32_1 = arith.constant 0 : i32
    return %c0_i32, %c0_i32_0 : i32, i32
  }
  func.func @transform_3(%arg0: i32) -> (i32, i32) {
    %c0_i32 = arith.constant 0 : i32
    %c0_i32_0 = arith.constant 0 : i32
    %c0_i32_1 = arith.constant 0 : i32
    return %c0_i32, %c0_i32_0 : i32, i32
  }
  func.func @transform_4(%arg0: i32) -> (i32, i32) {
    %c0_i32 = arith.constant 0 : i32
    %c0_i32_0 = arith.constant 0 : i32
    %c0_i32_1 = arith.constant 0 : i32
    return %c0_i32, %c0_i32_0 : i32, i32
  }
  func.func @transform_5(%arg0: i32) -> (i32, i32) {
    %c0_i32 = arith.constant 0 : i32
    %c0_i32_0 = arith.constant 0 : i32
    %c0_i32_1 = arith.constant 0 : i32
    return %c0_i32, %c0_i32_0 : i32, i32
  }
  func.func @transform_6(%arg0: i32) -> (i32, i32) {
    %c0_i32 = arith.constant 0 : i32
    %c0_i32_0 = arith.constant 0 : i32
    %c0_i32_1 = arith.constant 0 : i32
    return %c0_i32, %c0_i32_0 : i32, i32
  }
  func.func @transform_7(%arg0: i32) -> (i32, i32) {
    %c0_i32 = arith.constant 0 : i32
    %c0_i32_0 = arith.constant 0 : i32
    %c0_i32_1 = arith.constant 0 : i32
    return %c0_i32, %c0_i32_0 : i32, i32
  }
  func.func @transform_8(%arg0: i32) -> (i32, i32) {
    %c0_i32 = arith.constant 0 : i32
    %c0_i32_0 = arith.constant 0 : i32
    %c0_i32_1 = arith.constant 0 : i32
    return %c0_i32, %c0_i32_0 : i32, i32
  }
  func.func @transform_9(%arg0: i32) -> (i32, i32) {
    %c0_i32 = arith.constant 0 : i32
    %c0_i32_0 = arith.constant 0 : i32
    %c0_i32_1 = arith.constant 0 : i32
    return %c0_i32, %c0_i32_0 : i32, i32
  }
  func.func @transform_10(%arg0: i32) -> (i32, i32) {
    %c0_i32 = arith.constant 0 : i32
    %c0_i32_0 = arith.constant 0 : i32
    %c0_i32_1 = arith.constant 0 : i32
    return %c0_i32, %c0_i32_0 : i32, i32
  }
  func.func @transform_11(%arg0: i32) -> (i32, i32) {
    %c0_i32 = arith.constant 0 : i32
    %c0_i32_0 = arith.constant 0 : i32
    %c0_i32_1 = arith.constant 0 : i32
    return %c0_i32, %c0_i32_0 : i32, i32
  }
  func.func @transform_12(%arg0: i32) -> (i32, i32, i32) {
    %c0_i32 = arith.constant 0 : i32
    %c0_i32_0 = arith.constant 0 : i32
    %c0_i32_1 = arith.constant 0 : i32
    return %arg0, %c0_i32, %c0_i32_0 : i32, i32, i32
  }
}

</mosaic_0001>

<bundles_post_ra>
// kernel: tpu_custom_call.1
= control target key start
LH: loop header
LB: loop body
LE: loop exit
PB: predicated region body
PF: predicated region fallthrough
CT: control target
= control target key end

     0   :  { %s7307_s0 = inlined_call_operand.hbm [shape: f32[2,4,1024], index: 0, kind: input, shape index: {}]   ;;  %s7308_s1 = inlined_call_operand.hbm [shape: f32[9,1024], index: 1, kind: input, shape index: {}]   ;;  %s7309_s2 = inlined_call_operand.vmem [shape: f32[4,1024], index: 2, kind: input, shape index: {}]   ;;  %s7310_s3 = inlined_call_operand.hbm [shape: f32[1024,256], index: 3, kind: input, shape index: {}]   ;;  %s7311_s4 = inlined_call_operand.vmem [shape: f32[4,9], index: 4, kind: input, shape index: {}]   ;;  %s7312_s5 = inlined_call_operand.vmem [shape: f32[8,4], index: 5, kind: input, shape index: {}]   ;;  %s7313_s6 = inlined_call_operand.vmem [shape: f32[8,1], index: 6, kind: input, shape index: {}]   ;;  %s7314_s7 = inlined_call_operand.vmem [shape: f32[8,9], index: 7, kind: input, shape index: {}]   ;;  %s7315_s8 = inlined_call_operand.vmem [shape: f32[8,8], index: 8, kind: input, shape index: {}]   ;;  %s7316_s9 = inlined_call_operand.vmem [shape: f32[8,1], index: 9, kind: input, shape index: {}]   ;;  %s7317_s10 = inlined_call_operand.vmem [shape: f32[8,4], index: 10, kind: input, shape index: {}]   ;;  %s7318_s11 = inlined_call_operand.vmem [shape: f32[8,1], index: 11, kind: input, shape index: {}]   ;;  %s7319_s12 = inlined_call_operand.hbm [shape: f32[2,8,256], index: 12, kind: output, shape index: {}]  }
   0x1   :  { %7456 = sst [smem:[#allocation105_spill]] %s7317_s10 }
   0x2   :  { %7457 = sst [smem:[#allocation106_spill]] %s7319_s12 }
   0x3   :  { %17 = vsyncpa [#allocation3], 0 }
   0x4   :  { %19 = vsyncpa [#allocation3 + $0x1], 0 }
   0x5   :  { %20 = vsyncpa [#allocation6], 0 }
   0x6   :  { %21 = vsyncpa [#allocation4], 0 }
   0x7   :  { %23 = vsyncpa [#allocation4 + $0x1], 0  ;;  %s4429_s21 = smov 0   ;;  %s4431_s22 = smov 0  }
   0x8   :  { %s4433_s23 = smov 0   ;;  %s4435_s24 = smov 0  }
   0x9 LB: > { %7458 = sst [smem:[#allocation12_spill]] %s4324_s21  ;;  %s4450_s25 = sadd.s32 4294967295, %s4336_s24   ;;  %s4336_s24 = sphi %s4435_s24, %s7772_s24   ;;  %s4332_s23 = sphi %s4433_s23, %s7771_s23   ;;  %s4328_s22 = sphi %s4431_s22, %s7770_s22   ;;  %s4324_s21 = sphi %s4429_s21, %s7769_s21  }
   0xa   : > { %s3744_s26 = sadd.s32 4294967294, %s4336_s24   ;;  %p49_p0 = scmp.ne.s32.totalorder %s4328_s22, %s4324_s21 }
   0xb   : > { %p7321_p1 = scmp.eq.s32.totalorder %s4450_s25, 0  ;;  %p310_p3 = scmp.eq.s32.totalorder %s3744_s26, 1 }
   0xc   : > { %p3745_p5 = scmp.ge.s32.totalorder %s4336_s24, 1  ;;  %p317_p7 = scmp.lt.s32.totalorder %s4336_s24, 3 }
   0xd   : > { %p4459_p4 = por %p7321_p1, %p49_p0  ;;  %p4464_p6 = por %p310_p3, %p49_p0 }
   0xe   : > { %p4469_p8 = pnand %p3745_p5, %p317_p7  ;;  %s4338_s30 = smov [#allocation5]  }
   0xf   : > { %s7459_s27 = scalar_select %p4459_p4, 1, 0 }
  0x10   : > { %s7460_s28 = scalar_select %p4464_p6, 1, 0 }
  0x11   : > { %s329_s13 = sshll.u32 %s4338_s30, 4  ;;  %p4052_p9 = pneg %p4469_p8  ;;  %s4473_s13 = int_to_ptr.vmem [resolvable:$true] %s329_s13 }
  0x12   : > { %7461 = sst [smem:[#allocation13_spill]] %s7460_s28  ;;  %s4339_s15 = smov [#allocation7]  }
  0x13   : > { %p4480_p11 = pnand %p4052_p9, %p7321_p1  ;;  %s345_s16 = sshll.u32 %s4339_s15, 4  ;;  %s4484_s16 = int_to_ptr.vmem [resolvable:$true] %s345_s16 }
  0x14   : > { %s4180_s19 = scalar_lea.hbm %s7308_s1, 2048 }
  0x15   : > { %p4181_p12 = scmp.ne.s32.totalorder %s7308_s1, %s4180_s19  ;;  %p4182_p13 = pneg %p4480_p11 }
  0x16   : > { %p4187_p5 = scmp.lt.u32.totalorder %s4180_s19, %s7308_s1 }
  0x17   : > { %p4183_p0 = pnand %p4182_p13, %p4181_p12 }
  0x19   : > { %p4184_p3 = pneg %p4183_p0 }
  0x1b   : > { %p4189_p7 = pnand %p4187_p5, %p4184_p3 }
  0x1d   : > { %4192 = shalt.err (!%p4189_p7)
}
  0x1e   : > { %s4193_s15 = scalar_lea.vmem %s4473_s13, 2048  ;;  %p4201_p2 = scmp.lt.s32.totalorder %s4473_s13, %s4473_s13 }
  0x1f   : > { %p4194_p9 = scmp.ne.s32.totalorder %s4473_s13, %s4193_s15  ;;  %p4202_p12 = scmp.lt.s32.totalorder %s4193_s15, %s4193_s15 }
  0x21   : > { %p4196_p10 = pnand %p4194_p9, %p4182_p13  ;;  %p4203_p0 = por %p4202_p12, %p4201_p2 }
  0x23   : > { %p4197_p1 = pneg %p4196_p10 }
  0x25   : > { %p4204_p6 = pnand %p4203_p0, %p4197_p1 }
  0x27   : > { %4207 = shalt.err (!%p4204_p6)
}
  0x28   : > { %s4340_s28 = smov 1024   ;;  %s4341_s17 = smov 64  }
  0x29   : > { %4055 = dma.hbm_to_vmem [thread:$0]  (!%p4480_p11), %s7308_s1, 2048, %s4473_s13, [#allocation6], %s4340_s28, %s4340_s28, %s4341_s17  }
  0x2a   : > { %s4208_s30 = scalar_lea.hbm %s7310_s3, 32768 }
  0x2b   : > { %p4209_p2 = scmp.ne.s32.totalorder %s7310_s3, %s4208_s30  ;;  %p4215_p10 = scmp.lt.u32.totalorder %s4208_s30, %s7310_s3 }
  0x2d   : > { %p4211_p1 = pnand %p4209_p2, %p4182_p13 }
  0x2f   : > { %p4212_p6 = pneg %p4211_p1 }
  0x31   : > { %p4217_p3 = pnand %p4215_p10, %p4212_p6 }
  0x33   : > { %4220 = shalt.err (!%p4217_p3)
}
  0x34   : > { %s4221_s13 = scalar_lea.vmem %s4484_s16, 32768  ;;  %p4229_p12 = scmp.lt.s32.totalorder %s4484_s16, %s4484_s16 }
  0x35   : > { %p4222_p5 = scmp.ne.s32.totalorder %s4484_s16, %s4221_s13  ;;  %p4230_p0 = scmp.lt.s32.totalorder %s4221_s13, %s4221_s13 }
  0x37   : > { %p4224_p7 = pnand %p4222_p5, %p4182_p13  ;;  %p4231_p2 = por %p4230_p0, %p4229_p12 }
  0x39   : > { %p4225_p9 = pneg %p4224_p7 }
  0x3b   : > { %p4232_p1 = pnand %p4231_p2, %p4225_p9 }
  0x3d   : > { %4235 = shalt.err (!%p4232_p1)
}
  0x3e   : > { %s4342_s10 = smov 256   ;;  %s4343_s12 = smov 16  }
  0x3f   : > { %4058 = dma.hbm_to_vmem [thread:$0]  (!%p4480_p11), %s7310_s3, 32768, %s4484_s16, [#allocation6], %s4342_s10, %s4342_s10, %s4343_s12  }
  0x40   : > { %s4539_s17 = sadd.s32 1, %s4336_s24   ;;  %s36_s19 = sadd.s32 1, %s4332_s23 }
  0x41   : > { %s33_s18 = ssub.s32 %s4336_s24, %s4539_s17  ;;  %p43_p6 = scmp.ne.s32.totalorder %s4332_s23, %s4328_s22 }
  0x42   : > { %p34_p13 = scmp.eq.s32.totalorder %s33_s18, 0  ;;  %p44_p10 = scmp.eq.s32.totalorder %s4336_s24, 0 }
  0x43   : > { %p7464_p5 = scmp.eq.s32.totalorder %s4450_s25, 1  ;;  %p4069_p9 = scmp.lt.s32.totalorder %s4336_s24, 2 }
  0x44   : > { %s4548_s20 = scalar_select %p34_p13, %s4332_s23, %s36_s19  }
  0x45   : > { %p45_p3 = por %p44_p10, %p43_p6  ;;  %p4552_p7 = por %p7464_p5, %p43_p6 }
  0x46   : > { %s383_s14 = sand.u32 1, %s4332_s23   ;;  %s3770_s16 = sshll.u32 %s4336_s24, 9 }
  0x47   : > { %s7465_s26 = scalar_select %p4552_p7, 1, 0 }
  0x48   : > { %s3749_s30 = sshll.u32 %s383_s14, 5  ;;  %s4562_s10 = scalar_lea.hbm %s7307_s0, %s3770_s16 }
  0x49   : > { %s387_s12 = scalar_lea.vmem [#allocation2], %s3749_s30  ;;  %p4566_p11 = pnand %p4069_p9, %p45_p3 }
  0x4a   : > { %s395_s21 = sshll.u32 %s387_s12, 4  ;;  %s384_s18 = scalar_lea.sflag [#allocation3], %s383_s14  ;;  %s4564_s21 = int_to_ptr.vmem [resolvable:$true] %s395_s21 }
  0x4b   : > { %s4236_s19 = scalar_lea.hbm %s4562_s10, 512  ;;  %p4238_p0 = pneg %p4566_p11 }
  0x4c   : > { %p4237_p12 = scmp.ne.s32.totalorder %s4562_s10, %s4236_s19  ;;  %s4241_s15 = scalar_lea.hbm %s7307_s0, 1024 }
  0x4d   : > { %p4242_p13 = scmp.lt.u32.totalorder %s4562_s10, %s7307_s0  ;;  %p4243_p6 = scmp.lt.u32.totalorder %s4241_s15, %s4236_s19 }
  0x4e   : > { %p4239_p2 = pnand %p4238_p0, %p4237_p12  ;;  %p4245_p3 = scmp.lt.u32.totalorder %s4236_s19, %s4562_s10 }
  0x4f   : > { %p4244_p10 = por %p4243_p6, %p4242_p13 }
  0x50   : > { %p4240_p1 = pneg %p4239_p2 }
  0x51   : > { %p4246_p5 = por %p4245_p3, %p4244_p10 }
  0x53   : > { %p4247_p9 = pnand %p4246_p5, %p4240_p1 }
  0x55   : > { %4250 = shalt.err (!%p4247_p9)
}
  0x56   : > { %s4251_s14 = scalar_lea.vmem %s4564_s21, 512  ;;  %s4344_s16 = smov [#allocation2]  }
  0x57   : > { %p4252_p12 = scmp.ne.s32.totalorder %s4564_s21, %s4251_s14  ;;  %s4256_s30 = sshll.u32 %s4344_s16, 4  ;;  %s4257_s30 = int_to_ptr.vmem [resolvable:$false] %s4256_s30 }
  0x58   : > { %s4258_s13 = scalar_lea.vmem %s4257_s30, 1024  ;;  %p4259_p4 = scmp.lt.s32.totalorder %s4564_s21, %s4257_s30 }
  0x59   : > { %p4254_p2 = pnand %p4252_p12, %p4238_p0  ;;  %p4260_p13 = scmp.lt.s32.totalorder %s4258_s13, %s4251_s14 }
  0x5b   : > { %p4255_p7 = pneg %p4254_p2  ;;  %p4261_p6 = por %p4260_p13, %p4259_p4 }
  0x5d   : > { %p4262_p10 = pnand %p4261_p6, %p4255_p7 }
  0x5f   : > { %4265 = shalt.err (!%p4262_p10)
}
  0x60   : > { %4062 = dma.hbm_to_vmem [thread:$0]  (!%p4566_p11), %s4562_s10, 512, %s4564_s21, %s384_s18  }
  0x61   : > { %404 = sbr.rel (%p4469_p8) target bundleno = 1345 (0x541), region = 68 }
  0x68   : > { %s4598_s19 = sand.u32 1, %s4328_s22   ;;  %p7467_p4 = scmp.ne.s32.totalorder %s7459_s27, 0 }
  0x69   : > { %s3753_s15 = sshll.u32 %s4598_s19, 5  ;;  %s407_s12 = scalar_lea.sflag [#allocation3], %s4598_s19 }
  0x6a   : > { %s4602_s14 = scalar_lea.vmem [#allocation2], %s3753_s15 }
  0x6b   : > { %4311 = dma.done.wait (%p7467_p4), %s407_s12, 512  }
  0x6c   : > { %4313 = vsyncadd (%p7467_p4), %s407_s12, 4294966784  ;;  %p7468_p7 = scmp.eq.s32.totalorder %s4450_s25, 0 }
  0x6e   : > { %4315 = dma.done.wait (%p7468_p7), [#allocation6], 34816   ;;  %p7469_p8 = pmov %p7468_p7 }
  0x6f   : > { %v7329_v0 = vmov 1   ;;  %v7326_v1 = vmov 4   ;;  %v4617_v2 = vld [vmem:[%s7311_s4] sm:$0xf]  ;;  %v460_v3 = vld [vmem:[%s4602_s14 + $0x8] sm:$0xff]  ;;  %v461_v7 = vld [vmem:[%s4602_s14 + $0x10] sm:$0xff]  ;;  %v502_v61 = vlaneseq }
  0x70   : > { %4317 = vsyncadd (%p7469_p8), [#allocation6], 4294932480  ;;  %4130 = vset.pattern.permute.xlu1 %v7329_v0  ;;  %4129 = vset.pattern.permute.xlu0 %v7326_v1  ;;  %v459_v4 = vld [vmem:[%s4602_s14] sm:$0xff]  ;;  %v4623_v5 = vmax.f32 %v460_v3, 0.0  ;;  %s4347_s27 = smov 17   ;;  %v4632_v8 = vmax.f32 %v461_v7, 0.0 }
  0x71   : > { %688 = vperm.xlu1 %4130, %v4617_v2   ;;  %497 = vperm.xlu0 %4129, %v4617_v2   ;;  %v4625_v6 = vmax.f32 %v459_v4, 0.0  ;;  %v462_v10 = vld [vmem:[%s4602_s14 + $0x18] sm:$0xff]  ;;  %v7338_v11 = vmov 5   ;;  %v7340_v12 = vmov 0   ;;  %s4350_s21 = smov 16   ;;  %s4351_s28 = smov 15  }
  0x72   : > { %v4645_v13 = vmax.f32 %v462_v10, 0.0  ;;  %v4649_v14 = vcombine.high %v4623_v5, %v4623_v5  ;;  %v4657_v15 = vcombine.high %v4632_v8, %v4632_v8  ;;  %s4352_s18 = smov 1   ;;  %v7336_v17 = vmov 6   ;;  %s4354_s16 = smov 127   ;;  %v484_v20 = vld [vmem:[%s7312_s5] sm:$0xff] }
  0x73   : > { %v4636_v9 = vcombine.high %v4625_v6, %v4625_v6  ;;  %v7334_v18 = vmov 7   ;;  %s4356_s30 = smov 113   ;;  %v7333_v19 = vmov 8   ;;  %s4358_s13 = smov 112   ;;  %v7331_v23 = vmov 2   ;;  %v485_v39 = vld [vmem:[%s7313_s6] sm:$0xff] }
  0x74   : > { %v4665_v16 = vcombine.high %v4645_v13, %v4645_v13  ;;  %s4359_s15 = smov 111   ;;  %v7327_v28 = vmov 3   ;;  %v486_v48 = vld [vmem:[%s7314_s7] sm:$0xff]  ;;  %v4882_v4 = vshrl.u32 %v502_v61, 7  ;;  %s7759_s12 = sld [smem:[#allocation105_spill]] }
  0x75   : > { %527 = vrot.lane.b32.xlu0 %v4623_v5, %s4347_s27  ;;  %523 = vrot.lane.b32.xlu1 %v4625_v6, %s4347_s27  ;;  %p7764_p0 = scmp.ne.s32.totalorder %s7465_s26, 0 }
  0x76   : > { %4131 = vset.pattern.permute.xlu0 %v7338_v11  ;;  %4137 = vset.pattern.permute.xlu1 %v7340_v12  ;;  %7486 = vst [vmem:[#allocation30_spill] sm:$0xff] %v4882_v4  ;;  %v4924_v11 = vld [vmem:[#allocation5 + $0x38] sm:$0xff] }
  0x79   : > { %531 = vrot.lane.b32.xlu0 %v4632_v8, %s4347_s27  ;;  %525 = vrot.lane.b32.xlu1 %v4636_v9, %s4347_s27 }
  0x7d   : > { %535 = vrot.lane.b32.xlu0 %v4645_v13, %s4347_s27  ;;  %529 = vrot.lane.b32.xlu1 %v4649_v14, %s4347_s27 }
  0x81   : > { %626 = vrot.lane.b32.xlu0 %v4623_v5, %s4350_s21  ;;  %533 = vrot.lane.b32.xlu1 %v4657_v15, %s4347_s27 }
  0x85   : > { %630 = vrot.lane.b32.xlu0 %v4632_v8, %s4350_s21  ;;  %537 = vrot.lane.b32.xlu1 %v4665_v16, %s4347_s27 }
  0x89   : > { %634 = vrot.lane.b32.xlu0 %v4645_v13, %s4350_s21  ;;  %622 = vrot.lane.b32.xlu1 %v4625_v6, %s4350_s21 }
  0x8d   : > { %723 = vrot.lane.b32.xlu0 %v4623_v5, %s4351_s28  ;;  %624 = vrot.lane.b32.xlu1 %v4636_v9, %s4350_s21 }
  0x91   : > { %727 = vrot.lane.b32.xlu0 %v4632_v8, %s4351_s28  ;;  %628 = vrot.lane.b32.xlu1 %v4649_v14, %s4350_s21 }
  0x95   : > { %731 = vrot.lane.b32.xlu0 %v4645_v13, %s4351_s28  ;;  %632 = vrot.lane.b32.xlu1 %v4657_v15, %s4350_s21 }
  0x99   : > { %979 = vperm.xlu0 %4131, %v4617_v2   ;;  %636 = vrot.lane.b32.xlu1 %v4665_v16, %s4350_s21 }
  0x9d   : > { %820 = vrot.lane.b32.xlu0 %v4623_v5, %s4352_s18  ;;  %719 = vrot.lane.b32.xlu1 %v4625_v6, %s4351_s28 }
  0x9e   : > { %4132 = vset.pattern.permute.xlu0 %v7336_v17  ;;  %v4922_v17 = vld [vmem:[#allocation5] sm:$0xff] }
  0xa1   : > { %824 = vrot.lane.b32.xlu0 %v4632_v8, %s4352_s18  ;;  %721 = vrot.lane.b32.xlu1 %v4636_v9, %s4351_s28 }
  0xa5   : > { %828 = vrot.lane.b32.xlu0 %v4645_v13, %s4352_s18  ;;  %725 = vrot.lane.b32.xlu1 %v4649_v14, %s4351_s28 }
  0xa9   : > { %1076 = vperm.xlu0 %4132, %v4617_v2   ;;  %729 = vrot.lane.b32.xlu1 %v4657_v15, %s4351_s28 }
  0xad   : > { %917 = vrot.lane.b32.xlu0 %v4623_v5, %s4354_s16  ;;  %733 = vrot.lane.b32.xlu1 %v4665_v16, %s4351_s28 }
  0xae   : > { %4133 = vset.pattern.permute.xlu0 %v7334_v18  ;;  %v4920_v18 = vsub.s32 5, %v4882_v4 }
  0xb0   : > { %7495 = vst [vmem:[#allocation39_spill] sm:$0xff] %v4920_v18 }
  0xb1   : > { %921 = vrot.lane.b32.xlu0 %v4632_v8, %s4354_s16  ;;  %816 = vrot.lane.b32.xlu1 %v4625_v6, %s4352_s18 }
  0xb5   : > { %925 = vrot.lane.b32.xlu0 %v4645_v13, %s4354_s16  ;;  %818 = vrot.lane.b32.xlu1 %v4636_v9, %s4352_s18 }
  0xb9   : > { %1173 = vperm.xlu0 %4133, %v4617_v2   ;;  %822 = vrot.lane.b32.xlu1 %v4649_v14, %s4352_s18 }
  0xbd   : > { %1014 = vrot.lane.b32.xlu0 %v4623_v5, %s4356_s30  ;;  %826 = vrot.lane.b32.xlu1 %v4657_v15, %s4352_s18 }
  0xbe   : > { %4134 = vset.pattern.permute.xlu0 %v7333_v19  ;;  %v4917_v19 = vsub.s32 3, %v4882_v4 }
  0xc0   : > { %7494 = vst [vmem:[#allocation38_spill] sm:$0xff] %v4917_v19 }
  0xc1   : > { %1018 = vrot.lane.b32.xlu0 %v4632_v8, %s4356_s30  ;;  %830 = vrot.lane.b32.xlu1 %v4665_v16, %s4352_s18 }
  0xc5   : > { %1022 = vrot.lane.b32.xlu0 %v4645_v13, %s4356_s30  ;;  %913 = vrot.lane.b32.xlu1 %v4625_v6, %s4354_s16 }
  0xc9   : > { %1270 = vperm.xlu0 %4134, %v4617_v2   ;;  %915 = vrot.lane.b32.xlu1 %v4636_v9, %s4354_s16 }
  0xcd   : > { %4135 = vset.pattern.permute.xlu0 %v7340_v12  ;;  %919 = vrot.lane.b32.xlu1 %v4649_v14, %s4354_s16  ;;  %v4927_v12 = vsub.s32 6, %v4882_v4 }
  0xce   : > { %591 = vperm.xlu0 %4135, %v4617_v2  }
  0xcf   : > { %7496 = vst [vmem:[#allocation40_spill] sm:$0xff] %v4927_v12 }
  0xd1   : > { %923 = vrot.lane.b32.xlu1 %v4657_v15, %s4354_s16 }
  0xd2   : > { %1111 = vrot.lane.b32.xlu0 %v4623_v5, %s4358_s13 }
  0xd5   : > { %927 = vrot.lane.b32.xlu1 %v4665_v16, %s4354_s16 }
  0xd6   : > { %1115 = vrot.lane.b32.xlu0 %v4632_v8, %s4358_s13 }
  0xd9   : > { %1010 = vrot.lane.b32.xlu1 %v4625_v6, %s4356_s30 }
  0xda   : > { %1119 = vrot.lane.b32.xlu0 %v4645_v13, %s4358_s13 }
  0xdd   : > { %1012 = vrot.lane.b32.xlu1 %v4636_v9, %s4356_s30 }
  0xde   : > { %1204 = vrot.lane.b32.xlu0 %v4625_v6, %s4359_s15 }
  0xe1   : > { %1016 = vrot.lane.b32.xlu1 %v4649_v14, %s4356_s30 }
  0xe2   : > { %1208 = vrot.lane.b32.xlu0 %v4623_v5, %s4359_s15 }
  0xe5   : > { %1020 = vrot.lane.b32.xlu1 %v4657_v15, %s4356_s30 }
  0xe6   : > { %1212 = vrot.lane.b32.xlu0 %v4632_v8, %s4359_s15 }
  0xe9   : > { %1024 = vrot.lane.b32.xlu1 %v4665_v16, %s4356_s30 }
  0xea   : > { %1216 = vrot.lane.b32.xlu0 %v4645_v13, %s4359_s15 }
  0xed   : > { %1107 = vrot.lane.b32.xlu1 %v4625_v6, %s4358_s13 }
  0xee   : > { %1303 = vperm.xlu0 %4135, %v484_v20  }
  0xf0   : > { %v4775_v21 = vpop.permute.xlu1 %688  ;;  %v4777_v22 = vpop.permute.xlu0 %497 }
  0xf1   : > { %1109 = vrot.lane.b32.xlu1 %v4636_v9, %s4358_s13 }
  0xf2   : > { %4136 = vset.pattern.permute.xlu0 %v7331_v23 }
  0xf3   : > { %785 = vperm.xlu0 %4136, %v4617_v2  }
  0xf4   : > { %v4783_v24 = vpop.permute.xlu0 %527  ;;  %v4785_v25 = vpop.permute.xlu1 %523 }
  0xf5   : > { %1113 = vrot.lane.b32.xlu1 %v4649_v14, %s4358_s13 }
  0xf7   : > { %1496 = vperm.xlu0 %4136, %v484_v20  }
  0xf8   : > { %v4789_v26 = vpop.permute.xlu0 %531  ;;  %v4791_v27 = vpop.permute.xlu1 %525 }
  0xf9   : > { %1117 = vrot.lane.b32.xlu1 %v4657_v15, %s4358_s13 }
  0xfb   : > { %4139 = vset.pattern.permute.xlu0 %v7327_v28 }
  0xfc   : > { %v4796_v29 = vpop.permute.xlu0 %535  ;;  %882 = vperm.xlu0 %4139, %v4617_v2   ;;  %v4799_v30 = vpop.permute.xlu1 %529  ;;  %v4362_v2 = vmov 839922192  }
  0xfd   : > { %1121 = vrot.lane.b32.xlu1 %v4665_v16, %s4358_s13  ;;  %v500_v3 = vunpack.c.l.s4 %v4362_v2  ;;  %v4902_v2 = vld [vmem:[#allocation5 + $0x20] sm:$0xff] }
  0xff   : > { %v501_v10 = vunpack.c.0.s8 %v500_v3 }
 0x100   : > { %v4803_v31 = vpop.permute.xlu0 %626  ;;  %v4805_v32 = vpop.permute.xlu1 %533 }
 0x101   : > { %1206 = vrot.lane.b32.xlu1 %v4636_v9, %s4359_s15 }
 0x104   : > { %v4809_v33 = vpop.permute.xlu0 %630  ;;  %v4811_v34 = vpop.permute.xlu1 %537 }
 0x105   : > { %1210 = vrot.lane.b32.xlu1 %v4649_v14, %s4359_s15  ;;  %v4889_v14 = vsub.s32 0, %v4882_v4 }
 0x107   : > { %7489 = vst [vmem:[#allocation33_spill] sm:$0xff] %v4889_v14 }
 0x108   : > { %v4815_v35 = vpop.permute.xlu0 %634  ;;  %v4817_v36 = vpop.permute.xlu1 %622 }
 0x109   : > { %1214 = vrot.lane.b32.xlu1 %v4657_v15, %s4359_s15  ;;  %v4891_v15 = vand.u32 127, %v502_v61  ;;  %v504_v61 = vsub.s32 %v501_v10, %v4882_v4 }
 0x10b   : > { %vm541_vm0 = vcmp.lt.s32.totalorder %v4891_v15, 17  ;;  %vm638_vm1 = vcmp.lt.s32.totalorder %v4891_v15, 16  ;;  %vm735_vm2 = vcmp.lt.s32.totalorder %v4891_v15, 15  ;;  %vm929_vm3 = vcmp.lt.s32.totalorder %v4891_v15, 127 }
 0x10c   : > { %v4821_v37 = vpop.permute.xlu0 %723  ;;  %v4823_v38 = vpop.permute.xlu1 %624  ;;  %vm832_vm4 = vcmp.lt.s32.totalorder %v4891_v15, 1  ;;  %vm1026_vm5 = vcmp.lt.s32.totalorder %v4891_v15, 113  ;;  %vm1123_vm6 = vcmp.lt.s32.totalorder %v4891_v15, 112  ;;  %vm1220_vm7 = vcmp.lt.s32.totalorder %v4891_v15, 111 }
 0x10d   : > { %1218 = vrot.lane.b32.xlu1 %v4665_v16, %s4359_s15  ;;  %v4893_v16 = vld [vmem:[#allocation5 + $0x8] sm:$0xff] }
 0x10e   : > { %v4934_v10 = vrot.slane %v4893_v16, %v4889_v14 }
 0x110   : > { %v4830_v40 = vpop.permute.xlu0 %727  ;;  %v4832_v41 = vpop.permute.xlu1 %628  ;;  %7498 = vst [vmem:[#allocation42_spill] sm:$0xff] %v4934_v10 }
 0x111   : > { %7470 = vst [vmem:[#allocation14_spill] sm:$0xff] %v4830_v40  ;;  %1392 = vperm.xlu1 %4137, %v485_v39   ;;  %v4897_v39 = vld [vmem:[#allocation5 + $0x18] sm:$0xff] }
 0x114   : > { %v4834_v42 = vpop.permute.xlu0 %731  ;;  %v4836_v43 = vpop.permute.xlu1 %632 }
 0x115   : > { %7471 = vst [vmem:[#allocation15_spill] sm:$0xff] %v4834_v42  ;;  %4138 = vset.pattern.permute.xlu1 %v7329_v0 }
 0x116   : > { %1404 = vperm.xlu1 %4138, %v484_v20  }
 0x118   : > { %v4839_v44 = vpop.permute.xlu0 %979  ;;  %v4841_v45 = vpop.permute.xlu1 %636 }
 0x119   : > { %7472 = vst [vmem:[#allocation16_spill] sm:$0xff] %v4839_v44  ;;  %v4959_v44 = vrot.slane %v4922_v17, %v4889_v14 }
 0x11a   : > { %4140 = vset.pattern.permute.xlu1 %v7327_v28  ;;  %v4906_v28 = vld [vmem:[#allocation5 + $0x30] sm:$0xff] }
 0x11b   : > { %1588 = vperm.xlu1 %4140, %v484_v20   ;;  %v4895_v20 = vld [vmem:[#allocation5 + $0x10] sm:$0xff]  ;;  %7504 = vst [vmem:[#allocation48_spill] sm:$0xff] %v4959_v44 }
 0x11c   : > { %v4844_v46 = vpop.permute.xlu0 %820  ;;  %v4846_v47 = vpop.permute.xlu1 %719 }
 0x11d   : > { %7473 = vst [vmem:[#allocation17_spill] sm:$0xff] %v4844_v46 }
 0x11f   : > { %4141 = vset.pattern.permute.xlu1 %v7326_v1  ;;  %v4904_v1 = vld [vmem:[#allocation5 + $0x28] sm:$0xff] }
 0x120   : > { %v4852_v49 = vpop.permute.xlu0 %824  ;;  %v4854_v50 = vpop.permute.xlu1 %721  ;;  %1689 = vperm.xlu1 %4141, %v486_v48  }
 0x121   : > { %7474 = vst [vmem:[#allocation18_spill] sm:$0xff] %v4852_v49 }
 0x124   : > { %v4856_v51 = vpop.permute.xlu0 %828  ;;  %v4858_v52 = vpop.permute.xlu1 %725  ;;  %4142 = vset.pattern.permute.xlu1 %v7329_v0 }
 0x125   : > { %7475 = vst [vmem:[#allocation19_spill] sm:$0xff] %v4856_v51  ;;  %1785 = vperm.xlu1 %4142, %v486_v48   ;;  %v4900_v48 = vsub.s32 1, %v4882_v4 }
 0x127   : > { %7490 = vst [vmem:[#allocation34_spill] sm:$0xff] %v4900_v48  ;;  %v4971_v51 = vrot.slane %v4895_v20, %v4900_v48  ;;  %v4999_v46 = vrot.slane %v4924_v11, %v4900_v48 }
 0x128   : > { %v4861_v53 = vpop.permute.xlu0 %1076  ;;  %v4863_v54 = vpop.permute.xlu1 %729 }
 0x129   : > { %7476 = vst [vmem:[#allocation20_spill] sm:$0xff] %v4861_v53  ;;  %7477 = vst [vmem:[#allocation21_spill] sm:$0xff] %v4863_v54  ;;  %4143 = vset.pattern.permute.xlu1 %v7331_v23  ;;  %v4914_v23 = vsub.s32 2, %v4882_v4  ;;  %v4938_v53 = vrot.slane %v4895_v20, %v4889_v14 }
 0x12a   : > { %7507 = vst [vmem:[#allocation51_spill] sm:$0xff] %v4971_v51  ;;  %7515 = vst [vmem:[#allocation59_spill] sm:$0xff] %v4999_v46 }
 0x12b   : > { %7493 = vst [vmem:[#allocation37_spill] sm:$0xff] %v4914_v23  ;;  %7499 = vst [vmem:[#allocation43_spill] sm:$0xff] %v4938_v53  ;;  %v5015_v54 = vrot.slane %v4902_v2, %v4914_v23  ;;  %v5023_v42 = vrot.slane %v4906_v28, %v4914_v23  ;;  %v5028_v40 = vrot.slane %v4922_v17, %v4914_v23 }
 0x12c   : > { %v4866_v55 = vpop.permute.xlu0 %917  ;;  %v4868_v56 = vpop.permute.xlu1 %733 }
 0x12d   : > { %7478 = vst [vmem:[#allocation22_spill] sm:$0xff] %v4866_v55  ;;  %7479 = vst [vmem:[#allocation23_spill] sm:$0xff] %v4868_v56  ;;  %v5007_v55 = vrot.slane %v4895_v20, %v4914_v23  ;;  %v5011_v56 = vrot.slane %v4897_v39, %v4914_v23 }
 0x12e   : > { %7519 = vst [vmem:[#allocation63_spill] sm:$0xff] %v5015_v54  ;;  %7521 = vst [vmem:[#allocation65_spill] sm:$0xff] %v5023_v42  ;;  %v5036_v54 = vrot.slane %v4893_v16, %v4917_v19 }
 0x12f   : > { %7517 = vst [vmem:[#allocation61_spill] sm:$0xff] %v5007_v55  ;;  %7518 = vst [vmem:[#allocation62_spill] sm:$0xff] %v5011_v56  ;;  %v5032_v56 = vrot.slane %v4924_v11, %v4914_v23 }
 0x130   : > { %v4870_v57 = vpop.permute.xlu0 %921  ;;  %v4872_v58 = vpop.permute.xlu1 %816  ;;  %7522 = vst [vmem:[#allocation66_spill] sm:$0xff] %v5028_v40  ;;  %7524 = vst [vmem:[#allocation68_spill] sm:$0xff] %v5036_v54  ;;  %v5060_v54 = vrot.slane %v4906_v28, %v4917_v19 }
 0x131   : > { %7480 = vst [vmem:[#allocation24_spill] sm:$0xff] %v4870_v57  ;;  %7481 = vst [vmem:[#allocation25_spill] sm:$0xff] %v4872_v58  ;;  %v4979_v57 = vrot.slane %v4897_v39, %v4900_v48  ;;  %v4987_v58 = vrot.slane %v4904_v1, %v4900_v48 }
 0x132   : > { %7523 = vst [vmem:[#allocation67_spill] sm:$0xff] %v5032_v56  ;;  %v5056_v56 = vrot.slane %v4904_v1, %v4917_v19  ;;  %7530 = vst [vmem:[#allocation74_spill] sm:$0xff] %v5060_v54  ;;  %v5081_v54 = vrot.slane %v4895_v20, %v4920_v18 }
 0x133   : > { %7510 = vst [vmem:[#allocation54_spill] sm:$0xff] %v4979_v57  ;;  %7512 = vst [vmem:[#allocation56_spill] sm:$0xff] %v4987_v58 }
 0x134   : > { %v4874_v59 = vpop.permute.xlu0 %925  ;;  %v4876_v60 = vpop.permute.xlu1 %818  ;;  %7529 = vst [vmem:[#allocation73_spill] sm:$0xff] %v5056_v56  ;;  %v505_v56 = vrot.slane %v4777_v22, %v504_v61  ;;  %7535 = vst [vmem:[#allocation79_spill] sm:$0xff] %v5081_v54  ;;  %v5099_v22 = vrot.slane %v4906_v28, %v4920_v18  ;;  %v5103_v61 = vrot.slane %v4924_v11, %v4920_v18 }
 0x135   : > { %7482 = vst [vmem:[#allocation26_spill] sm:$0xff] %v4874_v59  ;;  %7483 = vst [vmem:[#allocation27_spill] sm:$0xff] %v4876_v60  ;;  %v4955_v59 = vrot.slane %v4906_v28, %v4889_v14  ;;  %v4991_v60 = vrot.slane %v4906_v28, %v4900_v48 }
 0x136   : > { %7539 = vst [vmem:[#allocation83_spill] sm:$0xff] %v5099_v22  ;;  %7540 = vst [vmem:[#allocation84_spill] sm:$0xff] %v5103_v61  ;;  %v5121_v22 = vrot.slane %v4897_v39, %v4927_v12  ;;  %v5144_v61 = vmul.f32 %v505_v56, %v4625_v6  ;;  %v5163_v6 = vmul.f32 %v505_v56, %v4632_v8 }
 0x137   : > { %7503 = vst [vmem:[#allocation47_spill] sm:$0xff] %v4955_v59  ;;  %7513 = vst [vmem:[#allocation57_spill] sm:$0xff] %v4991_v60  ;;  %v641_v8 = vsel %vm638_vm1, %v4809_v33, %v4836_v43 }
 0x138   : > { %v4878_v62 = vpop.permute.xlu0 %1173  ;;  %v4880_v63 = vpop.permute.xlu1 %822  ;;  %7544 = vst [vmem:[#allocation88_spill] sm:$0xff] %v5121_v22  ;;  %v5141_v22 = vrot.slane %v4924_v11, %v4927_v12  ;;  %7549 = vst [vmem:[#allocation93_spill] sm:$0xff] %v5144_v61 }
 0x139   : > { %7484 = vst [vmem:[#allocation28_spill] sm:$0xff] %v4878_v62  ;;  %7485 = vst [vmem:[#allocation29_spill] sm:$0xff] %v4880_v63  ;;  %v4930_v62 = vsub.s32 7, %v4882_v4  ;;  %v4951_v4 = vrot.slane %v4904_v1, %v4889_v14 }
 0x13a   : > { %7548 = vst [vmem:[#allocation92_spill] sm:$0xff] %v5141_v22  ;;  %v5166_v22 = vmul.f32 %v505_v56, %v4645_v13 }
 0x13b   : > { %7497 = vst [vmem:[#allocation41_spill] sm:$0xff] %v4930_v62  ;;  %7502 = vst [vmem:[#allocation46_spill] sm:$0xff] %v4951_v4  ;;  %v5172_v61 = vrot.slane %v4895_v20, %v4930_v62 }
 0x13c   : > { %v4884_v7 = vpop.permute.xlu0 %1014  ;;  %v4886_v9 = vpop.permute.xlu1 %826 }
 0x13d   : > { %7487 = vst [vmem:[#allocation31_spill] sm:$0xff] %v4884_v7  ;;  %7488 = vst [vmem:[#allocation32_spill] sm:$0xff] %v4886_v9  ;;  %v4947_v7 = vrot.slane %v4902_v2, %v4889_v14  ;;  %v4967_v9 = vrot.slane %v4893_v16, %v4900_v48 }
 0x13e   : > { %7552 = vst [vmem:[#allocation96_spill] sm:$0xff] %v5172_v61 }
 0x13f   : > { %7501 = vst [vmem:[#allocation45_spill] sm:$0xff] %v4947_v7  ;;  %7506 = vst [vmem:[#allocation50_spill] sm:$0xff] %v4967_v9 }
 0x140   : > { %v4908_v3 = vpop.permute.xlu0 %1018  ;;  %v4910_v0 = vpop.permute.xlu1 %830 }
 0x141   : > { %7491 = vst [vmem:[#allocation35_spill] sm:$0xff] %v4908_v3  ;;  %7492 = vst [vmem:[#allocation36_spill] sm:$0xff] %v4910_v0  ;;  %v4943_v3 = vrot.slane %v4897_v39, %v4889_v14  ;;  %v4963_v0 = vrot.slane %v4924_v11, %v4889_v14  ;;  %v4983_v14 = vrot.slane %v4902_v2, %v4900_v48 }
 0x143   : > { %7500 = vst [vmem:[#allocation44_spill] sm:$0xff] %v4943_v3  ;;  %7505 = vst [vmem:[#allocation49_spill] sm:$0xff] %v4963_v0 }
 0x144   : > { %v4973_v49 = vpop.permute.xlu0 %1022  ;;  %v4975_v63 = vpop.permute.xlu1 %913  ;;  %7511 = vst [vmem:[#allocation55_spill] sm:$0xff] %v4983_v14 }
 0x145   : > { %7508 = vst [vmem:[#allocation52_spill] sm:$0xff] %v4973_v49  ;;  %7509 = vst [vmem:[#allocation53_spill] sm:$0xff] %v4975_v63  ;;  %v4995_v49 = vrot.slane %v4922_v17, %v4900_v48  ;;  %v5003_v63 = vrot.slane %v4893_v16, %v4914_v23  ;;  %v5019_v48 = vrot.slane %v4904_v1, %v4914_v23 }
 0x146   : > { %v5052_v23 = vrot.slane %v4902_v2, %v4917_v19 }
 0x147   : > { %7514 = vst [vmem:[#allocation58_spill] sm:$0xff] %v4995_v49  ;;  %7516 = vst [vmem:[#allocation60_spill] sm:$0xff] %v5003_v63  ;;  %v5048_v63 = vrot.slane %v4897_v39, %v4917_v19 }
 0x148   : > { %7520 = vst [vmem:[#allocation64_spill] sm:$0xff] %v5019_v48  ;;  %v5040_v48 = vrot.slane %v4895_v20, %v4917_v19  ;;  %v5042_v55 = vpop.permute.xlu1 %915  ;;  %v5044_v42 = vpop.permute.xlu0 %1270  ;;  %7528 = vst [vmem:[#allocation72_spill] sm:$0xff] %v5052_v23  ;;  %v5076_v23 = vrot.slane %v4893_v16, %v4920_v18 }
 0x149   : > { %7526 = vst [vmem:[#allocation70_spill] sm:$0xff] %v5044_v42  ;;  %7527 = vst [vmem:[#allocation71_spill] sm:$0xff] %v5048_v63  ;;  %v5068_v42 = vrot.slane %v4924_v11, %v4917_v19  ;;  %v5072_v63 = vrot.slane %v4922_v17, %v4920_v18 }
 0x14a   : > { %7525 = vst [vmem:[#allocation69_spill] sm:$0xff] %v5040_v48  ;;  %v5064_v48 = vrot.slane %v4922_v17, %v4917_v19  ;;  %7534 = vst [vmem:[#allocation78_spill] sm:$0xff] %v5076_v23  ;;  %v5089_v19 = vrot.slane %v4902_v2, %v4920_v18 }
 0x14b   : > { %7532 = vst [vmem:[#allocation76_spill] sm:$0xff] %v5068_v42  ;;  %7533 = vst [vmem:[#allocation77_spill] sm:$0xff] %v5072_v63  ;;  %v5095_v63 = vrot.slane %v4904_v1, %v4920_v18 }
 0x14c   : > { %7531 = vst [vmem:[#allocation75_spill] sm:$0xff] %v5064_v48  ;;  %v5085_v48 = vrot.slane %v4897_v39, %v4920_v18  ;;  %7537 = vst [vmem:[#allocation81_spill] sm:$0xff] %v5089_v19  ;;  %v5091_v42 = vpop.permute.xlu1 %919  ;;  %v5113_v19 = vrot.slane %v4893_v16, %v4927_v12  ;;  %v5125_v18 = vrot.slane %v4902_v2, %v4927_v12 }
 0x14d   : > { %7538 = vst [vmem:[#allocation82_spill] sm:$0xff] %v5095_v63  ;;  %v5109_v54 = vpop.permute.xlu0 %591  ;;  %v5117_v63 = vrot.slane %v4895_v20, %v4927_v12  ;;  %v639_v20 = vsel %vm638_vm1, %v4815_v35, %v4841_v45 }
 0x14e   : > { %7536 = vst [vmem:[#allocation80_spill] sm:$0xff] %v5085_v48  ;;  %v5107_v48 = vrot.slane %v4922_v17, %v4927_v12  ;;  %7542 = vst [vmem:[#allocation86_spill] sm:$0xff] %v5113_v19  ;;  %v5133_v19 = vrot.slane %v4904_v1, %v4927_v12 }
 0x14f   : > { %7543 = vst [vmem:[#allocation87_spill] sm:$0xff] %v5117_v63  ;;  %7545 = vst [vmem:[#allocation89_spill] sm:$0xff] %v5125_v18  ;;  %v5137_v63 = vrot.slane %v4906_v28, %v4927_v12  ;;  %v547_v18 = vsel %vm541_vm0, %v4791_v27, %v4783_v24  ;;  %v5160_v12 = vmul.f32 %v505_v56, %v4623_v5 }
 0x150   : > { %7541 = vst [vmem:[#allocation85_spill] sm:$0xff] %v5107_v48  ;;  %v548_v48 = vsel %vm541_vm0, %v4785_v25, %v4791_v27  ;;  %7546 = vst [vmem:[#allocation90_spill] sm:$0xff] %v5133_v19  ;;  %v5153_v19 = vrot.slane %v4922_v17, %v4930_v62  ;;  %v5168_v27 = vpop.permute.xlu1 %923  ;;  %v643_v5 = vsel %vm638_vm1, %v4803_v31, %v4832_v41 }
 0x151   : > { %7547 = vst [vmem:[#allocation91_spill] sm:$0xff] %v5137_v63  ;;  %v5157_v63 = vrot.slane %v4893_v16, %v4930_v62  ;;  %v5175_v17 = vmul.f32 %v4934_v10, %v548_v48  ;;  %v5185_v13 = vpop.permute.xlu0 %1111  ;;  %v5189_v56 = vrot.slane %v4897_v39, %v4930_v62  ;;  %v5192_v16 = vmul.f32 %v4938_v53, %v547_v18 }
 0x152   : > { %7550 = vst [vmem:[#allocation94_spill] sm:$0xff] %v5153_v19  ;;  %v646_v48 = vsel %vm638_vm1, %v4841_v45, %v4817_v36  ;;  %v5204_v10 = vrot.slane %v4902_v2, %v4930_v62  ;;  %v545_v18 = vsel %vm541_vm0, %v4799_v30, %v4789_v26  ;;  %v546_v39 = vsel %vm541_vm0, %v4783_v24, %v4799_v30 }
 0x153   : > { %7551 = vst [vmem:[#allocation95_spill] sm:$0xff] %v5157_v63  ;;  %7553 = vst [vmem:[#allocation97_spill] sm:$0xff] %v5189_v56  ;;  %v644_v53 = vsel %vm638_vm1, %v4823_v38, %v4803_v31  ;;  %v642_v45 = vsel %vm638_vm1, %v4832_v41, %v4809_v33  ;;  %v645_v2 = vsel %vm638_vm1, %v4817_v36, %v4823_v38 }
 0x154   : > { %7554 = vst [vmem:[#allocation98_spill] sm:$0xff] %v5204_v10  ;;  %v682_v10 = vmul.f32 %v4979_v57, %v643_v5  ;;  %v640_v24 = vsel %vm638_vm1, %v4836_v43, %v4815_v35  ;;  %v684_v30 = vmul.f32 %v4987_v58, %v641_v8  ;;  %v5233_v31 = vpop.permute.xlu1 %927  ;;  %v544_v33 = vsel %vm541_vm0, %v4789_v26, %v4805_v32 }
 0x155   : > { %v679_v36 = vmul.f32 %v4995_v49, %v646_v48  ;;  %v686_v38 = vmul.f32 %v4999_v46, %v639_v20  ;;  %v5242_v41 = vpop.permute.xlu0 %1115  ;;  %v5246_v35 = vrot.slane %v4904_v1, %v4930_v62  ;;  %v5249_v43 = vmul.f32 %v4943_v3, %v546_v39  ;;  %v7576_v3 = vld [vmem:[#allocation64_spill] sm:$0xff] }
 0x156   : > { %v5252_v5 = vmul.f32 %v4947_v7, %v545_v18  ;;  %v681_v8 = vmul.f32 %v4971_v51, %v644_v53  ;;  %v683_v26 = vmul.f32 %v4983_v14, %v642_v45  ;;  %v680_v48 = vmul.f32 %v4967_v9, %v645_v2  ;;  %v7564_v14 = vld [vmem:[#allocation62_spill] sm:$0xff]  ;;  %v7566_v51 = vld [vmem:[#allocation21_spill] sm:$0xff]  ;;  %v7571_v9 = vld [vmem:[#allocation27_spill] sm:$0xff] }
 0x157   : > { %7555 = vst [vmem:[#allocation99_spill] sm:$0xff] %v5246_v35  ;;  %v685_v20 = vmul.f32 %v4991_v60, %v640_v24  ;;  %v5260_v46 = vrot.slane %v4906_v28, %v4930_v62  ;;  %v5264_v1 = vrot.slane %v4924_v11, %v4930_v62  ;;  %v543_v18 = vsel %vm541_vm0, %v4805_v32, %v4796_v29  ;;  %v7560_v60 = vld [vmem:[#allocation60_spill] sm:$0xff] }
 0x158   : > { %v5271_v53 = vmul.f32 %v4951_v4, %v544_v33  ;;  %v5274_v39 = vmul.f32 %v4775_v21, %v682_v10  ;;  %v5277_v45 = vmul.f32 %v4775_v21, %v684_v30  ;;  %v5279_v28 = vpop.permute.xlu1 %1010  ;;  %v542_v11 = vsel %vm541_vm0, %v4796_v29, %v4811_v34  ;;  %v7574_v4 = vld [vmem:[#allocation63_spill] sm:$0xff]  ;;  %v7586_v56 = vld [vmem:[#allocation80_spill] sm:$0xff] }
 0x159   : > { %7556 = vst [vmem:[#allocation100_spill] sm:$0xff] %v5260_v46  ;;  %7557 = vst [vmem:[#allocation101_spill] sm:$0xff] %v5264_v1  ;;  %v549_v32 = vsel %vm541_vm0, %v4811_v34, %v4785_v25  ;;  %v5290_v2 = vmul.f32 %v4775_v21, %v679_v36  ;;  %v5293_v10 = vmul.f32 %v4775_v21, %v686_v38  ;;  %v5295_v24 = vpop.permute.xlu0 %1119  ;;  %v7578_v1 = vld [vmem:[#allocation65_spill] sm:$0xff] }
 0x15a   : > { %7558 = vst [vmem:[#allocation102_spill] sm:$0xff] %v5277_v45  ;;  %7559 = vst [vmem:[#allocation103_spill] sm:$0xff] %v5295_v24  ;;  %v5298_v30 = vmul.f32 %v4775_v21, %v681_v8  ;;  %v5301_v33 = vmul.f32 %v4775_v21, %v683_v26  ;;  %v741_v29 = vsel %vm735_vm2, %v4854_v50, %v4821_v37  ;;  %v7584_v24 = vld [vmem:[#allocation69_spill] sm:$0xff]  ;;  %v7587_v45 = vld [vmem:[#allocation18_spill] sm:$0xff] }
 0x15b   : > { %v742_v25 = vsel %vm735_vm2, %v4846_v47, %v4854_v50  ;;  %v588_v34 = vmul.f32 %v4955_v59, %v543_v18  ;;  %v5313_v36 = vmul.f32 %v4775_v21, %v680_v48  ;;  %v5316_v38 = vmul.f32 %v4775_v21, %v685_v20  ;;  %v7563_v50 = vld [vmem:[#allocation14_spill] sm:$0xff]  ;;  %v7565_v21 = vld [vmem:[#allocation15_spill] sm:$0xff] }
 0x15c   : > { %v740_v8 = vsel %vm735_vm2, %v4821_v37, %v4858_v52  ;;  %v582_v26 = vmul.f32 %v4959_v44, %v549_v32  ;;  %v589_v49 = vmul.f32 %v4963_v0, %v542_v11  ;;  %v5328_v48 = vpop.permute.xlu1 %1012  ;;  %v5335_v37 = vmul.f32 %v7560_v60, %v742_v25  ;;  %v7561_v32 = vld [vmem:[#allocation61_spill] sm:$0xff]  ;;  %v7567_v25 = vld [vmem:[#allocation23_spill] sm:$0xff] }
 0x15d   : > { %v5338_v58 = vmul.f32 %v7561_v32, %v741_v29  ;;  %v5340_v11 = vpop.permute.xlu0 %1204  ;;  %v739_v18 = vsel %vm735_vm2, %v4858_v52, %v7563_v50  ;;  %v5347_v57 = vmul.f32 %v7564_v14, %v740_v8  ;;  %v737_v20 = vsel %vm735_vm2, %v7566_v51, %v7565_v21  ;;  %v7568_v8 = vld [vmem:[#allocation22_spill] sm:$0xff]  ;;  %v7569_v32 = vld [vmem:[#allocation53_spill] sm:$0xff] }
 0x15e   : > { %7562 = vst [vmem:[#allocation104_spill] sm:$0xff] %v5340_v11  ;;  %v738_v29 = vsel %vm735_vm2, %v7563_v50, %v7566_v51  ;;  %v736_v60 = vsel %vm735_vm2, %v7565_v21, %v7567_v25  ;;  %v743_v52 = vsel %vm735_vm2, %v7567_v25, %v4846_v47  ;;  %v935_v14 = vsel %vm929_vm3, %v5042_v55, %v7568_v8  ;;  %v7570_v50 = vld [vmem:[#allocation17_spill] sm:$0xff]  ;;  %v7573_v25 = vld [vmem:[#allocation24_spill] sm:$0xff] }
 0x15f   : > { %v936_v51 = vsel %vm929_vm3, %v7569_v32, %v5042_v55  ;;  %v838_v21 = vsel %vm832_vm4, %v7571_v9, %v7570_v50  ;;  %v7572_v0 = vld [vmem:[#allocation25_spill] sm:$0xff]  ;;  %v933_v59 = vsel %vm929_vm3, %v5091_v42, %v7573_v25  ;;  %v934_v55 = vsel %vm929_vm3, %v7568_v8, %v5091_v42 }
 0x160   : > { %v839_v47 = vsel %vm832_vm4, %v7572_v0, %v7571_v9  ;;  %v1017_v44 = vpop.permute.xlu1 %1016  ;;  %v5390_v7 = vmul.f32 %v7574_v4, %v739_v18  ;;  %v5393_v62 = vmul.f32 %v7576_v3, %v738_v29  ;;  %v5396_v46 = vmul.f32 %v7578_v1, %v737_v20  ;;  %v7579_v9 = vld [vmem:[#allocation29_spill] sm:$0xff]  ;;  %v7581_v18 = vld [vmem:[#allocation67_spill] sm:$0xff]  ;;  %v7583_v1 = vld [vmem:[#allocation68_spill] sm:$0xff] }
 0x161   : > { %v837_v35 = vsel %vm832_vm4, %v7570_v50, %v7579_v9  ;;  %v5403_v11 = vpop.permute.xlu0 %1208  ;;  %v5406_v42 = vmul.f32 %v5028_v40, %v743_v52  ;;  %v5409_v8 = vmul.f32 %v7581_v18, %v736_v60  ;;  %v7582_v29 = vld [vmem:[#allocation77_spill] sm:$0xff]  ;;  %v971_v20 = vmul.f32 %v5076_v23, %v935_v14  ;;  %v7585_v50 = vld [vmem:[#allocation79_spill] sm:$0xff]  ;;  %v7591_v14 = vld [vmem:[#allocation32_spill] sm:$0xff] }
 0x162   : > { %7575 = vst [vmem:[#allocation14_spill] sm:$0xff] %v5390_v7  ;;  %7577 = vst [vmem:[#allocation15_spill] sm:$0xff] %v5393_v62  ;;  %v970_v3 = vmul.f32 %v7582_v29, %v936_v51  ;;  %v5414_v4 = vmul.f32 %v7583_v1, %v839_v47  ;;  %v5417_v62 = vmul.f32 %v7584_v24, %v838_v21  ;;  %v7588_v52 = vld [vmem:[#allocation71_spill] sm:$0xff]  ;;  %v7600_v1 = vld [vmem:[#allocation74_spill] sm:$0xff] }
 0x163   : > { %7580 = vst [vmem:[#allocation21_spill] sm:$0xff] %v5403_v11  ;;  %v972_v7 = vmul.f32 %v7585_v50, %v934_v55  ;;  %v973_v11 = vmul.f32 %v7586_v56, %v933_v59  ;;  %v836_v60 = vsel %vm832_vm4, %v7579_v9, %v7587_v45  ;;  %v5426_v40 = vmul.f32 %v7588_v52, %v837_v35  ;;  %v7590_v51 = vld [vmem:[#allocation19_spill] sm:$0xff]  ;;  %v7592_v59 = vld [vmem:[#allocation36_spill] sm:$0xff] }
 0x164   : > { %v834_v47 = vsel %vm832_vm4, %v7591_v14, %v7590_v51  ;;  %v835_v21 = vsel %vm832_vm4, %v7587_v45, %v7591_v14  ;;  %v1021_v55 = vpop.permute.xlu1 %1020  ;;  %v833_v23 = vsel %vm832_vm4, %v7590_v51, %v7592_v59  ;;  %v840_v35 = vsel %vm832_vm4, %v7592_v59, %v7572_v0  ;;  %v7594_v50 = vld [vmem:[#allocation16_spill] sm:$0xff] }
 0x165   : > { %7589 = vst [vmem:[#allocation23_spill] sm:$0xff] %v5426_v40  ;;  %v594_v9 = vmul.f32 %v5109_v54, %v582_v26  ;;  %v595_v56 = vmul.f32 %v5109_v54, %v5175_v17  ;;  %v5447_v18 = vpop.permute.xlu0 %1212  ;;  %v5450_v45 = vmul.f32 %v7594_v50, %v970_v3  ;;  %v5453_v14 = vmul.f32 %v7594_v50, %v971_v20  ;;  %v7595_v17 = vld [vmem:[#allocation26_spill] sm:$0xff] }
 0x166   : > { %7593 = vst [vmem:[#allocation22_spill] sm:$0xff] %v5447_v18  ;;  %v596_v51 = vmul.f32 %v5109_v54, %v5192_v16  ;;  %v597_v29 = vmul.f32 %v5109_v54, %v5249_v43  ;;  %v5460_v0 = vmul.f32 %v7594_v50, %v972_v7  ;;  %v5463_v26 = vmul.f32 %v7594_v50, %v973_v11  ;;  %v7596_v16 = vld [vmem:[#allocation72_spill] sm:$0xff]  ;;  %v7598_v43 = vld [vmem:[#allocation73_spill] sm:$0xff] }
 0x167   : > { %v931_v3 = vsel %vm929_vm3, %v5168_v27, %v7595_v17  ;;  %v932_v20 = vsel %vm929_vm3, %v7573_v25, %v5168_v27  ;;  %v5474_v59 = vmul.f32 %v7596_v16, %v836_v60  ;;  %v5477_v52 = vmul.f32 %v7598_v43, %v835_v21  ;;  %v7602_v21 = vld [vmem:[#allocation75_spill] sm:$0xff]  ;;  %v7604_v16 = vld [vmem:[#allocation81_spill] sm:$0xff] }
 0x168   : > { %v600_v7 = vmul.f32 %v5109_v54, %v588_v34  ;;  %v601_v11 = vmul.f32 %v5109_v54, %v589_v49  ;;  %v1025_v24 = vpop.permute.xlu1 %1024  ;;  %v5483_v18 = vmul.f32 %v7600_v1, %v834_v47  ;;  %v598_v40 = vmul.f32 %v5109_v54, %v5252_v5  ;;  %v7603_v34 = vld [vmem:[#allocation76_spill] sm:$0xff] }
 0x169   : > { %7597 = vst [vmem:[#allocation53_spill] sm:$0xff] %v5474_v59  ;;  %7599 = vst [vmem:[#allocation17_spill] sm:$0xff] %v5477_v52  ;;  %v599_v27 = vmul.f32 %v5109_v54, %v5271_v53  ;;  %v5489_v25 = vpop.permute.xlu0 %1216  ;;  %v610_v60 = vcombine.low %v594_v9, %v595_v56  ;;  %v5492_v43 = vmul.f32 %v7602_v21, %v840_v35  ;;  %v7605_v59 = vld [vmem:[#allocation82_spill] sm:$0xff]  ;;  %v7606_v53 = vld [vmem:[#allocation31_spill] sm:$0xff] }
 0x16a   : > { %7601 = vst [vmem:[#allocation27_spill] sm:$0xff] %v5489_v25  ;;  %v5495_v49 = vmul.f32 %v7603_v34, %v833_v23  ;;  %v974_v52 = vmul.f32 %v7604_v16, %v932_v20  ;;  %v975_v47 = vmul.f32 %v7605_v59, %v931_v3  ;;  %v930_v54 = vsel %vm929_vm3, %v7595_v17, %v5233_v31  ;;  %v7607_v17 = vld [vmem:[#allocation35_spill] sm:$0xff]  ;;  %v7611_v34 = vld [vmem:[#allocation84_spill] sm:$0xff] }
 0x16b   : > { %v611_v56 = vcombine.low %v596_v51, %v597_v29  ;;  %v937_v23 = vsel %vm929_vm3, %v5233_v31, %v7569_v32  ;;  %v1032_v35 = vsel %vm1026_vm5, %v5328_v48, %v7606_v53  ;;  %v1033_v9 = vsel %vm1026_vm5, %v5279_v28, %v5328_v48  ;;  %v7609_v51 = vld [vmem:[#allocation93_spill] sm:$0xff] }
 0x16c   : > { %v5519_v3 = vpop.permute.xlu1 %1107  ;;  %v613_v20 = vcombine.low %v600_v7, %v601_v11  ;;  %v1030_v29 = vsel %vm1026_vm5, %v1017_v44, %v7607_v17  ;;  %v1031_v31 = vsel %vm1026_vm5, %v7606_v53, %v1017_v44  ;;  %v618_v5 = vadd.f32 %v610_v60, %v7609_v51  ;;  %v7610_v7 = vld [vmem:[#allocation83_spill] sm:$0xff]  ;;  %v7612_v44 = vld [vmem:[#allocation85_spill] sm:$0xff]  ;;  %v7614_v60 = vld [vmem:[#allocation52_spill] sm:$0xff] }
 0x16d   : > { %v5527_v32 = vpop.permute.xlu0 %1303  ;;  %v612_v1 = vcombine.low %v598_v40, %v599_v27  ;;  %v5531_v16 = vmul.f32 %v7594_v50, %v974_v52  ;;  %v5534_v48 = vmul.f32 %v7594_v50, %v975_v47  ;;  %v976_v11 = vmul.f32 %v7610_v7, %v930_v54  ;;  %v7615_v52 = vld [vmem:[#allocation87_spill] sm:$0xff]  ;;  %v7616_v47 = vld [vmem:[#allocation88_spill] sm:$0xff] }
 0x16e   : > { %7608 = vst [vmem:[#allocation25_spill] sm:$0xff] %v5527_v32  ;;  %v1029_v59 = vsel %vm1026_vm5, %v7607_v17, %v1021_v55  ;;  %v977_v21 = vmul.f32 %v7611_v34, %v937_v23  ;;  %v1067_v53 = vmul.f32 %v7612_v44, %v1033_v9  ;;  %v7613_v32 = vld [vmem:[#allocation86_spill] sm:$0xff]  ;;  %v1028_v40 = vsel %vm1026_vm5, %v1021_v55, %v7614_v60  ;;  %v7617_v9 = vld [vmem:[#allocation89_spill] sm:$0xff] }
 0x16f   : > { %v1068_v25 = vmul.f32 %v7613_v32, %v1032_v35  ;;  %v1069_v27 = vmul.f32 %v7615_v52, %v1031_v31  ;;  %v1070_v51 = vmul.f32 %v7616_v47, %v1030_v29  ;;  %v1027_v54 = vsel %vm1026_vm5, %v7614_v60, %v1025_v24  ;;  %v7619_v47 = vld [vmem:[#allocation90_spill] sm:$0xff] }
 0x170   : > { %v1034_v23 = vsel %vm1026_vm5, %v1025_v24, %v5279_v28  ;;  %v1110_v17 = vpop.permute.xlu1 %1109  ;;  %v1071_v44 = vmul.f32 %v7617_v9, %v1029_v59  ;;  %v621_v35 = vadd.f32 %v613_v20, %v5166_v22  ;;  %v7618_v55 = vcombine.low %v5290_v2, %v5313_v36  ;;  %v7620_v22 = vld [vmem:[#allocation20_spill] sm:$0xff]  ;;  %v7621_v2 = vld [vmem:[#allocation91_spill] sm:$0xff] }
 0x171   : > { %v619_v31 = vadd.f32 %v611_v56, %v5160_v12  ;;  %v5563_v60 = vmul.f32 %v7594_v50, %v976_v11  ;;  %v1072_v52 = vmul.f32 %v7619_v47, %v1028_v40  ;;  %v620_v24 = vadd.f32 %v612_v1, %v5163_v6  ;;  %v7622_v12 = vld [vmem:[#allocation92_spill] sm:$0xff] }
 0x172   : > { %v715_v32 = vadd.f32 %v7618_v55, %v618_v5  ;;  %v786_v28 = vpop.permute.xlu0 %785  ;;  %v5568_v59 = vmul.f32 %v7594_v50, %v977_v21  ;;  %v5571_v20 = vmul.f32 %v7620_v22, %v1067_v53  ;;  %v1073_v36 = vmul.f32 %v7621_v2, %v1027_v54 }
 0x173   : > { %v1074_v5 = vmul.f32 %v7622_v12, %v1034_v23  ;;  %v5576_v56 = vmul.f32 %v7620_v22, %v1068_v25  ;;  %v5579_v11 = vmul.f32 %v7620_v22, %v1069_v27  ;;  %v5582_v40 = vmul.f32 %v7620_v22, %v1070_v51 }
 0x174   : > { %v1130_v6 = vsel %vm1123_vm6, %v5519_v3, %v1110_v17  ;;  %v1114_v1 = vpop.permute.xlu1 %1113  ;;  %v5588_v50 = vmul.f32 %v7620_v22, %v1071_v44  ;;  %v1129_v21 = vsel %vm1123_vm6, %v1110_v17, %v5185_v13  ;;  %v788_v25 = vmul.f32 %v786_v28, %v5406_v42 }
 0x175   : > { %v789_v53 = vmul.f32 %v786_v28, %v5335_v37  ;;  %v5596_v27 = vmul.f32 %v7620_v22, %v1072_v52  ;;  %v1128_v51 = vsel %vm1123_vm6, %v5185_v13, %v1114_v1  ;;  %v790_v44 = vmul.f32 %v786_v28, %v5338_v58 }
 0x176   : > { %v5601_v54 = vpop.permute.xlu0 %1496  ;;  %v791_v23 = vmul.f32 %v786_v28, %v5347_v57  ;;  %v5607_v17 = vmul.f32 %v7620_v22, %v1073_v36  ;;  %v5610_v37 = vmul.f32 %v7620_v22, %v1074_v5  ;;  %v1164_v42 = vmul.f32 %v5153_v19, %v1130_v6 }
 0x177   : > { %v1127_v13 = vsel %vm1123_vm6, %v1114_v1, %v5242_v41  ;;  %v1165_v52 = vmul.f32 %v5157_v63, %v1129_v21  ;;  %v794_v29 = vmul.f32 %v786_v28, %v5396_v46  ;;  %v795_v58 = vmul.f32 %v786_v28, %v5409_v8  ;;  %v7625_v1 = vld [vmem:[#allocation102_spill] sm:$0xff]  ;;  %v7627_v63 = vld [vmem:[#allocation97_spill] sm:$0xff] }
 0x178   : > { %v1118_v55 = vpop.permute.xlu1 %1117  ;;  %v7623_v57 = vcombine.low %v5298_v30, %v5274_v39  ;;  %v1166_v22 = vmul.f32 %v5172_v61, %v1128_v51  ;;  %v7624_v5 = vcombine.low %v5316_v38, %v5293_v10  ;;  %v804_v9 = vcombine.low %v788_v25, %v789_v53  ;;  %v7629_v25 = vld [vmem:[#allocation14_spill] sm:$0xff]  ;;  %v7630_v51 = vld [vmem:[#allocation15_spill] sm:$0xff]  ;;  %v7632_v38 = vld [vmem:[#allocation53_spill] sm:$0xff] }
 0x179   : > { %v7626_v19 = vcombine.low %v5301_v33, %v7625_v1  ;;  %v1095_v8 = vcombine.low %v5571_v20, %v5576_v56  ;;  %v1167_v39 = vmul.f32 %v7627_v63, %v1127_v13  ;;  %v805_v30 = vcombine.low %v790_v44, %v791_v23  ;;  %v7628_v33 = vld [vmem:[#allocation28_spill] sm:$0xff]  ;;  %v3757_v1 = vld [vmem:[#allocation5 + $0x40] ss:$0 sm:$0xff] }
 0x17a   : > { %v716_v36 = vadd.f32 %v7623_v57, %v619_v31  ;;  %v718_v6 = vadd.f32 %v7624_v5, %v621_v35  ;;  %v807_v20 = vcombine.low %v794_v29, %v795_v58  ;;  %v792_v53 = vmul.f32 %v786_v28, %v7629_v25 }
 0x17b   : > { %v717_v21 = vadd.f32 %v7626_v19, %v620_v24  ;;  %v5641_v19 = vmul.f32 %v7628_v33, %v1164_v42  ;;  %v883_v35 = vpop.permute.xlu0 %882  ;;  %v5644_v24 = vmul.f32 %v7628_v33, %v1165_v52  ;;  %v793_v44 = vmul.f32 %v786_v28, %v7630_v51  ;;  %v7631_v51 = vld [vmem:[#allocation23_spill] sm:$0xff] }
 0x17c   : > { %v1122_v56 = vpop.permute.xlu1 %1121  ;;  %v5649_v23 = vmul.f32 %v7628_v33, %v1166_v22  ;;  %v885_v13 = vmul.f32 %v883_v35, %v5492_v43  ;;  %v886_v57 = vmul.f32 %v883_v35, %v5414_v4  ;;  %v812_v5 = vadd.f32 %v804_v9, %v715_v32  ;;  %v7633_v43 = vld [vmem:[#allocation103_spill] sm:$0xff] }
 0x17d   : > { %v5654_v42 = vmul.f32 %v7628_v33, %v1167_v39  ;;  %v891_v52 = vmul.f32 %v883_v35, %v5483_v18  ;;  %v892_v29 = vmul.f32 %v883_v35, %v5495_v49  ;;  %v813_v58 = vadd.f32 %v805_v30, %v716_v36  ;;  %v3758_v18 = vld [vmem:[#allocation5 + $0x48] ss:$0 sm:$0xff]  ;;  %v7634_v36 = vld [vmem:[#allocation17_spill] sm:$0xff] }
 0x17e   : > { %v901_v25 = vcombine.low %v885_v13, %v886_v57  ;;  %v887_v28 = vmul.f32 %v883_v35, %v5417_v62  ;;  %v888_v22 = vmul.f32 %v883_v35, %v7631_v51  ;;  %v889_v10 = vmul.f32 %v883_v35, %v7632_v38  ;;  %v7635_v13 = vld [vmem:[#allocation21_spill] sm:$0xff]  ;;  %v7636_v57 = vld [vmem:[#allocation104_spill] sm:$0xff] }
 0x17f   : > { %v1125_v4 = vsel %vm1123_vm6, %v1118_v55, %v7633_v43  ;;  %v1126_v32 = vsel %vm1123_vm6, %v5242_v41, %v1118_v55  ;;  %v806_v49 = vcombine.low %v792_v53, %v793_v44  ;;  %v890_v39 = vmul.f32 %v883_v35, %v7634_v36 }
 0x180   : > { %v1207_v9 = vpop.permute.xlu1 %1206  ;;  %v909_v30 = vadd.f32 %v901_v25, %v812_v5  ;;  %v902_v51 = vcombine.low %v887_v28, %v888_v22  ;;  %v1192_v31 = vcombine.low %v5641_v19, %v5644_v24  ;;  %v815_v46 = vadd.f32 %v807_v20, %v718_v6  ;;  %v3759_v5 = vld [vmem:[#allocation5 + $0x50] ss:$0 sm:$0xff]  ;;  %v3760_v25 = vld [vmem:[#allocation5 + $0x58] ss:$0 sm:$0xff]  ;;  %v7639_v22 = vld [vmem:[#allocation99_spill] sm:$0xff] }
 0x181   : > { %v1226_v62 = vsel %vm1220_vm7, %v1207_v9, %v7635_v13  ;;  %v1227_v38 = vsel %vm1220_vm7, %v7636_v57, %v1207_v9  ;;  %v904_v41 = vcombine.low %v891_v52, %v892_v29  ;;  %v7637_v53 = vcombine.low %v5450_v45, %v5453_v14  ;;  %v7638_v9 = vld [vmem:[#allocation98_spill] sm:$0xff] }
 0x182   : > { %v1261_v55 = vmul.f32 %v3757_v1, %v1227_v38  ;;  %v1262_v44 = vmul.f32 %v3758_v18, %v1226_v62  ;;  %v910_v36 = vadd.f32 %v902_v51, %v813_v58  ;;  %v903_v63 = vcombine.low %v889_v10, %v890_v39  ;;  %v7640_v14 = vld [vmem:[#allocation22_spill] sm:$0xff]  ;;  %v7646_v51 = vld [vmem:[#allocation27_spill] sm:$0xff] }
 0x183   : > { %v1006_v35 = vadd.f32 %v7637_v53, %v909_v30  ;;  %v1193_v61 = vcombine.low %v5649_v23, %v5654_v42  ;;  %v1168_v28 = vmul.f32 %v7638_v9, %v1126_v32  ;;  %v1169_v12 = vmul.f32 %v7639_v22, %v1125_v4  ;;  %v7642_v1 = vld [vmem:[#allocation70_spill] sm:$0xff]  ;;  %v7643_v32 = vld [vmem:[#allocation100_spill] sm:$0xff]  ;;  %v7677_v9 = vld [vmem:[#allocation73_spill] sm:$0xff] }
 0x184   : > { %v1211_v19 = vpop.permute.xlu1 %1210  ;;  %v814_v6 = vadd.f32 %v806_v49, %v717_v21  ;;  %v1124_v24 = vsel %vm1123_vm6, %v7633_v43, %v1122_v56  ;;  %v1131_v45 = vsel %vm1123_vm6, %v1122_v56, %v5519_v3  ;;  %v912_v23 = vadd.f32 %v904_v41, %v815_v46  ;;  %v3762_v56 = vld [vmem:[#allocation5 + $0x68] ss:$0 sm:$0xff]  ;;  %v7644_v49 = vld [vmem:[#allocation101_spill] sm:$0xff] }
 0x185   : > { %v1224_v10 = vsel %vm1220_vm7, %v1211_v19, %v7640_v14  ;;  %v1225_v20 = vsel %vm1220_vm7, %v7635_v13, %v1211_v19  ;;  %v7641_v21 = vcombine.low %v5460_v0, %v5463_v26  ;;  %v1103_v58 = vadd.f32 %v1095_v8, %v1006_v35  ;;  %v3761_v13 = vld [vmem:[#allocation5 + $0x60] ss:$0 sm:$0xff]  ;;  %v3764_v19 = vld [vmem:[#allocation5 + $0x78] ss:$0 sm:$0xff] }
 0x186   : > { %v1263_v52 = vmul.f32 %v3759_v5, %v1225_v20  ;;  %v1264_v29 = vmul.f32 %v3760_v25, %v1224_v10  ;;  %v1273_v43 = vmul.f32 %v7642_v1, %v1261_v55  ;;  %v1274_v3 = vmul.f32 %v7642_v1, %v1262_v44 }
 0x187   : > { %v1007_v42 = vadd.f32 %v7641_v21, %v910_v36  ;;  %v911_v4 = vadd.f32 %v903_v63, %v814_v6  ;;  %v1170_v18 = vmul.f32 %v7643_v32, %v1124_v24  ;;  %v1171_v39 = vmul.f32 %v7644_v49, %v1131_v45 }
 0x188   : > { %v1275_v30 = vmul.f32 %v7642_v1, %v1263_v52  ;;  %v1276_v46 = vmul.f32 %v7642_v1, %v1264_v29  ;;  %v1215_v0 = vpop.permute.xlu1 %1214  ;;  %v1180_v26 = vmul.f32 %v7628_v33, %v1168_v28  ;;  %v1181_v8 = vmul.f32 %v7628_v33, %v1169_v12  ;;  %v3763_v28 = vld [vmem:[#allocation5 + $0x70] ss:$0 sm:$0xff] }
 0x189   : > { %v7645_v62 = vcombine.low %v5531_v16, %v5534_v48  ;;  %v1222_v63 = vsel %vm1220_vm7, %v1215_v0, %v7646_v51  ;;  %v7647_v41 = vcombine.low %v5563_v60, %v5568_v59  ;;  %v7648_v53 = vcombine.low %v5579_v11, %v5582_v40 }
 0x18a   : > { %v1223_v12 = vsel %vm1220_vm7, %v7640_v14, %v1215_v0  ;;  %v1266_v44 = vmul.f32 %v3762_v56, %v1222_v63  ;;  %v1200_v5 = vadd.f32 %v1192_v31, %v1103_v58  ;;  %v1289_v16 = vcombine.low %v1273_v43, %v1274_v3 }
 0x18b   : > { %v1008_v38 = vadd.f32 %v7645_v62, %v911_v4  ;;  %v1009_v55 = vadd.f32 %v7647_v41, %v912_v23  ;;  %v1104_v35 = vadd.f32 %v7648_v53, %v1007_v42  ;;  %v7649_v48 = vcombine.low %v5588_v50, %v5596_v27  ;;  %v7651_v23 = vld [vmem:[#allocation30_spill] sm:$0xff]  ;;  %v7655_v53 = vld [vmem:[#allocation39_spill] sm:$0xff] }
 0x18c   : > { %v1265_v36 = vmul.f32 %v3761_v13, %v1223_v12  ;;  %v1182_v60 = vmul.f32 %v7628_v33, %v1170_v18  ;;  %v1183_v59 = vmul.f32 %v7628_v33, %v1171_v39  ;;  %v1290_v11 = vcombine.low %v1275_v30, %v1276_v46  ;;  %v1219_v6 = vpop.permute.xlu1 %1218  ;;  %v7654_v41 = vld [vmem:[#allocation34_spill] sm:$0xff] }
 0x18d   : > { %v1105_v25 = vadd.f32 %v7649_v48, %v1008_v38  ;;  %v1278_v40 = vmul.f32 %v7642_v1, %v1266_v44  ;;  %v1194_v24 = vcombine.low %v1180_v26, %v1181_v8  ;;  %v1221_v31 = vsel %vm1220_vm7, %v7646_v51, %v1219_v6 }
 0x18e   : > { %v1277_v45 = vmul.f32 %v7642_v1, %v1265_v36  ;;  %v1228_v50 = vsel %vm1220_vm7, %v1219_v6, %v7636_v57  ;;  %v7650_v27 = vcombine.low %v5607_v17, %v5610_v37  ;;  %v1201_v33 = vadd.f32 %v1193_v61, %v1104_v35  ;;  %v7653_v37 = vld [vmem:[#allocation33_spill] sm:$0xff] }
 0x18f   : > { %v1267_v10 = vmul.f32 %v3763_v28, %v1221_v31  ;;  %v1268_v20 = vmul.f32 %v3764_v19, %v1228_v50  ;;  %v5738_v21 = vsub.s32 4, %v7651_v23  ;;  %v5740_v42 = vadd.f32 %v1289_v16, %v1200_v5  ;;  %v7656_v19 = vld [vmem:[#allocation25_spill] sm:$0xff] }
 0x190   : > { %v1106_v14 = vadd.f32 %v7650_v27, %v1009_v55  ;;  %v1202_v52 = vadd.f32 %v1194_v24, %v1105_v25  ;;  %v1291_v29 = vcombine.low %v1277_v45, %v1278_v40  ;;  %v1195_v58 = vcombine.low %v1182_v60, %v1183_v59  ;;  %v1393_v8 = vpop.permute.xlu1 %1392 }
 0x191   : > { %7652 = vst [vmem:[#allocation24_spill] sm:$0xff] %v5738_v21  ;;  %v5742_v43 = vadd.f32 %v1290_v11, %v1201_v33  ;;  %v1279_v3 = vmul.f32 %v7642_v1, %v1267_v10  ;;  %v1280_v57 = vmul.f32 %v7642_v1, %v1268_v20  ;;  %v1313_v4 = vrot.slane %v5740_v42, %v7653_v37 }
 0x192   : > { %v5746_v56 = vadd.f32 %v1291_v29, %v1202_v52  ;;  %v1203_v17 = vadd.f32 %v1195_v58, %v1106_v14  ;;  %v1317_v18 = vrot.slane %v5740_v42, %v5738_v21  ;;  %v1410_v36 = vrot.slane %v5740_v42, %v7654_v41 }
 0x193   : > { %v1292_v61 = vcombine.low %v1279_v3, %v1280_v57  ;;  %v1321_v30 = vrot.slane %v5742_v43, %v7653_v37  ;;  %v1325_v46 = vrot.slane %v5742_v43, %v5738_v21  ;;  %v1353_v62 = vrot.slane %v1313_v4, %v7653_v37 }
 0x194   : > { %v1329_v1 = vrot.slane %v5746_v56, %v7653_v37  ;;  %v1333_v13 = vrot.slane %v5746_v56, %v5738_v21  ;;  %v1357_v38 = vrot.slane %v1317_v18, %v7653_v37  ;;  %v1418_v55 = vrot.slane %v5742_v43, %v7654_v41 }
 0x195   : > { %v5752_v39 = vadd.f32 %v1292_v61, %v1203_v17  ;;  %v1361_v51 = vrot.slane %v1321_v30, %v7653_v37  ;;  %v1365_v63 = vrot.slane %v1325_v46, %v7653_v37  ;;  %v1422_v35 = vrot.slane %v5742_v43, %v7655_v53  ;;  %v1405_v10 = vpop.permute.xlu1 %1404 }
 0x196   : > { %v1369_v12 = vrot.slane %v1329_v1, %v7653_v37  ;;  %v1373_v44 = vrot.slane %v1333_v13, %v7653_v37  ;;  %v1426_v5 = vrot.slane %v5746_v56, %v7654_v41  ;;  %v1430_v16 = vrot.slane %v5746_v56, %v7655_v53 }
 0x197   : > { %v1337_v0 = vrot.slane %v5752_v39, %v7653_v37  ;;  %v1341_v26 = vrot.slane %v5752_v39, %v5738_v21  ;;  %v1414_v28 = vrot.slane %v5740_v42, %v7655_v53  ;;  %v1382_v60 = vmul.f32 %v1353_v62, %v7656_v19 }
 0x198   : > { %v1383_v59 = vmul.f32 %v1357_v38, %v7656_v19  ;;  %v1434_v11 = vrot.slane %v5752_v39, %v7654_v41  ;;  %v1438_v40 = vrot.slane %v5752_v39, %v7655_v53  ;;  %v1384_v6 = vmul.f32 %v1361_v51, %v7656_v19  ;;  %v7671_v53 = vld [vmem:[#allocation69_spill] sm:$0xff] }
 0x199   : > { %v1377_v48 = vrot.slane %v1337_v0, %v7653_v37  ;;  %v1381_v25 = vrot.slane %v1341_v26, %v7653_v37  ;;  %v1385_v24 = vmul.f32 %v1365_v63, %v7656_v19  ;;  %v1458_v45 = vrot.slane %v1418_v55, %v7654_v41  ;;  %v7673_v37 = vld [vmem:[#allocation71_spill] sm:$0xff] }
 0x19a   : > { %v1462_v31 = vrot.slane %v1422_v35, %v7654_v41  ;;  %v1386_v50 = vmul.f32 %v1369_v12, %v7656_v19  ;;  %v1387_v27 = vmul.f32 %v1373_v44, %v7656_v19  ;;  %v1466_v14 = vrot.slane %v1426_v5, %v7654_v41  ;;  %v7657_v35 = vld [vmem:[#allocation37_spill] sm:$0xff]  ;;  %v7658_v44 = vld [vmem:[#allocation40_spill] sm:$0xff] }
 0x19b   : > { %v1470_v33 = vrot.slane %v1430_v16, %v7654_v41  ;;  %v1388_v20 = vmul.f32 %v1377_v48, %v7656_v19  ;;  %v1389_v23 = vmul.f32 %v1381_v25, %v7656_v19  ;;  %v1450_v52 = vrot.slane %v1410_v36, %v7654_v41 }
 0x19c   : > { %v1454_v29 = vrot.slane %v1414_v28, %v7654_v41  ;;  %v1395_v58 = vadd.f32 %v1393_v8, %v1382_v60  ;;  %v1396_v3 = vadd.f32 %v1393_v8, %v1383_v59  ;;  %v1474_v57 = vrot.slane %v1434_v11, %v7654_v41 }
 0x19d   : > { %v1478_v17 = vrot.slane %v1438_v40, %v7654_v41  ;;  %v1479_v61 = vmul.f32 %v1450_v52, %v1405_v10  ;;  %v1481_v18 = vmul.f32 %v1458_v45, %v1405_v10  ;;  %v1482_v30 = vmul.f32 %v1462_v31, %v1405_v10  ;;  %v7659_v31 = vld [vmem:[#allocation38_spill] sm:$0xff] }
 0x19e   : > { %v1480_v4 = vmul.f32 %v1454_v29, %v1405_v10  ;;  %v1397_v46 = vadd.f32 %v1393_v8, %v1384_v6  ;;  %v1398_v1 = vadd.f32 %v1393_v8, %v1385_v24  ;;  %v1399_v13 = vadd.f32 %v1393_v8, %v1386_v50 }
 0x19f   : > { %v1400_v0 = vadd.f32 %v1393_v8, %v1387_v27  ;;  %v1401_v26 = vadd.f32 %v1393_v8, %v1388_v20  ;;  %v1402_v62 = vadd.f32 %v1393_v8, %v1389_v23  ;;  %v1483_v38 = vmul.f32 %v1466_v14, %v1405_v10  ;;  %v7660_v27 = vld [vmem:[#allocation41_spill] sm:$0xff] }
 0x1a0   : > { %v1484_v51 = vmul.f32 %v1470_v33, %v1405_v10  ;;  %v1485_v63 = vmul.f32 %v1474_v57, %v1405_v10  ;;  %v1486_v55 = vmul.f32 %v1478_v17, %v1405_v10  ;;  %v1510_v12 = vrot.slane %v5742_v43, %v7657_v35 }
 0x1a1   : > { %v1514_v5 = vrot.slane %v5742_v43, %v7658_v44  ;;  %v1487_v16 = vadd.f32 %v1479_v61, %v1395_v58  ;;  %v1488_v48 = vadd.f32 %v1480_v4, %v1396_v3  ;;  %v1489_v25 = vadd.f32 %v1481_v18, %v1397_v46  ;;  %v1589_v3 = vpop.permute.xlu1 %1588 }
 0x1a2   : > { %v1490_v36 = vadd.f32 %v1482_v30, %v1398_v1  ;;  %v1491_v28 = vadd.f32 %v1483_v38, %v1399_v13  ;;  %v1492_v19 = vadd.f32 %v1484_v51, %v1400_v0  ;;  %v1518_v60 = vrot.slane %v5746_v56, %v7657_v35 }
 0x1a3   : > { %v1522_v8 = vrot.slane %v5746_v56, %v7658_v44  ;;  %v1493_v59 = vadd.f32 %v1485_v63, %v1401_v26  ;;  %v1494_v11 = vadd.f32 %v1486_v55, %v1402_v62  ;;  %v1526_v40 = vrot.slane %v5752_v39, %v7657_v35 }
 0x1a4   : > { %v1530_v6 = vrot.slane %v5752_v39, %v7658_v44  ;;  %v1550_v24 = vrot.slane %v1510_v12, %v7657_v35  ;;  %v1554_v45 = vrot.slane %v1514_v5, %v7657_v35  ;;  %v1602_v50 = vrot.slane %v5742_v43, %v7659_v31 }
 0x1a5   : > { %v1606_v14 = vrot.slane %v5742_v43, %v7660_v27  ;;  %v1502_v33 = vrot.slane %v5740_v42, %v7657_v35  ;;  %v1506_v10 = vrot.slane %v5740_v42, %v7658_v44  ;;  %v1594_v20 = vrot.slane %v5740_v42, %v7659_v31 }
 0x1a6   : > { %v1598_v23 = vrot.slane %v5740_v42, %v7660_v27  ;;  %v1558_v52 = vrot.slane %v1518_v60, %v7657_v35  ;;  %v1562_v29 = vrot.slane %v1522_v8, %v7657_v35  ;;  %v1610_v58 = vrot.slane %v5746_v56, %v7659_v31 }
 0x1a7   : > { %v1614_v43 = vrot.slane %v5746_v56, %v7660_v27  ;;  %v1542_v57 = vrot.slane %v1502_v33, %v7657_v35  ;;  %v1546_v17 = vrot.slane %v1506_v10, %v7657_v35  ;;  %v1634_v61 = vrot.slane %v1594_v20, %v7659_v31 }
 0x1a8   : > { %v1638_v4 = vrot.slane %v1598_v23, %v7659_v31  ;;  %v1573_v42 = vmul.f32 %v1550_v24, %v5601_v54  ;;  %v1574_v18 = vmul.f32 %v1554_v45, %v5601_v54  ;;  %v1642_v30 = vrot.slane %v1602_v50, %v7659_v31 }
 0x1a9   : > { %v1646_v46 = vrot.slane %v1606_v14, %v7659_v31  ;;  %v1571_v1 = vmul.f32 %v1542_v57, %v5601_v54  ;;  %v1572_v56 = vmul.f32 %v1546_v17, %v5601_v54  ;;  %v1663_v13 = vmul.f32 %v1634_v61, %v1589_v3 }
 0x1aa   : > { %v1664_v0 = vmul.f32 %v1638_v4, %v1589_v3  ;;  %v1566_v26 = vrot.slane %v1526_v40, %v7657_v35  ;;  %v1570_v62 = vrot.slane %v1530_v6, %v7657_v35  ;;  %v1581_v38 = vadd.f32 %v1573_v42, %v1489_v25 }
 0x1ab   : > { %v1582_v51 = vadd.f32 %v1574_v18, %v1490_v36  ;;  %v1579_v63 = vadd.f32 %v1571_v1, %v1487_v16  ;;  %v1580_v55 = vadd.f32 %v1572_v56, %v1488_v48  ;;  %v1665_v12 = vmul.f32 %v1642_v30, %v1589_v3 }
 0x1ac   : > { %v1666_v5 = vmul.f32 %v1646_v46, %v1589_v3  ;;  %v1575_v60 = vmul.f32 %v1558_v52, %v5601_v54  ;;  %v1576_v8 = vmul.f32 %v1562_v29, %v5601_v54  ;;  %v1650_v24 = vrot.slane %v1610_v58, %v7659_v31  ;;  %v4167_v46 = vld [vmem:[%s7314_s7] sm:$0xff] }
 0x1ad   : > { %v1654_v45 = vrot.slane %v1614_v43, %v7659_v31  ;;  %v1618_v50 = vrot.slane %v5752_v39, %v7659_v31  ;;  %v1622_v40 = vrot.slane %v5752_v39, %v7660_v27  ;;  %v1671_v25 = vadd.f32 %v1663_v13, %v1579_v63  ;;  %v7670_v27 = vld [vmem:[#allocation68_spill] sm:$0xff] }
 0x1ae   : > { %v1672_v36 = vadd.f32 %v1664_v0, %v1580_v55  ;;  %v1583_v16 = vadd.f32 %v1575_v60, %v1491_v28  ;;  %v1584_v48 = vadd.f32 %v1576_v8, %v1492_v19  ;;  %v1667_v6 = vmul.f32 %v1650_v24, %v1589_v3  ;;  %v487_v60 = vld [vmem:[%s7315_s8] sm:$0xff] }
 0x1af   : > { %v1668_v14 = vmul.f32 %v1654_v45, %v1589_v3  ;;  %v1673_v33 = vadd.f32 %v1665_v12, %v1581_v38  ;;  %v1674_v10 = vadd.f32 %v1666_v5, %v1582_v51  ;;  %v5858_v20 = vmax.f32 %v1671_v25, 0.0 }
 0x1b0   : > { %v5860_v23 = vmax.f32 %v1672_v36, 0.0  ;;  %v1577_v52 = vmul.f32 %v1566_v26, %v5601_v54  ;;  %v1578_v29 = vmul.f32 %v1570_v62, %v5601_v54  ;;  %v1658_v58 = vrot.slane %v1618_v50, %v7659_v31  ;;  %v5985_v62 = vpop.permute.xlu1 %1689 }
 0x1b1   : > { %v1662_v39 = vrot.slane %v1622_v40, %v7659_v31  ;;  %1700 = vrot.lane.b32.xlu1 %v5858_v20, %s4347_s27  ;;  %v1675_v43 = vadd.f32 %v1667_v6, %v1583_v16  ;;  %v1676_v57 = vadd.f32 %v1668_v14, %v1584_v48  ;;  %v5870_v17 = vmax.f32 %v1673_v33, 0.0  ;;  %v488_v6 = vld [vmem:[%s7316_s9] sm:$0xff] }
 0x1b2   : > { %1702 = vrot.lane.b32.xlu0 %v5860_v23, %s4347_s27  ;;  %v1585_v28 = vadd.f32 %v1577_v52, %v1493_v59  ;;  %v1586_v19 = vadd.f32 %v1578_v29, %v1494_v11  ;;  %v5872_v61 = vmax.f32 %v1674_v10, 0.0  ;;  %v1669_v4 = vmul.f32 %v1658_v58, %v1589_v3 }
 0x1b3   : > { %v1670_v54 = vmul.f32 %v1662_v39, %v1589_v3  ;;  %v5878_v30 = vmax.f32 %v1675_v43, 0.0  ;;  %v5880_v59 = vmax.f32 %v1676_v57, 0.0  ;;  %v7661_v1 = vmov 0  }
 0x1b4   : > { %v1677_v42 = vadd.f32 %v1669_v4, %v1585_v28  ;;  %v7662_v56 = vmov 5   ;;  %v7663_v13 = vmov 6   ;;  %v7664_v0 = vmov 7   ;;  %v5993_v51 = vpop.permute.xlu1 %1785 }
 0x1b5   : > { %1704 = vrot.lane.b32.xlu1 %v5870_v17, %s4347_s27  ;;  %v1678_v18 = vadd.f32 %v1670_v54, %v1586_v19  ;;  %v7665_v26 = vmov 8   ;;  %v7666_v50 = vmov 2   ;;  %v7667_v52 = vmov 1  }
 0x1b6   : > { %1706 = vrot.lane.b32.xlu0 %v5872_v61, %s4347_s27  ;;  %v5886_v11 = vmax.f32 %v1677_v42, 0.0  ;;  %v7668_v39 = vmov 3   ;;  %v7669_v43 = vmov 4  }
 0x1b7   : > { %v5888_v3 = vmax.f32 %v1678_v18, 0.0 }
 0x1b9   : > { %1708 = vrot.lane.b32.xlu1 %v5878_v30, %s4347_s27 }
 0x1ba   : > { %1710 = vrot.lane.b32.xlu0 %v5880_v59, %s4347_s27 }
 0x1bd   : > { %1712 = vrot.lane.b32.xlu1 %v5886_v11, %s4347_s27 }
 0x1be   : > { %1714 = vrot.lane.b32.xlu0 %v5888_v3, %s4347_s27 }
 0x1c1   : > { %1837 = vperm.xlu1 %4143, %v4167_v46  }
 0x1c2   : > { %1752 = vrot.lane.b32.xlu0 %v5858_v20, %s4350_s21 }
 0x1c5   : > { %1754 = vrot.lane.b32.xlu1 %v5860_v23, %s4350_s21 }
 0x1c6   : > { %1756 = vrot.lane.b32.xlu0 %v5870_v17, %s4350_s21  ;;  %4149 = vset.pattern.permute.xlu1 %v7661_v1 }
 0x1c9   : > { %1758 = vrot.lane.b32.xlu1 %v5872_v61, %s4350_s21 }
 0x1ca   : > { %1760 = vrot.lane.b32.xlu0 %v5878_v30, %s4350_s21 }
 0x1cd   : > { %1762 = vrot.lane.b32.xlu1 %v5880_v59, %s4350_s21 }
 0x1ce   : > { %1764 = vrot.lane.b32.xlu0 %v5886_v11, %s4350_s21 }
 0x1d1   : > { %1766 = vrot.lane.b32.xlu1 %v5888_v3, %s4350_s21 }
 0x1d2   : > { %1889 = vperm.xlu0 %4139, %v4167_v46  }
 0x1d5   : > { %1804 = vrot.lane.b32.xlu1 %v5858_v20, %s4351_s28 }
 0x1d6   : > { %1808 = vrot.lane.b32.xlu0 %v5870_v17, %s4351_s28 }
 0x1d7   : > { %4144 = vset.pattern.permute.xlu0 %v7662_v56 }
 0x1d9   : > { %1806 = vrot.lane.b32.xlu1 %v5860_v23, %s4351_s28 }
 0x1da   : > { %1812 = vrot.lane.b32.xlu0 %v5878_v30, %s4351_s28 }
 0x1dd   : > { %1810 = vrot.lane.b32.xlu1 %v5872_v61, %s4351_s28 }
 0x1de   : > { %1816 = vrot.lane.b32.xlu0 %v5886_v11, %s4351_s28 }
 0x1e1   : > { %1814 = vrot.lane.b32.xlu1 %v5880_v59, %s4351_s28 }
 0x1e2   : > { %1941 = vperm.xlu0 %4144, %v4167_v46  }
 0x1e5   : > { %1818 = vrot.lane.b32.xlu1 %v5888_v3, %s4351_s28 }
 0x1e6   : > { %1860 = vrot.lane.b32.xlu0 %v5870_v17, %s4352_s18 }
 0x1e7   : > { %4145 = vset.pattern.permute.xlu0 %v7663_v13 }
 0x1e9   : > { %1856 = vrot.lane.b32.xlu1 %v5858_v20, %s4352_s18 }
 0x1ea   : > { %1864 = vrot.lane.b32.xlu0 %v5878_v30, %s4352_s18 }
 0x1ed   : > { %1858 = vrot.lane.b32.xlu1 %v5860_v23, %s4352_s18 }
 0x1ee   : > { %1868 = vrot.lane.b32.xlu0 %v5886_v11, %s4352_s18 }
 0x1f1   : > { %1862 = vrot.lane.b32.xlu1 %v5872_v61, %s4352_s18 }
 0x1f2   : > { %1993 = vperm.xlu0 %4145, %v4167_v46  }
 0x1f5   : > { %1866 = vrot.lane.b32.xlu1 %v5880_v59, %s4352_s18 }
 0x1f6   : > { %1912 = vrot.lane.b32.xlu0 %v5870_v17, %s4354_s16 }
 0x1f7   : > { %4146 = vset.pattern.permute.xlu0 %v7664_v0 }
 0x1f9   : > { %1870 = vrot.lane.b32.xlu1 %v5888_v3, %s4352_s18 }
 0x1fa   : > { %1916 = vrot.lane.b32.xlu0 %v5878_v30, %s4354_s16 }
 0x1fd   : > { %1908 = vrot.lane.b32.xlu1 %v5858_v20, %s4354_s16 }
 0x1fe   : > { %1920 = vrot.lane.b32.xlu0 %v5886_v11, %s4354_s16 }
 0x201   : > { %1910 = vrot.lane.b32.xlu1 %v5860_v23, %s4354_s16 }
 0x202   : > { %2045 = vperm.xlu0 %4146, %v4167_v46  }
 0x205   : > { %1914 = vrot.lane.b32.xlu1 %v5872_v61, %s4354_s16 }
 0x206   : > { %1964 = vrot.lane.b32.xlu0 %v5870_v17, %s4356_s30 }
 0x207   : > { %4147 = vset.pattern.permute.xlu0 %v7665_v26 }
 0x209   : > { %1918 = vrot.lane.b32.xlu1 %v5880_v59, %s4354_s16 }
 0x20a   : > { %1968 = vrot.lane.b32.xlu0 %v5878_v30, %s4356_s30 }
 0x20d   : > { %1922 = vrot.lane.b32.xlu1 %v5888_v3, %s4354_s16 }
 0x20e   : > { %1972 = vrot.lane.b32.xlu0 %v5886_v11, %s4356_s30 }
 0x211   : > { %1960 = vrot.lane.b32.xlu1 %v5858_v20, %s4356_s30 }
 0x212   : > { %2097 = vperm.xlu0 %4147, %v4167_v46  }
 0x215   : > { %1962 = vrot.lane.b32.xlu1 %v5860_v23, %s4356_s30 }
 0x216   : > { %4148 = vset.pattern.permute.xlu0 %v7661_v1 }
 0x217   : > { %1733 = vperm.xlu0 %4148, %v4167_v46  }
 0x219   : > { %1966 = vrot.lane.b32.xlu1 %v5872_v61, %s4356_s30 }
 0x21b   : > { %2016 = vrot.lane.b32.xlu0 %v5870_v17, %s4358_s13 }
 0x21d   : > { %1970 = vrot.lane.b32.xlu1 %v5880_v59, %s4356_s30 }
 0x21f   : > { %2020 = vrot.lane.b32.xlu0 %v5878_v30, %s4358_s13 }
 0x221   : > { %1974 = vrot.lane.b32.xlu1 %v5888_v3, %s4356_s30  ;;  %s7763_s30 = sld [smem:[#allocation106_spill]] }
 0x223   : > { %2024 = vrot.lane.b32.xlu0 %v5886_v11, %s4358_s13  ;;  %v6003_v55 = vpop.permute.xlu1 %1700 }
 0x224   : > { %v5991_v38 = vpop.permute.xlu0 %1702 }
 0x225   : > { %2012 = vrot.lane.b32.xlu1 %v5858_v20, %s4358_s13 }
 0x227   : > { %2064 = vrot.lane.b32.xlu0 %v5858_v20, %s4359_s15  ;;  %v6013_v5 = vpop.permute.xlu1 %1704 }
 0x228   : > { %v5999_v63 = vpop.permute.xlu0 %1706 }
 0x229   : > { %2014 = vrot.lane.b32.xlu1 %v5860_v23, %s4358_s13 }
 0x22b   : > { %2068 = vrot.lane.b32.xlu0 %v5870_v17, %s4359_s15  ;;  %v6026_v24 = vpop.permute.xlu1 %1708 }
 0x22c   : > { %v6009_v12 = vpop.permute.xlu0 %1710 }
 0x22d   : > { %2018 = vrot.lane.b32.xlu1 %v5872_v61, %s4358_s13 }
 0x22f   : > { %2072 = vrot.lane.b32.xlu0 %v5878_v30, %s4359_s15  ;;  %v6033_v40 = vpop.permute.xlu1 %1712 }
 0x230   : > { %v6022_v8 = vpop.permute.xlu0 %1714 }
 0x231   : > { %2022 = vrot.lane.b32.xlu1 %v5880_v59, %s4358_s13 }
 0x233   : > { %2076 = vrot.lane.b32.xlu0 %v5886_v11, %s4359_s15 }
 0x234   : > { %v6030_v45 = vpop.permute.xlu0 %1752 }
 0x235   : > { %2026 = vrot.lane.b32.xlu1 %v5888_v3, %s4358_s13 }
 0x237   : > { %2118 = vperm.xlu0 %4148, %v487_v60  }
 0x238   : > { %v6038_v25 = vpop.permute.xlu0 %1756 }
 0x239   : > { %2066 = vrot.lane.b32.xlu1 %v5860_v23, %s4359_s15 }
 0x23b   : > { %4151 = vset.pattern.permute.xlu0 %v7666_v50 }
 0x23c   : > { %2227 = vperm.xlu0 %4151, %v487_v60   ;;  %v6049_v48 = vpop.permute.xlu0 %1760 }
 0x23d   : > { %2070 = vrot.lane.b32.xlu1 %v5872_v61, %s4359_s15 }
 0x240   : > { %4154 = vset.pattern.permute.xlu0 %v7662_v56  ;;  %v6040_v36 = vpop.permute.xlu1 %1837  ;;  %v6056_v33 = vpop.permute.xlu0 %1764 }
 0x241   : > { %2383 = vperm.xlu0 %4154, %v487_v60   ;;  %2074 = vrot.lane.b32.xlu1 %v5880_v59, %s4359_s15 }
 0x244   : > { %v6044_v16 = vpop.permute.xlu1 %1754 }
 0x245   : > { %4157 = vset.pattern.permute.xlu0 %v7661_v1  ;;  %2078 = vrot.lane.b32.xlu1 %v5888_v3, %s4359_s15 }
 0x248   : > { %v6054_v14 = vpop.permute.xlu1 %1758 }
 0x249   : > { %2163 = vperm.xlu1 %4149, %v488_v6  }
 0x24c   : > { %v6058_v10 = vpop.permute.xlu1 %1762 }
 0x24d   : > { %4150 = vset.pattern.permute.xlu1 %v7667_v52 }
 0x24e   : > { %2175 = vperm.xlu1 %4150, %v487_v60  }
 0x250   : > { %v6061_v58 = vpop.permute.xlu1 %1766 }
 0x251   : > { %v1890_v29 = vpop.permute.xlu0 %1889 }
 0x252   : > { %4152 = vset.pattern.permute.xlu1 %v7668_v39 }
 0x253   : > { %2279 = vperm.xlu1 %4152, %v487_v60  }
 0x254   : > { %v6066_v19 = vpop.permute.xlu1 %1804 }
 0x255   : > { %v6064_v28 = vpop.permute.xlu0 %1808 }
 0x257   : > { %4153 = vset.pattern.permute.xlu1 %v7669_v43 }
 0x258   : > { %2331 = vperm.xlu1 %4153, %v487_v60   ;;  %v6071_v4 = vpop.permute.xlu1 %1806 }
 0x259   : > { %v6069_v57 = vpop.permute.xlu0 %1812 }
 0x25c   : > { %4155 = vset.pattern.permute.xlu1 %v7663_v13  ;;  %v6076_v42 = vpop.permute.xlu1 %1810 }
 0x25d   : > { %v6073_v54 = vpop.permute.xlu0 %1816  ;;  %2435 = vperm.xlu1 %4155, %v487_v60  }
 0x260   : > { %v6080_v46 = vpop.permute.xlu1 %1814 }
 0x261   : > { %v6078_v18 = vpop.permute.xlu0 %1941  ;;  %4156 = vset.pattern.permute.xlu1 %v7664_v0 }
 0x262   : > { %2487 = vperm.xlu1 %4156, %v487_v60  }
 0x264   : > { %v6083_v26 = vpop.permute.xlu1 %1818 }
 0x265   : > { %v1861_v56 = vpop.permute.xlu0 %1860 }
 0x266   : > { %4158 = vset.pattern.permute.xlu1 %v7661_v1 }
 0x268   : > { %v1857_v43 = vpop.permute.xlu1 %1856 }
 0x269   : > { %v1865_v6 = vpop.permute.xlu0 %1864 }
 0x26c   : > { %v1859_v50 = vpop.permute.xlu1 %1858 }
 0x26d   : > { %v1869_v39 = vpop.permute.xlu0 %1868  ;;  %v1877_v13 = vsel %vm832_vm4, %v1859_v50, %v1861_v56  ;;  %v1878_v52 = vsel %vm832_vm4, %v1857_v43, %v1859_v50  ;;  %v7674_v50 = vld [vmem:[#allocation72_spill] sm:$0xff] }
 0x26e   : > { %v1881_v44 = vmul.f32 %v1878_v52, %v7670_v27  ;;  %v1882_v0 = vmul.f32 %v1877_v13, %v7671_v53 }
 0x270   : > { %v6092_v60 = vmul.f32 %v1890_v29, %v1881_v44  ;;  %v6094_v21 = vmul.f32 %v1890_v29, %v1882_v0  ;;  %v1863_v1 = vpop.permute.xlu1 %1862 }
 0x271   : > { %v6096_v31 = vpop.permute.xlu0 %1993  ;;  %v1875_v41 = vsel %vm832_vm4, %v1863_v1, %v1865_v6  ;;  %v1876_v35 = vsel %vm832_vm4, %v1861_v56, %v1863_v1  ;;  %v7678_v56 = vld [vmem:[#allocation74_spill] sm:$0xff] }
 0x272   : > { %7672 = vst [vmem:[#allocation29_spill] sm:$0xff] %v6092_v60  ;;  %v1883_v49 = vmul.f32 %v1876_v35, %v7673_v37  ;;  %v1884_v22 = vmul.f32 %v1875_v41, %v7674_v50  ;;  %v7681_v60 = vld [vmem:[#allocation75_spill] sm:$0xff] }
 0x274   : > { %v6104_v27 = vmul.f32 %v1890_v29, %v1883_v49  ;;  %v6106_v53 = vmul.f32 %v1890_v29, %v1884_v22  ;;  %v1867_v52 = vpop.permute.xlu1 %1866 }
 0x275   : > { %v6108_v44 = vpop.permute.xlu0 %1912  ;;  %v1873_v13 = vsel %vm832_vm4, %v1867_v52, %v1869_v39  ;;  %v1874_v0 = vsel %vm832_vm4, %v1865_v6, %v1867_v52  ;;  %v7682_v6 = vld [vmem:[#allocation76_spill] sm:$0xff] }
 0x276   : > { %7675 = vst [vmem:[#allocation18_spill] sm:$0xff] %v6106_v53  ;;  %7676 = vst [vmem:[#allocation19_spill] sm:$0xff] %v6108_v44  ;;  %v1885_v32 = vmul.f32 %v1874_v0, %v7677_v9  ;;  %v1886_v1 = vmul.f32 %v1873_v13, %v7678_v56 }
 0x278   : > { %v6116_v37 = vmul.f32 %v1890_v29, %v1885_v32  ;;  %v6118_v41 = vmul.f32 %v1890_v29, %v1886_v1  ;;  %v1871_v22 = vpop.permute.xlu1 %1870 }
 0x279   : > { %v6120_v49 = vpop.permute.xlu0 %1916  ;;  %v1872_v35 = vsel %vm832_vm4, %v1869_v39, %v1871_v22  ;;  %v1879_v50 = vsel %vm832_vm4, %v1871_v22, %v1857_v43  ;;  %v1722_v43 = vsel %vm541_vm0, %v6003_v55, %v5991_v38  ;;  %v1721_v22 = vsel %vm541_vm0, %v5991_v38, %v6013_v5 }
 0x27a   : > { %7679 = vst [vmem:[#allocation32_spill] sm:$0xff] %v6116_v37  ;;  %7680 = vst [vmem:[#allocation36_spill] sm:$0xff] %v6118_v41  ;;  %v1880_v2 = vmul.f32 %v1879_v50, %v7681_v60  ;;  %v1887_v52 = vmul.f32 %v1872_v35, %v7682_v6  ;;  %v7687_v60 = vld [vmem:[#allocation77_spill] sm:$0xff]  ;;  %v6154_v35 = vmul.f32 %v5985_v62, %v5872_v61  ;;  %v7704_v41 = vld [vmem:[#allocation51_spill] sm:$0xff] }
 0x27b   : > { %v6158_v50 = vmul.f32 %v5985_v62, %v5878_v30  ;;  %v6162_v6 = vmul.f32 %v5985_v62, %v5880_v59  ;;  %v6173_v38 = vmul.f32 %v5985_v62, %v5886_v11  ;;  %v6177_v61 = vmul.f32 %v5985_v62, %v5888_v3  ;;  %v7690_v59 = vld [vmem:[#allocation42_spill] sm:$0xff]  ;;  %v7706_v37 = vld [vmem:[#allocation55_spill] sm:$0xff] }
 0x27c   : > { %v6128_v9 = vmul.f32 %v1890_v29, %v1880_v2  ;;  %v6130_v13 = vmul.f32 %v1890_v29, %v1887_v52  ;;  %v1909_v0 = vpop.permute.xlu1 %1908  ;;  %v6146_v29 = vmul.f32 %v5985_v62, %v5870_v17  ;;  %v6181_v30 = vmul.f32 %v5985_v62, %v5860_v23 }
 0x27d   : > { %v1921_v32 = vpop.permute.xlu0 %1920  ;;  %v6196_v3 = vmul.f32 %v5985_v62, %v5858_v20  ;;  %v1723_v20 = vsel %vm541_vm0, %v6022_v8, %v6003_v55  ;;  %v1716_v62 = vsel %vm541_vm0, %v6033_v40, %v6022_v8  ;;  %v1774_v55 = vsel %vm638_vm1, %v6030_v45, %v6044_v16 }
 0x27e   : > { %7683 = vst [vmem:[#allocation16_spill] sm:$0xff] %v6128_v9  ;;  %7684 = vst [vmem:[#allocation26_spill] sm:$0xff] %v6130_v13  ;;  %v1771_v8 = vsel %vm638_vm1, %v6054_v14, %v6049_v48 }
 0x27f   : > { %7689 = vst [vmem:[#allocation83_spill] sm:$0xff] %v6181_v30  ;;  %7691 = vst [vmem:[#allocation84_spill] sm:$0xff] %v6196_v3  ;;  %v7698_v3 = vld [vmem:[#allocation46_spill] sm:$0xff]  ;;  %v1780_v53 = vmul.f32 %v1771_v8, %v7706_v37  ;;  %v7707_v8 = vld [vmem:[#allocation56_spill] sm:$0xff] }
 0x280   : > { %v6134_v1 = vpop.permute.xlu1 %1910 }
 0x281   : > { %v6132_v56 = vpop.permute.xlu0 %2045  ;;  %7686 = vst [vmem:[#allocation35_spill] sm:$0xff] %v6134_v1  ;;  %v1930_v39 = vsel %vm929_vm3, %v1909_v0, %v6134_v1  ;;  %v7700_v1 = vld [vmem:[#allocation47_spill] sm:$0xff] }
 0x282   : > { %7685 = vst [vmem:[#allocation31_spill] sm:$0xff] %v6132_v56  ;;  %v1932_v2 = vmul.f32 %v1930_v39, %v7687_v60  ;;  %v6184_v60 = vmul.f32 %v1722_v43, %v7690_v59  ;;  %v7692_v56 = vld [vmem:[#allocation43_spill] sm:$0xff]  ;;  %v1718_v43 = vsel %vm541_vm0, %v6026_v24, %v6009_v12 }
 0x283   : > { %v6199_v23 = vmul.f32 %v1721_v22, %v7692_v56  ;;  %v7693_v59 = vld [vmem:[#allocation79_spill] sm:$0xff]  ;;  %v1717_v56 = vsel %vm541_vm0, %v6009_v12, %v6033_v40  ;;  %v1772_v12 = vsel %vm638_vm1, %v6038_v25, %v6054_v14  ;;  %v6252_v30 = vmul.f32 %v1718_v43, %v7698_v3  ;;  %v7699_v14 = vld [vmem:[#allocation48_spill] sm:$0xff]  ;;  %v7705_v43 = vld [vmem:[#allocation54_spill] sm:$0xff] }
 0x284   : > { %v6165_v17 = vmul.f32 %v6078_v18, %v1932_v2  ;;  %v6169_v39 = vpop.permute.xlu1 %1914  ;;  %v1720_v2 = vsel %vm541_vm0, %v6013_v5, %v5999_v63  ;;  %v1719_v5 = vsel %vm541_vm0, %v5999_v63, %v6026_v24  ;;  %v1773_v63 = vsel %vm638_vm1, %v6044_v16, %v6038_v25  ;;  %v7697_v16 = vld [vmem:[#allocation45_spill] sm:$0xff] }
 0x285   : > { %v6167_v52 = vpop.permute.xlu0 %1964  ;;  %v1928_v11 = vsel %vm929_vm3, %v6108_v44, %v6169_v39  ;;  %v6249_v9 = vmul.f32 %v1719_v5, %v7697_v16  ;;  %v7701_v44 = vld [vmem:[#allocation49_spill] sm:$0xff]  ;;  %v7703_v5 = vld [vmem:[#allocation50_spill] sm:$0xff]  ;;  %v1778_v3 = vmul.f32 %v1773_v63, %v7704_v41  ;;  %v1823_v63 = vsel %vm735_vm2, %v6076_v42, %v6069_v57 }
 0x286   : > { %7688 = vst [vmem:[#allocation93_spill] sm:$0xff] %v6165_v17  ;;  %v1934_v17 = vmul.f32 %v1928_v11, %v7693_v59  ;;  %v7696_v11 = vld [vmem:[#allocation44_spill] sm:$0xff]  ;;  %v6264_v13 = vmul.f32 %v1716_v62, %v7701_v44  ;;  %v1777_v16 = vmul.f32 %v1774_v55, %v7703_v5  ;;  %v1770_v44 = vsel %vm638_vm1, %v6049_v48, %v6058_v10 }
 0x287   : > { %v6246_v59 = vmul.f32 %v1720_v2, %v7696_v11  ;;  %v7702_v2 = vld [vmem:[#allocation82_spill] sm:$0xff]  ;;  %v1825_v48 = vsel %vm735_vm2, %v6071_v4, %v6064_v28 }
 0x288   : > { %v6239_v24 = vmul.f32 %v6078_v18, %v1934_v17  ;;  %v6243_v22 = vpop.permute.xlu1 %1918  ;;  %v6258_v17 = vmul.f32 %v1723_v20, %v7699_v14  ;;  %v1769_v20 = vsel %vm638_vm1, %v6058_v10, %v6056_v33  ;;  %v1822_v14 = vsel %vm735_vm2, %v6069_v57, %v6080_v46  ;;  %v7711_v57 = vld [vmem:[#allocation61_spill] sm:$0xff] }
 0x289   : > { %v6241_v40 = vpop.permute.xlu0 %1968  ;;  %v1925_v25 = vsel %vm929_vm3, %v6243_v22, %v1921_v32 }
 0x28a   : > { %7694 = vst [vmem:[#allocation52_spill] sm:$0xff] %v6239_v24  ;;  %7695 = vst [vmem:[#allocation90_spill] sm:$0xff] %v6241_v40  ;;  %v6261_v40 = vmul.f32 %v1717_v56, %v7700_v1  ;;  %v1937_v11 = vmul.f32 %v1925_v25, %v7702_v2  ;;  %v1779_v24 = vmul.f32 %v1772_v12, %v7705_v43  ;;  %v7709_v2 = vld [vmem:[#allocation58_spill] sm:$0xff] }
 0x28b   : > { %v1768_v1 = vsel %vm638_vm1, %v6056_v33, %v6061_v58  ;;  %v1775_v56 = vsel %vm638_vm1, %v6061_v58, %v6030_v45  ;;  %v1824_v45 = vsel %vm735_vm2, %v6064_v28, %v6076_v42  ;;  %v1781_v12 = vmul.f32 %v1770_v44, %v7707_v8  ;;  %v7710_v42 = vld [vmem:[#allocation59_spill] sm:$0xff]  ;;  %v7712_v44 = vld [vmem:[#allocation62_spill] sm:$0xff]  ;;  %v7715_v8 = vld [vmem:[#allocation65_spill] sm:$0xff] }
 0x28c   : > { %v6284_v41 = vmul.f32 %v6078_v18, %v1937_v11  ;;  %v1923_v37 = vpop.permute.xlu1 %1922  ;;  %v1776_v28 = vmul.f32 %v1775_v56, %v7709_v2  ;;  %v1791_v2 = vmul.f32 %v5993_v51, %v1779_v24 }
 0x28d   : > { %v6286_v62 = vpop.permute.xlu0 %1972  ;;  %v1924_v10 = vsel %vm929_vm3, %v1921_v32, %v1923_v37  ;;  %v1931_v33 = vsel %vm929_vm3, %v1923_v37, %v1909_v0  ;;  %v7708_v32 = vld [vmem:[#allocation57_spill] sm:$0xff]  ;;  %v1821_v0 = vsel %vm735_vm2, %v6080_v46, %v6073_v54  ;;  %v1830_v46 = vmul.f32 %v1825_v48, %v7711_v57 }
 0x28e   : > { %v1938_v58 = vmul.f32 %v1924_v10, %v7610_v7  ;;  %v1939_v55 = vmul.f32 %v1931_v33, %v7611_v34  ;;  %v1782_v25 = vmul.f32 %v1769_v20, %v7708_v32  ;;  %v1783_v7 = vmul.f32 %v1768_v1, %v7710_v42  ;;  %v7713_v1 = vld [vmem:[#allocation63_spill] sm:$0xff] }
 0x28f   : > { %v1826_v20 = vsel %vm735_vm2, %v6066_v19, %v6071_v4  ;;  %v1831_v37 = vmul.f32 %v1824_v45, %v7712_v44  ;;  %v1832_v56 = vmul.f32 %v1823_v63, %v7713_v1  ;;  %v6340_v10 = vmul.f32 %v5993_v51, %v1777_v16  ;;  %v7716_v45 = vld [vmem:[#allocation60_spill] sm:$0xff] }
 0x290   : > { %v6323_v34 = vmul.f32 %v6078_v18, %v1938_v58  ;;  %v6326_v11 = vmul.f32 %v6078_v18, %v1939_v55  ;;  %v6328_v5 = vpop.permute.xlu1 %1960  ;;  %v1790_v33 = vmul.f32 %v5993_v51, %v1778_v3  ;;  %v7714_v58 = vld [vmem:[#allocation64_spill] sm:$0xff]  ;;  %v1834_v32 = vmul.f32 %v1821_v0, %v7715_v8 }
 0x291   : > { %v6330_v43 = vpop.permute.xlu0 %2097  ;;  %v1833_v55 = vmul.f32 %v1822_v14, %v7714_v58  ;;  %v1792_v42 = vmul.f32 %v5993_v51, %v1780_v53  ;;  %v1793_v4 = vmul.f32 %v5993_v51, %v1781_v12  ;;  %v1820_v48 = vsel %vm735_vm2, %v6073_v54, %v6083_v26 }
 0x292   : > { %v1794_v16 = vmul.f32 %v5993_v51, %v1782_v25  ;;  %v6354_v63 = vmul.f32 %v5993_v51, %v1776_v28  ;;  %v1795_v3 = vmul.f32 %v5993_v51, %v1783_v7  ;;  %v6358_v0 = vmul.f32 %v1826_v20, %v7716_v45  ;;  %v7717_v7 = vld [vmem:[#allocation67_spill] sm:$0xff] }
 0x293   : > { %v1842_v53 = vmul.f32 %v6040_v36, %v1830_v46  ;;  %v1843_v12 = vmul.f32 %v6040_v36, %v1831_v37  ;;  %v1844_v14 = vmul.f32 %v6040_v36, %v1832_v56  ;;  %v1927_v54 = vsel %vm929_vm3, %v6169_v39, %v6120_v49  ;;  %v7718_v56 = vld [vmem:[#allocation80_spill] sm:$0xff] }
 0x294   : > { %v6360_v24 = vpop.permute.xlu1 %1962  ;;  %v1845_v28 = vmul.f32 %v6040_v36, %v1833_v55  ;;  %v1846_v51 = vmul.f32 %v6040_v36, %v1834_v32  ;;  %v1835_v20 = vmul.f32 %v1820_v48, %v7717_v7  ;;  %v1926_v57 = vsel %vm929_vm3, %v6120_v49, %v6243_v22  ;;  %v7720_v32 = vld [vmem:[#allocation87_spill] sm:$0xff] }
 0x295   : > { %v1827_v1 = vsel %vm735_vm2, %v6083_v26, %v6066_v19  ;;  %v1935_v58 = vmul.f32 %v1927_v54, %v7718_v56 }
 0x296   : > { %v1734_v25 = vpop.permute.xlu0 %1733  ;;  %v1847_v26 = vmul.f32 %v6040_v36, %v1835_v20 }
 0x297   : > { %v1738_v46 = vmul.f32 %v1734_v25, %v6199_v23  ;;  %v1739_v44 = vmul.f32 %v1734_v25, %v6246_v59  ;;  %v1740_v37 = vmul.f32 %v1734_v25, %v6249_v9  ;;  %v1741_v39 = vmul.f32 %v1734_v25, %v6252_v30  ;;  %v7719_v23 = vld [vmem:[#allocation81_spill] sm:$0xff] }
 0x298   : > { %v6385_v55 = vpop.permute.xlu1 %1966  ;;  %v1742_v8 = vmul.f32 %v1734_v25, %v6261_v40  ;;  %v1743_v49 = vmul.f32 %v1734_v25, %v6264_v13  ;;  %v1936_v22 = vmul.f32 %v1926_v57, %v7719_v23  ;;  %v1947_v7 = vmul.f32 %v6078_v18, %v1935_v58  ;;  %v7721_v58 = vld [vmem:[#allocation18_spill] sm:$0xff] }
 0x299   : > { %v1746_v59 = vadd.f32 %v1738_v46, %v6146_v29  ;;  %v1747_v9 = vadd.f32 %v1739_v44, %v6154_v35  ;;  %v1980_v30 = vsel %vm1026_vm5, %v6167_v52, %v6385_v55  ;;  %v1748_v40 = vadd.f32 %v1740_v37, %v6158_v50 }
 0x29a   : > { %v6396_v19 = vpop.permute.xlu0 %2016  ;;  %v1986_v48 = vmul.f32 %v1980_v30, %v7720_v32  ;;  %v1749_v13 = vadd.f32 %v1741_v39, %v6162_v6  ;;  %v1750_v29 = vadd.f32 %v1742_v8, %v6173_v38  ;;  %v1751_v35 = vadd.f32 %v1743_v49, %v6177_v61  ;;  %v7722_v49 = vld [vmem:[#allocation32_spill] sm:$0xff] }
 0x29b   : > { %v1798_v45 = vadd.f32 %v1790_v33, %v1746_v59  ;;  %v1799_v54 = vadd.f32 %v1791_v2, %v1747_v9  ;;  %v1800_v46 = vadd.f32 %v1792_v42, %v1748_v40  ;;  %v1948_v20 = vmul.f32 %v6078_v18, %v1936_v22 }
 0x29c   : > { %v1998_v57 = vmul.f32 %v6096_v31, %v1986_v48  ;;  %v1801_v44 = vadd.f32 %v1793_v4, %v1749_v13  ;;  %v6406_v56 = vpop.permute.xlu1 %1970  ;;  %v1736_v38 = vmul.f32 %v1734_v25, %v6258_v17  ;;  %v1802_v39 = vadd.f32 %v1794_v16, %v1750_v29  ;;  %v7725_v48 = vld [vmem:[#allocation36_spill] sm:$0xff]  ;;  %v7726_v13 = vld [vmem:[#allocation26_spill] sm:$0xff]  ;;  %v7729_v29 = vld [vmem:[#allocation91_spill] sm:$0xff] }
 0x29d   : > { %v1850_v23 = vadd.f32 %v1842_v53, %v1798_v45  ;;  %v1851_v50 = vadd.f32 %v1843_v12, %v1799_v54  ;;  %v1977_v6 = vsel %vm1026_vm5, %v6406_v56, %v6286_v62  ;;  %v1852_v61 = vadd.f32 %v1844_v14, %v1800_v46  ;;  %v7728_v45 = vld [vmem:[#allocation35_spill] sm:$0xff] }
 0x29e   : > { %v1853_v33 = vadd.f32 %v1845_v28, %v1801_v44  ;;  %v1989_v2 = vmul.f32 %v1977_v6, %v7619_v47  ;;  %v6417_v37 = vpop.permute.xlu0 %2020  ;;  %v1803_v53 = vadd.f32 %v1795_v3, %v1751_v35  ;;  %v1737_v12 = vmul.f32 %v1734_v25, %v6184_v60  ;;  %v7723_v28 = vld [vmem:[#allocation52_spill] sm:$0xff]  ;;  %v7724_v25 = vld [vmem:[#allocation66_spill] sm:$0xff] }
 0x29f   : > { %v1902_v42 = vadd.f32 %v6094_v21, %v1850_v23  ;;  %v1903_v4 = vadd.f32 %v6104_v27, %v1851_v50  ;;  %v1904_v8 = vadd.f32 %v7721_v58, %v1852_v61  ;;  %v1854_v21 = vadd.f32 %v1846_v51, %v1802_v39  ;;  %v7730_v35 = vld [vmem:[#allocation92_spill] sm:$0xff] }
 0x2a0   : > { %v1905_v22 = vadd.f32 %v7722_v49, %v1853_v33  ;;  %v2001_v17 = vmul.f32 %v6096_v31, %v1989_v2  ;;  %v1975_v14 = vpop.permute.xlu1 %1974  ;;  %v1855_v9 = vadd.f32 %v1847_v26, %v1803_v53  ;;  %v1828_v30 = vmul.f32 %v1827_v1, %v7724_v25  ;;  %v7727_v26 = vld [vmem:[#allocation19_spill] sm:$0xff]  ;;  %v7732_v50 = vld [vmem:[#allocation84_spill] sm:$0xff] }
 0x2a1   : > { %v1954_v59 = vadd.f32 %v7723_v28, %v1902_v42  ;;  %v6424_v47 = vadd.f32 %v1947_v7, %v1903_v4  ;;  %v6426_v27 = vadd.f32 %v1948_v20, %v1904_v8  ;;  %v1976_v60 = vsel %vm1026_vm5, %v6286_v62, %v1975_v14  ;;  %v7731_v20 = vld [vmem:[#allocation83_spill] sm:$0xff]  ;;  %v7733_v4 = vld [vmem:[#allocation78_spill] sm:$0xff] }
 0x2a2   : > { %v1957_v16 = vadd.f32 %v6284_v41, %v1905_v22  ;;  %v1983_v3 = vsel %vm1026_vm5, %v1975_v14, %v6328_v5  ;;  %v1906_v40 = vadd.f32 %v7725_v48, %v1854_v21  ;;  %v1907_v51 = vadd.f32 %v7726_v13, %v1855_v9  ;;  %v7734_v22 = vld [vmem:[#allocation29_spill] sm:$0xff]  ;;  %v7735_v14 = vld [vmem:[#allocation16_spill] sm:$0xff]  ;;  %v7739_v48 = vld [vmem:[#allocation31_spill] sm:$0xff] }
 0x2a3   : > { %v2006_v32 = vadd.f32 %v1998_v57, %v1954_v59  ;;  %v1929_v41 = vsel %vm929_vm3, %v7728_v45, %v7727_v26  ;;  %v1990_v62 = vmul.f32 %v1976_v60, %v7729_v29  ;;  %v1991_v7 = vmul.f32 %v1983_v3, %v7730_v35  ;;  %v2025_v57 = vpop.permute.xlu0 %2024  ;;  %v7736_v21 = vld [vmem:[#allocation93_spill] sm:$0xff]  ;;  %v7737_v9 = vld [vmem:[#allocation96_spill] sm:$0xff]  ;;  %v7738_v3 = vld [vmem:[#allocation90_spill] sm:$0xff] }
 0x2a4   : > { %v6442_v54 = vadd.f32 %v2001_v17, %v1957_v16  ;;  %v2013_v46 = vpop.permute.xlu1 %2012  ;;  %v1958_v44 = vadd.f32 %v6323_v34, %v1906_v40  ;;  %v1959_v1 = vadd.f32 %v6326_v11, %v1907_v51  ;;  %v1745_v23 = vadd.f32 %v1737_v12, %v7731_v20  ;;  %v7740_v26 = vld [vmem:[#allocation85_spill] sm:$0xff]  ;;  %v7742_v29 = vld [vmem:[#allocation88_spill] sm:$0xff]  ;;  %v7743_v35 = vld [vmem:[#allocation94_spill] sm:$0xff] }
 0x2a5   : > { %v1744_v6 = vadd.f32 %v1736_v38, %v7732_v50  ;;  %v1841_v61 = vmul.f32 %v6040_v36, %v6358_v0  ;;  %v2002_v33 = vmul.f32 %v6096_v31, %v1990_v62  ;;  %v2003_v2 = vmul.f32 %v6096_v31, %v1991_v7 }
 0x2a6   : > { %v1840_v42 = vmul.f32 %v6040_v36, %v1828_v30  ;;  %v1933_v39 = vmul.f32 %v1929_v41, %v7733_v4  ;;  %v1797_v34 = vadd.f32 %v6340_v10, %v1745_v23  ;;  %v1981_v60 = vsel %vm1026_vm5, %v6360_v24, %v6167_v52  ;;  %v7741_v52 = vld [vmem:[#allocation86_spill] sm:$0xff]  ;;  %v7745_v23 = vld [vmem:[#allocation89_spill] sm:$0xff] }
 0x2a7   : > { %v1796_v11 = vadd.f32 %v6354_v63, %v1744_v6  ;;  %v2010_v53 = vadd.f32 %v2002_v33, %v1958_v44  ;;  %v6458_v58 = vadd.f32 %v2003_v2, %v1959_v1  ;;  %v6461_v49 = vpop.permute.xlu0 %2064  ;;  %v1979_v25 = vsel %vm1026_vm5, %v6385_v55, %v7738_v3  ;;  %v7744_v1 = vld [vmem:[#allocation95_spill] sm:$0xff]  ;;  %v7746_v6 = vld [vmem:[#allocation100_spill] sm:$0xff] }
 0x2a8   : > { %v2015_v12 = vpop.permute.xlu1 %2014  ;;  %v1849_v38 = vadd.f32 %v1841_v61, %v1797_v34  ;;  %v1945_v0 = vmul.f32 %v6078_v18, %v1933_v39  ;;  %v1982_v18 = vsel %vm1026_vm5, %v6328_v5, %v6360_v24  ;;  %v1985_v24 = vmul.f32 %v1981_v60, %v7741_v52  ;;  %v7747_v39 = vld [vmem:[#allocation97_spill] sm:$0xff] }
 0x2a9   : > { %v1848_v8 = vadd.f32 %v1840_v42, %v1796_v11  ;;  %v2034_v30 = vsel %vm1123_vm6, %v2013_v46, %v2015_v12  ;;  %v1984_v45 = vmul.f32 %v1982_v18, %v7740_v26  ;;  %v2033_v5 = vsel %vm1123_vm6, %v2015_v12, %v6396_v19  ;;  %v7748_v18 = vld [vmem:[#allocation98_spill] sm:$0xff] }
 0x2aa   : > { %v1901_v17 = vadd.f32 %v7734_v22, %v1849_v38  ;;  %v1987_v62 = vmul.f32 %v1979_v25, %v7742_v29  ;;  %v1978_v55 = vsel %vm1026_vm5, %v7738_v3, %v6406_v56  ;;  %v2036_v7 = vmul.f32 %v2034_v30, %v7743_v35  ;;  %v7750_v30 = vld [vmem:[#allocation101_spill] sm:$0xff] }
 0x2ab   : > { %v1900_v36 = vadd.f32 %v7735_v14, %v1848_v8  ;;  %v2069_v51 = vpop.permute.xlu0 %2068  ;;  %v2037_v20 = vmul.f32 %v2033_v5, %v7744_v1  ;;  %v1988_v50 = vmul.f32 %v1978_v55, %v7745_v23  ;;  %v1996_v33 = vmul.f32 %v6096_v31, %v1984_v45 }
 0x2ac   : > { %v2019_v28 = vpop.permute.xlu1 %2018  ;;  %v1953_v59 = vadd.f32 %v1945_v0, %v1901_v17  ;;  %v1997_v56 = vmul.f32 %v6096_v31, %v1985_v24  ;;  %v1999_v2 = vmul.f32 %v6096_v31, %v1987_v62  ;;  %v2048_v42 = vmul.f32 %v7739_v48, %v2036_v7  ;;  %v4170_v24 = vld [vmem:[#allocation5 + $0x50] ss:$0 sm:$0xff]  ;;  %v4171_v62 = vld [vmem:[#allocation5 + $0x58] ss:$0 sm:$0xff] }
 0x2ad   : > { %v1952_v10 = vadd.f32 %v7736_v21, %v1900_v36  ;;  %v2032_v63 = vsel %vm1123_vm6, %v6396_v19, %v2019_v28  ;;  %v2031_v19 = vsel %vm1123_vm6, %v2019_v28, %v6417_v37  ;;  %v2049_v0 = vmul.f32 %v7739_v48, %v2037_v20  ;;  %v4169_v21 = vld [vmem:[#allocation5 + $0x48] ss:$0 sm:$0xff] }
 0x2ae   : > { %v2038_v16 = vmul.f32 %v2032_v63, %v7737_v9  ;;  %v2039_v34 = vmul.f32 %v2031_v19, %v7747_v39  ;;  %v2005_v9 = vadd.f32 %v1997_v56, %v1953_v59  ;;  %v2007_v52 = vadd.f32 %v1999_v2, %v6424_v47  ;;  %v4172_v56 = vld [vmem:[#allocation5 + $0x60] ss:$0 sm:$0xff]  ;;  %v4173_v2 = vld [vmem:[#allocation5 + $0x68] ss:$0 sm:$0xff] }
 0x2af   : > { %v2073_v4 = vpop.permute.xlu0 %2072 }
 0x2b0   : > { %v2050_v40 = vmul.f32 %v7739_v48, %v2038_v16  ;;  %v2023_v13 = vpop.permute.xlu1 %2022  ;;  %v2004_v16 = vadd.f32 %v1996_v33, %v1952_v10  ;;  %v2051_v25 = vmul.f32 %v7739_v48, %v2039_v34  ;;  %v2057_v45 = vadd.f32 %v2049_v0, %v2005_v9  ;;  %v4175_v9 = vld [vmem:[#allocation5 + $0x78] ss:$0 sm:$0xff] }
 0x2b1   : > { %v2029_v11 = vsel %vm1123_vm6, %v2023_v13, %v2025_v57  ;;  %v2030_v12 = vsel %vm1123_vm6, %v6417_v37, %v2023_v13  ;;  %v4168_v37 = vld [vmem:[#allocation5 + $0x40] ss:$0 sm:$0xff] }
 0x2b2   : > { %v6489_v41 = vadd.f32 %v2050_v40, %v2006_v32  ;;  %v2040_v60 = vmul.f32 %v2030_v12, %v7748_v18  ;;  %v2056_v26 = vadd.f32 %v2048_v42, %v2004_v16  ;;  %v2059_v20 = vadd.f32 %v2051_v25, %v2007_v52 }
 0x2b3   : > { %v2077_v5 = vpop.permute.xlu0 %2076 }
 0x2b4   : > { %v2027_v44 = vpop.permute.xlu1 %2026  ;;  %v2052_v35 = vmul.f32 %v7739_v48, %v2040_v60 }
 0x2b5   : > { %v2028_v32 = vsel %vm1123_vm6, %v2025_v57, %v2027_v44  ;;  %v2035_v22 = vsel %vm1123_vm6, %v2027_v44, %v2013_v46  ;;  %v2000_v57 = vmul.f32 %v6096_v31, %v1988_v50  ;;  %v7749_v46 = vld [vmem:[#allocation99_spill] sm:$0xff] }
 0x2b6   : > { %v2042_v61 = vmul.f32 %v2028_v32, %v7746_v6  ;;  %v2041_v3 = vmul.f32 %v2029_v11, %v7749_v46  ;;  %v2043_v40 = vmul.f32 %v2035_v22, %v7750_v30  ;;  %v7752_v22 = vld [vmem:[#allocation37_spill] sm:$0xff] }
 0x2b7   : > { %v2008_v23 = vadd.f32 %v2000_v57, %v6426_v27  ;;  %v2119_v11 = vpop.permute.xlu0 %2118  ;;  %v7751_v27 = vld [vmem:[#allocation33_spill] sm:$0xff] }
 0x2b8   : > { %v2054_v38 = vmul.f32 %v7739_v48, %v2042_v61  ;;  %v2067_v8 = vpop.permute.xlu1 %2066  ;;  %v2053_v7 = vmul.f32 %v7739_v48, %v2041_v3  ;;  %v2055_v19 = vmul.f32 %v7739_v48, %v2043_v40  ;;  %v7753_v3 = vld [vmem:[#allocation34_spill] sm:$0xff] }
 0x2b9   : > { %v2085_v17 = vsel %vm1220_vm7, %v2067_v8, %v2069_v51  ;;  %v2086_v14 = vsel %vm1220_vm7, %v6461_v49, %v2067_v8  ;;  %v2060_v39 = vadd.f32 %v2052_v35, %v2008_v23 }
 0x2ba   : > { %v6526_v36 = vadd.f32 %v2054_v38, %v2010_v53  ;;  %v2088_v28 = vmul.f32 %v4168_v37, %v2086_v14  ;;  %v2089_v63 = vmul.f32 %v4169_v21, %v2085_v17  ;;  %v2061_v34 = vadd.f32 %v2053_v7, %v6442_v54  ;;  %v4174_v21 = vld [vmem:[#allocation5 + $0x70] ss:$0 sm:$0xff] }
 0x2bb   : > { %v6581_v18 = vpop.permute.xlu0 %2227  ;;  %v7755_v7 = vld [vmem:[#allocation24_spill] sm:$0xff] }
 0x2bc   : > { %v2100_v13 = vmul.f32 %v6330_v43, %v2088_v28  ;;  %v2101_v31 = vmul.f32 %v6330_v43, %v2089_v63  ;;  %v2071_v53 = vpop.permute.xlu1 %2070 }
 0x2bd   : > { %v2083_v59 = vsel %vm1220_vm7, %v2071_v53, %v2073_v4  ;;  %v2084_v10 = vsel %vm1220_vm7, %v2069_v51, %v2071_v53 }
 0x2be   : > { %v2090_v29 = vmul.f32 %v4170_v24, %v2084_v10  ;;  %v2091_v55 = vmul.f32 %v4171_v62, %v2083_v59  ;;  %v6541_v44 = vadd.f32 %v2100_v13, %v2056_v26  ;;  %v6543_v1 = vadd.f32 %v2101_v31, %v2057_v45  ;;  %v7754_v59 = vld [vmem:[#allocation38_spill] sm:$0xff] }
 0x2c0   : > { %v2102_v32 = vmul.f32 %v6330_v43, %v2090_v29  ;;  %v2103_v51 = vmul.f32 %v6330_v43, %v2091_v55  ;;  %v2075_v47 = vpop.permute.xlu1 %2074  ;;  %v2128_v12 = vrot.slane %v6543_v1, %v7751_v27  ;;  %v2124_v38 = vrot.slane %v6541_v44, %v7751_v27  ;;  %v6619_v23 = vpop.permute.xlu0 %2383 }
 0x2c1   : > { %v2081_v50 = vsel %vm1220_vm7, %v2075_v47, %v2077_v5  ;;  %v2082_v6 = vsel %vm1220_vm7, %v2073_v4, %v2075_v47  ;;  %v2063_v4 = vadd.f32 %v2055_v19, %v6458_v58  ;;  %v2237_v17 = vrot.slane %v6543_v1, %v7752_v22 }
 0x2c2   : > { %v6554_v61 = vadd.f32 %v2102_v32, %v6489_v41  ;;  %v6556_v33 = vadd.f32 %v2103_v51, %v2059_v20  ;;  %v2092_v48 = vmul.f32 %v4172_v56, %v2082_v6  ;;  %v2093_v42 = vmul.f32 %v4173_v2, %v2081_v50  ;;  %v7756_v51 = vld [vmem:[#allocation39_spill] sm:$0xff] }
 0x2c3   : > { %v2154_v60 = vmul.f32 %v2128_v12, %v2119_v11  ;;  %v2153_v46 = vmul.f32 %v2124_v38, %v2119_v11  ;;  %v2181_v25 = vrot.slane %v6541_v44, %v7753_v3  ;;  %v2289_v10 = vrot.slane %v6543_v1, %v7754_v59 }
 0x2c4   : > { %v2104_v41 = vmul.f32 %v6330_v43, %v2092_v48  ;;  %v2105_v8 = vmul.f32 %v6330_v43, %v2093_v42  ;;  %v2079_v0 = vpop.permute.xlu1 %2078  ;;  %v2132_v57 = vrot.slane %v6554_v61, %v7751_v27  ;;  %v2136_v58 = vrot.slane %v6556_v33, %v7751_v27 }
 0x2c5   : > { %v2080_v54 = vsel %vm1220_vm7, %v2077_v5, %v2079_v0  ;;  %v2087_v14 = vsel %vm1220_vm7, %v2079_v0, %v6461_v49  ;;  %v2185_v49 = vrot.slane %v6543_v1, %v7753_v3  ;;  %v2189_v45 = vrot.slane %v6554_v61, %v7753_v3 }
 0x2c6   : > { %v6577_v37 = vadd.f32 %v2104_v41, %v2060_v39  ;;  %v6579_v28 = vadd.f32 %v2105_v8, %v2061_v34  ;;  %v2094_v63 = vmul.f32 %v4174_v21, %v2080_v54  ;;  %v2095_v16 = vmul.f32 %v4175_v9, %v2087_v14  ;;  %v7757_v8 = vld [vmem:[#allocation40_spill] sm:$0xff]  ;;  %v7758_v14 = vld [vmem:[#allocation41_spill] sm:$0xff] }
 0x2c7   : > { %v2156_v26 = vmul.f32 %v2136_v58, %v2119_v11  ;;  %v2193_v5 = vrot.slane %v6556_v33, %v7753_v3  ;;  %v6606_v24 = vmul.f32 %v2132_v57, %v2119_v11  ;;  %v2263_v29 = vmul.f32 %v2237_v17, %v6581_v18 }
 0x2c8   : > { %v2106_v30 = vmul.f32 %v6330_v43, %v2094_v63  ;;  %v2107_v40 = vmul.f32 %v6330_v43, %v2095_v16  ;;  %v2140_v13 = vrot.slane %v6577_v37, %v7751_v27  ;;  %v2144_v31 = vrot.slane %v6579_v28, %v7751_v27  ;;  %v6593_v53 = vpop.permute.xlu1 %2163 }
 0x2c9   : > { %v2166_v35 = vadd.f32 %v6593_v53, %v2153_v46  ;;  %v2341_v20 = vrot.slane %v6543_v1, %v7755_v7  ;;  %v2167_v32 = vadd.f32 %v6593_v53, %v2154_v60  ;;  %v2393_v47 = vrot.slane %v6543_v1, %v7756_v51 }
 0x2ca   : > { %v6602_v43 = vadd.f32 %v2106_v30, %v6526_v36  ;;  %v6604_v52 = vadd.f32 %v2107_v40, %v2063_v4  ;;  %v2157_v62 = vmul.f32 %v2140_v13, %v2119_v11  ;;  %v2158_v55 = vmul.f32 %v2144_v31, %v2119_v11 }
 0x2cb   : > { %v2169_v50 = vadd.f32 %v6593_v53, %v2156_v26  ;;  %v2197_v6 = vrot.slane %v6577_v37, %v7753_v3  ;;  %v2201_v56 = vrot.slane %v6579_v28, %v7753_v3  ;;  %v2445_v0 = vrot.slane %v6543_v1, %v7757_v8 }
 0x2cc   : > { %v2148_v19 = vrot.slane %v6602_v43, %v7751_v27  ;;  %v2152_v36 = vrot.slane %v6604_v52, %v7751_v27  ;;  %v2205_v48 = vrot.slane %v6602_v43, %v7753_v3  ;;  %v2170_v38 = vadd.f32 %v6593_v53, %v2157_v62 }
 0x2cd   : > { %v6628_v2 = vpop.permute.xlu1 %2175  ;;  %v6634_v4 = vadd.f32 %v6593_v53, %v2158_v55  ;;  %v2209_v41 = vrot.slane %v6604_v52, %v7753_v3  ;;  %v2497_v57 = vrot.slane %v6543_v1, %v7758_v14  ;;  %v2233_v63 = vrot.slane %v6541_v44, %v7752_v22 }
 0x2ce   : > { %v2159_v42 = vmul.f32 %v2148_v19, %v2119_v11  ;;  %v2160_v39 = vmul.f32 %v2152_v36, %v2119_v11  ;;  %v2210_v34 = vmul.f32 %v2181_v25, %v6628_v2  ;;  %v2211_v12 = vmul.f32 %v2185_v49, %v6628_v2 }
 0x2cf   : > { %v2213_v17 = vmul.f32 %v2193_v5, %v6628_v2  ;;  %v2214_v54 = vmul.f32 %v2197_v6, %v6628_v2  ;;  %v2419_v11 = vmul.f32 %v2393_v47, %v6619_v23  ;;  %v2285_v9 = vrot.slane %v6541_v44, %v7754_v59 }
 0x2d0   : > { %v2219_v58 = vadd.f32 %v2211_v12, %v2167_v32  ;;  %v2218_v21 = vadd.f32 %v2210_v34, %v2166_v35  ;;  %v6650_v16 = vadd.f32 %v6593_v53, %v2159_v42  ;;  %v2173_v60 = vadd.f32 %v6593_v53, %v2160_v39 }
 0x2d1   : > { %v6654_v46 = vmul.f32 %v2201_v56, %v6628_v2  ;;  %v6657_v49 = vmul.f32 %v2205_v48, %v6628_v2  ;;  %v2262_v13 = vmul.f32 %v2233_v63, %v6581_v18  ;;  %v2217_v26 = vmul.f32 %v2209_v41, %v6628_v2 }
 0x2d2   : > { %v6659_v25 = vpop.permute.xlu1 %2279  ;;  %v2271_v30 = vadd.f32 %v2263_v29, %v2219_v58  ;;  %v2222_v5 = vadd.f32 %v2214_v54, %v2170_v38  ;;  %v2249_v62 = vrot.slane %v6577_v37, %v7752_v22  ;;  %v2301_v55 = vrot.slane %v6577_v37, %v7754_v59 }
 0x2d3   : > { %v2315_v40 = vmul.f32 %v2289_v10, %v6659_v25  ;;  %v2314_v31 = vmul.f32 %v2285_v9, %v6659_v25  ;;  %v2270_v35 = vadd.f32 %v2262_v13, %v2218_v21  ;;  %v2337_v19 = vrot.slane %v6541_v44, %v7755_v7 }
 0x2d4   : > { %v2389_v10 = vrot.slane %v6541_v44, %v7756_v51  ;;  %v2441_v29 = vrot.slane %v6541_v44, %v7757_v8  ;;  %v2266_v32 = vmul.f32 %v2249_v62, %v6581_v18  ;;  %v2318_v47 = vmul.f32 %v2301_v55, %v6659_v25 }
 0x2d5   : > { %v2323_v36 = vadd.f32 %v2315_v40, %v2271_v30  ;;  %v2353_v6 = vrot.slane %v6577_v37, %v7755_v7  ;;  %v2322_v48 = vadd.f32 %v2314_v31, %v2270_v35  ;;  %v2405_v42 = vrot.slane %v6577_v37, %v7756_v51 }
 0x2d6   : > { %v2221_v39 = vadd.f32 %v2213_v17, %v2169_v50  ;;  %v2245_v34 = vrot.slane %v6556_v33, %v7752_v22  ;;  %v2274_v41 = vadd.f32 %v2266_v32, %v2222_v5  ;;  %v2297_v21 = vrot.slane %v6556_v33, %v7754_v59 }
 0x2d7   : > { %v6679_v56 = vpop.permute.xlu1 %2331  ;;  %v2349_v63 = vrot.slane %v6556_v33, %v7755_v7  ;;  %v2401_v50 = vrot.slane %v6556_v33, %v7756_v51  ;;  %v2418_v40 = vmul.f32 %v2389_v10, %v6619_v23  ;;  %v2422_v35 = vmul.f32 %v2405_v42, %v6619_v23 }
 0x2d8   : > { %v2367_v12 = vmul.f32 %v2341_v20, %v6679_v56  ;;  %v2366_v38 = vmul.f32 %v2337_v19, %v6679_v56  ;;  %v2370_v54 = vmul.f32 %v2353_v6, %v6679_v56  ;;  %v2265_v58 = vmul.f32 %v2245_v34, %v6581_v18 }
 0x2d9   : > { %v2493_v20 = vrot.slane %v6541_v44, %v7758_v14  ;;  %v2326_v30 = vadd.f32 %v2318_v47, %v2274_v41  ;;  %v2317_v31 = vmul.f32 %v2297_v21, %v6659_v25  ;;  %v2369_v5 = vmul.f32 %v2349_v63, %v6679_v56 }
 0x2da   : > { %v2375_v17 = vadd.f32 %v2367_v12, %v2323_v36  ;;  %v2374_v9 = vadd.f32 %v2366_v38, %v2322_v48  ;;  %v2273_v13 = vadd.f32 %v2265_v58, %v2221_v39  ;;  %v2457_v19 = vrot.slane %v6577_v37, %v7757_v8 }
 0x2db   : > { %v2378_v55 = vadd.f32 %v2370_v54, %v2326_v30  ;;  %v2453_v36 = vrot.slane %v6556_v33, %v7757_v8  ;;  %v2421_v10 = vmul.f32 %v2401_v50, %v6619_v23  ;;  %v2261_v42 = vrot.slane %v6604_v52, %v7752_v22 }
 0x2dc   : > { %v6700_v62 = vpop.permute.xlu1 %2435  ;;  %v2427_v44 = vadd.f32 %v2419_v11, %v2375_v17  ;;  %v2426_v32 = vadd.f32 %v2418_v40, %v2374_v9  ;;  %v2325_v47 = vadd.f32 %v2317_v31, %v2273_v13  ;;  %v2225_v38 = vadd.f32 %v2217_v26, %v2173_v60 }
 0x2dd   : > { %v2471_v6 = vmul.f32 %v2445_v0, %v6700_v62  ;;  %v2470_v48 = vmul.f32 %v2441_v29, %v6700_v62  ;;  %v2474_v39 = vmul.f32 %v2457_v19, %v6700_v62  ;;  %v2430_v34 = vadd.f32 %v2422_v35, %v2378_v55 }
 0x2de   : > { %v2377_v12 = vadd.f32 %v2369_v5, %v2325_v47  ;;  %v2313_v41 = vrot.slane %v6604_v52, %v7754_v59  ;;  %v2509_v11 = vrot.slane %v6577_v37, %v7758_v14  ;;  %v2473_v54 = vmul.f32 %v2453_v36, %v6700_v62 }
 0x2df   : > { %v2505_v0 = vrot.slane %v6556_v33, %v7758_v14  ;;  %v2269_v29 = vmul.f32 %v2261_v42, %v6581_v18  ;;  %v2365_v60 = vrot.slane %v6604_v52, %v7755_v7  ;;  %v2417_v26 = vrot.slane %v6604_v52, %v7756_v51 }
 0x2e0   : > { %v2429_v21 = vadd.f32 %v2421_v10, %v2377_v12  ;;  %v2321_v63 = vmul.f32 %v2313_v41, %v6659_v25  ;;  %v2479_v50 = vadd.f32 %v2471_v6, %v2427_v44  ;;  %v2478_v33 = vadd.f32 %v2470_v48, %v2426_v32 }
 0x2e1   : > { %v6721_v58 = vpop.permute.xlu1 %2487  ;;  %v2482_v9 = vadd.f32 %v2474_v39, %v2430_v34  ;;  %v2277_v40 = vadd.f32 %v2269_v29, %v2225_v38  ;;  %v2373_v13 = vmul.f32 %v2365_v60, %v6679_v56  ;;  %v2469_v35 = vrot.slane %v6604_v52, %v7757_v8 }
 0x2e2   : > { %v2523_v37 = vmul.f32 %v2497_v57, %v6721_v58  ;;  %v2522_v17 = vmul.f32 %v2493_v20, %v6721_v58  ;;  %v2526_v30 = vmul.f32 %v2509_v11, %v6721_v58  ;;  %v2525_v55 = vmul.f32 %v2505_v0, %v6721_v58 }
 0x2e3   : > { %v2481_v1 = vadd.f32 %v2473_v54, %v2429_v21  ;;  %v2329_v57 = vadd.f32 %v2321_v63, %v2277_v40  ;;  %v2425_v19 = vmul.f32 %v2417_v26, %v6619_v23  ;;  %v2521_v20 = vrot.slane %v6604_v52, %v7758_v14 }
 0x2e4   : > { %v6735_v31 = vadd.f32 %v2523_v37, %v2479_v50  ;;  %v6737_v5 = vadd.f32 %v2522_v17, %v2478_v33  ;;  %v2223_v36 = vadd.f32 %v6654_v46, %v6634_v4  ;;  %v2253_v44 = vrot.slane %v6579_v28, %v7752_v22 }
 0x2e5   : > { %v2305_v32 = vrot.slane %v6579_v28, %v7754_v59  ;;  %v6755_v47 = vadd.f32 %v2526_v30, %v2482_v9  ;;  %v2381_v10 = vadd.f32 %v2373_v13, %v2329_v57  ;;  %v2477_v52 = vmul.f32 %v2469_v35, %v6700_v62 }
 0x2e6   : > { %2540 = vrot.lane.b32.xlu1 %v6735_v31, %s4352_s18  ;;  %2538 = vrot.lane.b32.xlu0 %v6737_v5, %s4352_s18  ;;  %v2357_v6 = vrot.slane %v6579_v28, %v7755_v7  ;;  %v6760_v48 = vadd.f32 %v2525_v55, %v2481_v1  ;;  %v2529_v39 = vmul.f32 %v2521_v20, %v6721_v58 }
 0x2e7   : > { %v2267_v4 = vmul.f32 %v2253_v44, %v6581_v18  ;;  %v2319_v46 = vmul.f32 %v2305_v32, %v6659_v25  ;;  %v2433_v42 = vadd.f32 %v2425_v19, %v2381_v10  ;;  %v2409_v12 = vrot.slane %v6579_v28, %v7756_v51 }
 0x2e8   : > { %v2371_v34 = vmul.f32 %v2357_v6, %v6679_v56  ;;  %v2224_v38 = vadd.f32 %v6657_v49, %v6650_v16  ;;  %v2257_v11 = vrot.slane %v6602_v43, %v7752_v22  ;;  %v2309_v54 = vrot.slane %v6602_v43, %v7754_v59 }
 0x2e9   : > { %v2275_v41 = vadd.f32 %v2267_v4, %v2223_v36  ;;  %v2168_v0 = vadd.f32 %v6593_v53, %v6606_v24  ;;  %v2212_v16 = vmul.f32 %v2189_v45, %v6628_v2  ;;  %v2485_v49 = vadd.f32 %v2477_v52, %v2433_v42 }
 0x2ea   : > { %2546 = vrot.lane.b32.xlu1 %v6755_v47, %s4352_s18  ;;  %2544 = vrot.lane.b32.xlu0 %v6760_v48, %s4352_s18  ;;  %v2461_v29 = vrot.slane %v6579_v28, %v7757_v8  ;;  %v2268_v63 = vmul.f32 %v2257_v11, %v6581_v18  ;;  %v2320_v60 = vmul.f32 %v2309_v54, %v6659_v25 }
 0x2eb   : > { %v2327_v21 = vadd.f32 %v2319_v46, %v2275_v41  ;;  %v2361_v26 = vrot.slane %v6602_v43, %v7755_v7  ;;  %v6790_v50 = vadd.f32 %v2529_v39, %v2485_v49  ;;  %v2423_v53 = vmul.f32 %v2409_v12, %v6619_v23  ;;  %v3133_v49 = vld [vmem:[#allocation7 + $0x418] sm:$0xff] }
 0x2ec   : > { %v2475_v24 = vmul.f32 %v2461_v29, %v6700_v62  ;;  %v2513_v45 = vrot.slane %v6579_v28, %v7758_v14  ;;  %v2276_v37 = vadd.f32 %v2268_v63, %v2224_v38  ;;  %v2413_v17 = vrot.slane %v6602_v43, %v7756_v51  ;;  %v3002_v29 = vld [vmem:[#allocation7] sm:$0xff] }
 0x2ed   : > { %v2379_v2 = vadd.f32 %v2371_v34, %v2327_v21  ;;  %v2372_v33 = vmul.f32 %v2361_v26, %v6679_v56  ;;  %v2220_v9 = vadd.f32 %v2212_v16, %v2168_v0  ;;  %v2241_v30 = vrot.slane %v6554_v61, %v7752_v22  ;;  %v3004_v21 = vld [vmem:[#allocation7 + $0x10] sm:$0xff]  ;;  %v3130_v26 = vld [vmem:[#allocation7 + $0x400] sm:$0xff] }
 0x2ee   : > { %2552 = vrot.lane.b32.xlu1 %v6790_v50, %s4352_s18  ;;  %v2293_v40 = vrot.slane %v6554_v61, %v7754_v59  ;;  %v2527_v28 = vmul.f32 %v2513_v45, %v6721_v58  ;;  %v2328_v55 = vadd.f32 %v2320_v60, %v2276_v37  ;;  %v2465_v35 = vrot.slane %v6602_v43, %v7757_v8  ;;  %v3135_v37 = vld [vmem:[#allocation7 + $0x428] sm:$0xff] }
 0x2ef   : > { %v2431_v13 = vadd.f32 %v2423_v53, %v2379_v2  ;;  %v2517_v1 = vrot.slane %v6602_v43, %v7758_v14  ;;  %v2264_v57 = vmul.f32 %v2241_v30, %v6581_v18  ;;  %v2345_v20 = vrot.slane %v6554_v61, %v7755_v7  ;;  %v3132_v53 = vld [vmem:[#allocation7 + $0x410] sm:$0xff]  ;;  %v3009_v2 = vld [vmem:[#allocation7 + $0x38] sm:$0xff]  ;;  %v3006_v30 = vld [vmem:[#allocation7 + $0x20] sm:$0xff] }
 0x2f0   : > { %v2316_v19 = vmul.f32 %v2293_v40, %v6659_v25  ;;  %v2380_v44 = vadd.f32 %v2372_v33, %v2328_v55  ;;  %v2424_v32 = vmul.f32 %v2413_v17, %v6619_v23  ;;  %v2476_v10 = vmul.f32 %v2465_v35, %v6700_v62  ;;  %v3137_v33 = vld [vmem:[#allocation7 + $0x438] sm:$0xff]  ;;  %v3008_v40 = vld [vmem:[#allocation7 + $0x30] sm:$0xff]  ;;  %v3011_v35 = vld [vmem:[#allocation7 + $0x48] sm:$0xff] }
 0x2f1   : > { %v2483_v36 = vadd.f32 %v2475_v24, %v2431_v13  ;;  %v2272_v52 = vadd.f32 %v2264_v57, %v2220_v9  ;;  %v2368_v6 = vmul.f32 %v2345_v20, %v6679_v56  ;;  %v2397_v39 = vrot.slane %v6554_v61, %v7756_v51  ;;  %v3007_v24 = vld [vmem:[#allocation7 + $0x28] sm:$0xff]  ;;  %v3134_v13 = vld [vmem:[#allocation7 + $0x420] sm:$0xff]  ;;  %v3136_v55 = vld [vmem:[#allocation7 + $0x430] sm:$0xff] }
 0x2f2   : > { %v2432_v18 = vadd.f32 %v2424_v32, %v2380_v44  ;;  %v2528_v25 = vmul.f32 %v2517_v1, %v6721_v58  ;;  %v2449_v46 = vrot.slane %v6554_v61, %v7757_v8  ;;  %v2501_v38 = vrot.slane %v6554_v61, %v7758_v14  ;;  %v3003_v61 = vld [vmem:[#allocation7 + $0x8] sm:$0xff]  ;;  %v3013_v1 = vld [vmem:[#allocation7 + $0x58] sm:$0xff]  ;;  %v3010_v44 = vld [vmem:[#allocation7 + $0x40] sm:$0xff] }
 0x2f3   : > { %v6819_v43 = vadd.f32 %v2527_v28, %v2483_v36  ;;  %v2324_v4 = vadd.f32 %v2316_v19, %v2272_v52  ;;  %v2420_v12 = vmul.f32 %v2397_v39, %v6619_v23  ;;  %v3005_v23 = vld [vmem:[#allocation7 + $0x18] sm:$0xff]  ;;  %v3774_v60 = vpack.c.bf16 %v3004_v21, %v3002_v29  ;;  %v3139_v20 = vld [vmem:[#allocation7 + $0x448] sm:$0xff]  ;;  %v3138_v52 = vld [vmem:[#allocation7 + $0x440] sm:$0xff] }
 0x2f4   : > { %v2484_v42 = vadd.f32 %v2476_v10, %v2432_v18  ;;  %v2472_v56 = vmul.f32 %v2449_v46, %v6700_v62  ;;  %v2524_v54 = vmul.f32 %v2501_v38, %v6721_v58  ;;  %v3131_v62 = vld [vmem:[#allocation7 + $0x408] sm:$0xff]  ;;  %v3772_v58 = vpack.c.bf16 %v3005_v23, %v3003_v61  ;;  %v3141_v36 = vld [vmem:[#allocation7 + $0x458] sm:$0xff]  ;;  %v3012_v10 = vld [vmem:[#allocation7 + $0x50] sm:$0xff] }
 0x2f5   : > { %2548 = vrot.lane.b32.xlu0 %v6819_v43, %s4352_s18  ;;  %v2376_v34 = vadd.f32 %v2368_v6, %v2324_v4  ;;  %v3900_v63 = vpack.c.bf16 %v3133_v49, %v3131_v62  ;;  %v3902_v45 = vpack.c.bf16 %v3132_v53, %v3130_v26  ;;  %v3776_v17 = vpack.c.bf16 %v3009_v2, %v3007_v24  ;;  %v3140_v6 = vld [vmem:[#allocation7 + $0x450] sm:$0xff]  ;;  %v3015_v18 = vld [vmem:[#allocation7 + $0x68] sm:$0xff]  ;;  %v3021_v61 = vld [vmem:[#allocation7 + $0x98] sm:$0xff] }
 0x2f6   : > { %v6830_v41 = vadd.f32 %v2528_v25, %v2484_v42  ;;  %3773 = vmatprep.subr.bf16.mxu1 %v3772_v58  ;;  %v3904_v9 = vpack.c.bf16 %v3137_v33, %v3135_v37  ;;  %v3778_v28 = vpack.c.bf16 %v3008_v40, %v3006_v30  ;;  %v3906_v57 = vpack.c.bf16 %v3136_v55, %v3134_v13  ;;  %v3017_v25 = vld [vmem:[#allocation7 + $0x78] sm:$0xff]  ;;  %v3143_v4 = vld [vmem:[#allocation7 + $0x468] sm:$0xff]  ;;  %v3018_v21 = vld [vmem:[#allocation7 + $0x80] sm:$0xff] }
 0x2f7   : > { %v2428_v11 = vadd.f32 %v2420_v12, %v2376_v34  ;;  %3901 = vmatprep.subr.bf16.mxu0 %v3900_v63  ;;  %3775 = vmatpush1.bf16.msra.mxu1 %v3774_v60  ;;  %v3780_v19 = vpack.c.bf16 %v3013_v1, %v3011_v35  ;;  %v3908_v32 = vpack.c.bf16 %v3141_v36, %v3139_v20  ;;  %v3145_v34 = vld [vmem:[#allocation7 + $0x478] sm:$0xff]  ;;  %v3014_v12 = vld [vmem:[#allocation7 + $0x60] sm:$0xff]  ;;  %v3147_v23 = vld [vmem:[#allocation7 + $0x488] sm:$0xff] }
 0x2f8   : > { %2550 = vrot.lane.b32.xlu1 %v6830_v41, %s4352_s18  ;;  %3903 = vmatpush1.bf16.msra.mxu0 %v3902_v45  ;;  %v3782_v39 = vpack.c.bf16 %v3012_v10, %v3010_v44  ;;  %v3910_v46 = vpack.c.bf16 %v3140_v6, %v3138_v52  ;;  %v3784_v42 = vpack.c.bf16 %v3017_v25, %v3015_v18  ;;  %v3149_v62 = vld [vmem:[#allocation7 + $0x498] sm:$0xff]  ;;  %v3020_v63 = vld [vmem:[#allocation7 + $0x90] sm:$0xff]  ;;  %v3146_v60 = vld [vmem:[#allocation7 + $0x480] sm:$0xff] }
 0x2f9   : > { %v2480_v0 = vadd.f32 %v2472_v56, %v2428_v11  ;;  %3777 = vmatprep.subr.bf16.mxu1 %v3776_v17  ;;  %3905 = vmatprep.subr.bf16.mxu0 %v3904_v9  ;;  %v3016_v56 = vld [vmem:[#allocation7 + $0x70] sm:$0xff]  ;;  %v3912_v38 = vpack.c.bf16 %v3145_v34, %v3143_v4  ;;  %v3142_v11 = vld [vmem:[#allocation7 + $0x460] sm:$0xff]  ;;  %v3916_v26 = vpack.c.bf16 %v3149_v62, %v3147_v23  ;;  %v3023_v24 = vld [vmem:[#allocation7 + $0xa8] sm:$0xff] }
 0x2fa   : > { %v3786_v58 = vpack.c.bf16 %v3016_v56, %v3014_v12  ;;  %v3148_v53 = vld [vmem:[#allocation7 + $0x490] sm:$0xff]  ;;  %v3025_v45 = vld [vmem:[#allocation7 + $0xb8] sm:$0xff]  ;;  %v3151_v2 = vld [vmem:[#allocation7 + $0x4a8] sm:$0xff]  ;;  %v3790_v33 = vpack.c.bf16 %v3020_v63, %v3018_v21 }
 0x2fb   : > { %v6835_v16 = vadd.f32 %v2524_v54, %v2480_v0  ;;  %3779 = vmatpush1.bf16.msra.mxu1 %v3778_v28  ;;  %v3144_v54 = vld [vmem:[#allocation7 + $0x470] sm:$0xff]  ;;  %v3019_v0 = vld [vmem:[#allocation7 + $0x88] sm:$0xff]  ;;  %v3153_v37 = vld [vmem:[#allocation7 + $0x4b8] sm:$0xff]  ;;  %v3918_v17 = vpack.c.bf16 %v3148_v53, %v3146_v60  ;;  %v3792_v9 = vpack.c.bf16 %v3025_v45, %v3023_v24 }
 0x2fc   : > { %2656 = vrot.lane.b32.xlu1 %v6735_v31, %s4354_s16  ;;  %3907 = vmatpush1.bf16.msra.mxu0 %v3906_v57  ;;  %v3914_v49 = vpack.c.bf16 %v3144_v54, %v3142_v11  ;;  %v3788_v29 = vpack.c.bf16 %v3021_v61, %v3019_v0  ;;  %v3022_v30 = vld [vmem:[#allocation7 + $0xa0] sm:$0xff]  ;;  %v3024_v40 = vld [vmem:[#allocation7 + $0xb0] sm:$0xff]  ;;  %v3920_v28 = vpack.c.bf16 %v3153_v37, %v3151_v2  ;;  %v3027_v35 = vld [vmem:[#allocation7 + $0xc8] sm:$0xff] }
 0x2fd   : > { %2542 = vrot.lane.b32.xlu0 %v6835_v16, %s4352_s18  ;;  %3781 = vmatprep.subr.bf16.mxu1 %v3780_v19  ;;  %v3150_v13 = vld [vmem:[#allocation7 + $0x4a0] sm:$0xff]  ;;  %v3152_v55 = vld [vmem:[#allocation7 + $0x4b0] sm:$0xff]  ;;  %v3029_v1 = vld [vmem:[#allocation7 + $0xd8] sm:$0xff]  ;;  %v3794_v20 = vpack.c.bf16 %v3024_v40, %v3022_v30  ;;  %s3641_s18 = scalar_lea.sflag [#allocation4], %s4598_s19 }
 0x2fe   : > { %3909 = vmatprep.subr.bf16.mxu0 %v3908_v32  ;;  %v3155_v57 = vld [vmem:[#allocation7 + $0x4c8] sm:$0xff]  ;;  %v3157_v19 = vld [vmem:[#allocation7 + $0x4d8] sm:$0xff]  ;;  %v3922_v36 = vpack.c.bf16 %v3152_v55, %v3150_v13  ;;  %v3796_v44 = vpack.c.bf16 %v3029_v1, %v3027_v35  ;;  %v3026_v32 = vld [vmem:[#allocation7 + $0xc0] sm:$0xff] }
 0x2ff   : > { %3783 = vmatpush1.bf16.msra.mxu1 %v3782_v39  ;;  %v3028_v10 = vld [vmem:[#allocation7 + $0xd0] sm:$0xff]  ;;  %v3154_v52 = vld [vmem:[#allocation7 + $0x4c0] sm:$0xff]  ;;  %v3924_v6 = vpack.c.bf16 %v3157_v19, %v3155_v57  ;;  %v3031_v18 = vld [vmem:[#allocation7 + $0xe8] sm:$0xff] }
 0x300   : > { %2662 = vrot.lane.b32.xlu1 %v6755_v47, %s4354_s16  ;;  %3911 = vmatpush1.bf16.msra.mxu0 %v3910_v46  ;;  %v3156_v39 = vld [vmem:[#allocation7 + $0x4d0] sm:$0xff]  ;;  %v3033_v25 = vld [vmem:[#allocation7 + $0xf8] sm:$0xff]  ;;  %v3159_v4 = vld [vmem:[#allocation7 + $0x4e8] sm:$0xff] }
 0x301   : > { %2654 = vrot.lane.b32.xlu0 %v6737_v5, %s4354_s16  ;;  %3785 = vmatprep.subr.bf16.mxu1 %v3784_v42  ;;  %v3161_v46 = vld [vmem:[#allocation7 + $0x4f8] sm:$0xff]  ;;  %v3798_v42 = vpack.c.bf16 %v3028_v10, %v3026_v32  ;;  %v3926_v34 = vpack.c.bf16 %v3156_v39, %v3154_v52  ;;  %v3800_v12 = vpack.c.bf16 %v3033_v25, %v3031_v18  ;;  %v3030_v56 = vld [vmem:[#allocation7 + $0xe0] sm:$0xff]  ;;  %v3160_v0 = vld [vmem:[#allocation7 + $0x4f0] sm:$0xff] }
 0x302   : > { %3913 = vmatprep.subr.bf16.mxu0 %v3912_v38  ;;  %v3032_v38 = vld [vmem:[#allocation7 + $0xf0] sm:$0xff]  ;;  %v3158_v11 = vld [vmem:[#allocation7 + $0x4e0] sm:$0xff]  ;;  %v3928_v54 = vpack.c.bf16 %v3161_v46, %v3159_v4  ;;  %v3035_v61 = vld [vmem:[#allocation7 + $0x108] sm:$0xff] }
 0x303   : > { %3787 = vmatpush1.bf16.msra.mxu1 %v3786_v58  ;;  %v3037_v23 = vld [vmem:[#allocation7 + $0x118] sm:$0xff]  ;;  %v3163_v62 = vld [vmem:[#allocation7 + $0x508] sm:$0xff]  ;;  %v3034_v63 = vld [vmem:[#allocation7 + $0x100] sm:$0xff] }
 0x304   : > { %2666 = vrot.lane.b32.xlu1 %v6830_v41, %s4354_s16  ;;  %3915 = vmatpush1.bf16.msra.mxu0 %v3914_v49  ;;  %v3165_v58 = vld [vmem:[#allocation7 + $0x518] sm:$0xff]  ;;  %v3802_v49 = vpack.c.bf16 %v3032_v38, %v3030_v56  ;;  %v3804_v21 = vpack.c.bf16 %v3037_v23, %v3035_v61  ;;  %v3036_v60 = vld [vmem:[#allocation7 + $0x110] sm:$0xff]  ;;  %v3162_v53 = vld [vmem:[#allocation7 + $0x500] sm:$0xff] }
 0x305   : > { %2658 = vrot.lane.b32.xlu0 %v6835_v16, %s4354_s16  ;;  %3789 = vmatprep.subr.bf16.mxu1 %v3788_v29  ;;  %v3930_v29 = vpack.c.bf16 %v3160_v0, %v3158_v11  ;;  %v3164_v24 = vld [vmem:[#allocation7 + $0x510] sm:$0xff]  ;;  %v3806_v45 = vpack.c.bf16 %v3036_v60, %v3034_v63  ;;  %v6866_v40 = vld [vmem:[%s7309_s2] sm:$0xff]  ;;  %v6878_v55 = vld [vmem:[%s7309_s2 + $0x18] sm:$0xff] }
 0x306   : > { %3917 = vmatprep.subr.bf16.mxu0 %v3916_v26  ;;  %v3932_v26 = vpack.c.bf16 %v3165_v58, %v3163_v62  ;;  %v3934_v2 = vpack.c.bf16 %v3164_v24, %v3162_v53  ;;  %v6871_v13 = vld [vmem:[%s7309_s2 + $0x10] sm:$0xff]  ;;  %v6885_v1 = vld [vmem:[%s7309_s2 + $0x8] sm:$0xff]  ;;  %v2573_v57 = vrot.slane %v6866_v40, %v7756_v51  ;;  %v2593_v32 = vrot.slane %v6878_v55, %v7753_v3  ;;  %v3166_v0 = vld [vmem:[#allocation7 + $0x520] sm:$0xff] }
 0x307   : > { %3791 = vmatpush1.bf16.msra.mxu1 %v3790_v33  ;;  %v2585_v19 = vrot.slane %v6871_v13, %v7753_v3  ;;  %v2597_v10 = vrot.slane %v6878_v55, %v7756_v51  ;;  %v3039_v52 = vld [vmem:[#allocation7 + $0x128] sm:$0xff]  ;;  %v2577_v18 = vrot.slane %v6885_v1, %v7753_v3  ;;  %v2581_v25 = vrot.slane %v6885_v1, %v7756_v51  ;;  %v3168_v61 = vld [vmem:[#allocation7 + $0x530] sm:$0xff] }
 0x308   : > { %2668 = vrot.lane.b32.xlu1 %v6790_v50, %s4354_s16  ;;  %3919 = vmatpush1.bf16.msra.mxu0 %v3918_v17  ;;  %v3167_v39 = vld [vmem:[#allocation7 + $0x528] sm:$0xff]  ;;  %v2681_v4 = vrot.slane %v6866_v40, %v7752_v22  ;;  %v2685_v38 = vrot.slane %v6866_v40, %v7757_v8  ;;  %v2701_v62 = vrot.slane %v6871_v13, %v7757_v8 }
 0x309   : > { %2664 = vrot.lane.b32.xlu0 %v6819_v43, %s4354_s16  ;;  %3793 = vmatprep.subr.bf16.mxu1 %v3792_v9  ;;  %v3938_v58 = vpack.c.bf16 %v3168_v61, %v3166_v0  ;;  %v2637_v53 = vrot.slane %v2597_v10, %v7753_v3  ;;  %v6927_v24 = vrot.slane %v2577_v18, %v7753_v3  ;;  %v3042_v18 = vld [vmem:[#allocation7 + $0x140] sm:$0xff] }
 0x30a   : > { %3921 = vmatprep.subr.bf16.mxu0 %v3920_v28  ;;  %v2569_v28 = vrot.slane %v6866_v40, %v7753_v3 }
 0x30b   : > { %3795 = vmatpush1.bf16.msra.mxu1 %v3794_v20 }
 0x30c   : > { %3923 = vmatpush1.bf16.msra.mxu0 %v3922_v36  ;;  %3797 = vmatprep.subr.bf16.mxu1 %v3796_v44  ;;  %v2609_v36 = vrot.slane %v2569_v28, %v7753_v3  ;;  %v2589_v44 = vrot.slane %v6871_v13, %v7756_v51  ;;  %v2697_v51 = vrot.slane %v6871_v13, %v7752_v22 }
 0x30d   : > { %2660 = vrot.lane.b32.xlu0 %v6760_v48, %s4354_s16  ;;  %3925 = vmatprep.subr.bf16.mxu0 %v3924_v6  ;;  %v3041_v6 = vld [vmem:[#allocation7 + $0x138] sm:$0xff]  ;;  %v2721_v28 = vrot.slane %v2681_v4, %v7752_v22 }
 0x30e   : > { %v3808_v46 = vpack.c.bf16 %v3041_v6, %v3039_v52  ;;  %v6938_v10 = vrot.slane %v2697_v51, %v7752_v22  ;;  %v6941_v52 = vrot.slane %v2701_v62, %v7752_v22 }
 0x30f   : > { %3799 = vmatpush1.bf16.msra.mxu1 %v3798_v42  ;;  %v3169_v42 = vld [vmem:[#allocation7 + $0x538] sm:$0xff] }
 0x310   : > { %3927 = vmatpush1.bf16.msra.mxu0 %v3926_v34  ;;  %3801 = vmatprep.subr.bf16.mxu1 %v3800_v12  ;;  %v3038_v34 = vld [vmem:[#allocation7 + $0x120] sm:$0xff]  ;;  %v3040_v12 = vld [vmem:[#allocation7 + $0x130] sm:$0xff]  ;;  %v3936_v11 = vpack.c.bf16 %v3169_v42, %v3167_v39  ;;  %v3173_v39 = vld [vmem:[#allocation7 + $0x558] sm:$0xff]  ;;  %v2709_v42 = vrot.slane %v6878_v55, %v7757_v8 }
 0x311   : > { %3929 = vmatprep.subr.bf16.mxu0 %v3928_v54  ;;  %v3810_v54 = vpack.c.bf16 %v3040_v12, %v3038_v34 }
 0x313   : > { %3803 = vmatpush1.bf16.msra.mxu1 %v3802_v49  ;;  %v2613_v49 = vrot.slane %v2573_v57, %v7753_v3  ;;  %v2725_v57 = vrot.slane %v2685_v38, %v7752_v22  ;;  %v3172_v38 = vld [vmem:[#allocation7 + $0x550] sm:$0xff] }
 0x314   : > { %3931 = vmatpush1.bf16.msra.mxu0 %v3930_v29  ;;  %3805 = vmatprep.subr.bf16.mxu1 %v3804_v21  ;;  %v2625_v29 = vrot.slane %v2585_v19, %v7753_v3  ;;  %v2629_v21 = vrot.slane %v2589_v44, %v7753_v3  ;;  %v3043_v19 = vld [vmem:[#allocation7 + $0x148] sm:$0xff] }
 0x315   : > { %3933 = vmatprep.subr.bf16.mxu0 %v3932_v26  ;;  %v6923_v26 = vrot.slane %v2593_v32, %v7753_v3  ;;  %v3171_v44 = vld [vmem:[#allocation7 + $0x548] sm:$0xff] }
 0x316   : > { %v3940_v34 = vpack.c.bf16 %v3173_v39, %v3171_v44 }
 0x317   : > { %3807 = vmatpush1.bf16.msra.mxu1 %v3806_v45 }
 0x318   : > { %3935 = vmatpush1.bf16.msra.mxu0 %v3934_v2  ;;  %3809 = vmatprep.subr.bf16.mxu1 %v3808_v46  ;;  %v2621_v2 = vrot.slane %v2581_v25, %v7753_v3  ;;  %v3044_v25 = vld [vmem:[#allocation7 + $0x150] sm:$0xff] }
 0x319   : > { %3937 = vmatprep.subr.bf16.mxu0 %v3936_v11  ;;  %v3814_v12 = vpack.c.bf16 %v3044_v25, %v3042_v18 }
 0x31b   : > { %3811 = vmatpush1.bf16.msra.mxu1 %v3810_v54 }
 0x31c   : > { %3939 = vmatpush1.bf16.msra.mxu0 %v3938_v58 }
 0x31d   : > { %3941 = vmatprep.subr.bf16.mxu0 %v3940_v34  ;;  %v3174_v34 = vld [vmem:[#allocation7 + $0x560] sm:$0xff] }
 0x358   : > { %v6855_v37 = vpop.permute.xlu1 %2540  ;;  %v2539_v33 = vpop.permute.xlu0 %2538 }
 0x359   : > { %v2560_v45 = vsel %vm832_vm4, %v2539_v33, %v6855_v37 }
 0x35a   : > { %v2639_v11 = vadd.f32 %v2613_v49, %v2560_v45  ;;  %v3049_v49 = vld [vmem:[#allocation7 + $0x178] sm:$0xff] }
 0x35c   : > { %v6857_v17 = vpop.permute.xlu1 %2546  ;;  %v6859_v9 = vpop.permute.xlu0 %2544 }
 0x35d   : > { %v2557_v4 = vsel %vm832_vm4, %v6859_v9, %v6857_v17 }
 0x35e   : > { %v6963_v45 = vadd.f32 %v2625_v29, %v2557_v4 }
 0x360   : > { %v6861_v30 = vpop.permute.xlu1 %2552 }
 0x361   : > { %v2561_v56 = vsel %vm832_vm4, %v6861_v30, %v2539_v33  ;;  %v2705_v33 = vrot.slane %v6878_v55, %v7752_v22 }
 0x362   : > { %v2638_v60 = vadd.f32 %v2609_v36, %v2561_v56  ;;  %v3045_v36 = vld [vmem:[#allocation7 + $0x158] sm:$0xff]  ;;  %v3170_v56 = vld [vmem:[#allocation7 + $0x540] sm:$0xff] }
 0x363   : > { %v3812_v6 = vpack.c.bf16 %v3045_v36, %v3043_v19  ;;  %v3942_v61 = vpack.c.bf16 %v3172_v38, %v3170_v56  ;;  %v2689_v36 = vrot.slane %v6885_v1, %v7752_v22 }
 0x364   : > { %v2646_v54 = vmax.f32 %v6737_v5, %v2638_v60  ;;  %v3047_v5 = vld [vmem:[#allocation7 + $0x168] sm:$0xff] }
 0x365   : > { %3813 = vmatprep.subr.bf16.mxu1 %v3812_v6  ;;  %v3175_v60 = vld [vmem:[#allocation7 + $0x568] sm:$0xff]  ;;  %3943 = vmatpush1.bf16.msra.mxu0 %v3942_v61  ;;  %v3816_v44 = vpack.c.bf16 %v3049_v49, %v3047_v5  ;;  %v3177_v6 = vld [vmem:[#allocation7 + $0x578] sm:$0xff]  ;;  %v2647_v61 = vmax.f32 %v6735_v31, %v2639_v11  ;;  %v2650_v31 = vmax.f32 %v6755_v47, %v6963_v45  ;;  %v3050_v45 = vld [vmem:[#allocation7 + $0x180] sm:$0xff] }
 0x366   : > { %3815 = vmatpush1.bf16.msra.mxu1 %v3814_v12  ;;  %v3944_v25 = vpack.c.bf16 %v3177_v6, %v3175_v60  ;;  %v3176_v12 = vld [vmem:[#allocation7 + $0x570] sm:$0xff] }
 0x367   : > { %v6880_v35 = vpop.permute.xlu0 %2548  ;;  %3817 = vmatprep.subr.bf16.mxu1 %v3816_v44  ;;  %v3178_v44 = vld [vmem:[#allocation7 + $0x580] sm:$0xff]  ;;  %v3180_v6 = vld [vmem:[#allocation7 + $0x590] sm:$0xff] }
 0x368   : > { %v2556_v51 = vsel %vm832_vm4, %v6857_v17, %v6880_v35  ;;  %v2693_v17 = vrot.slane %v6885_v1, %v7757_v8  ;;  %3945 = vmatprep.subr.bf16.mxu0 %v3944_v25 }
 0x369   : > { %v2643_v56 = vadd.f32 %v2629_v21, %v2556_v51  ;;  %v3051_v51 = vld [vmem:[#allocation7 + $0x188] sm:$0xff] }
 0x36a   : > { %v6891_v20 = vpop.permute.xlu1 %2550 }
 0x36b   : > { %v2554_v62 = vsel %vm832_vm4, %v6891_v20, %v6861_v30  ;;  %v3046_v30 = vld [vmem:[#allocation7 + $0x160] sm:$0xff]  ;;  %v2651_v49 = vmax.f32 %v6819_v43, %v2643_v56 }
 0x36c   : > { %v6977_v38 = vadd.f32 %v2637_v53, %v2554_v62  ;;  %v6991_v53 = vrot.slane %v2689_v36, %v7752_v22  ;;  %v3053_v62 = vld [vmem:[#allocation7 + $0x198] sm:$0xff]  ;;  %v3052_v36 = vld [vmem:[#allocation7 + $0x190] sm:$0xff] }
 0x36e   : > { %v6911_v23 = vpop.permute.xlu1 %2656  ;;  %v2653_v47 = vmax.f32 %v6790_v50, %v6977_v38  ;;  %v3820_v50 = vpack.c.bf16 %v3053_v62, %v3051_v51 }
 0x36f   : > { %v6920_v63 = vpop.permute.xlu0 %2542 }
 0x370   : > { %v2558_v39 = vsel %vm832_vm4, %v6920_v63, %v6859_v9  ;;  %v2749_v9 = vrot.slane %v2709_v42, %v7752_v22 }
 0x372   : > { %v6935_v32 = vpop.permute.xlu1 %2662 }
 0x373   : > { %v2655_v46 = vpop.permute.xlu0 %2654 }
 0x374   : > { %v2676_v0 = vsel %vm929_vm3, %v2655_v46, %v6911_v23 }
 0x375   : > { %v2750_v58 = vadd.f32 %v2721_v28, %v2676_v0  ;;  %v3048_v28 = vld [vmem:[#allocation7 + $0x170] sm:$0xff]  ;;  %v3946_v0 = vpack.c.bf16 %v3176_v12, %v3174_v34  ;;  %v3057_v34 = vld [vmem:[#allocation7 + $0x1b8] sm:$0xff] }
 0x376   : > { %v6965_v19 = vpop.permute.xlu1 %2666  ;;  %v3818_v4 = vpack.c.bf16 %v3048_v28, %v3046_v30  ;;  %v3055_v30 = vld [vmem:[#allocation7 + $0x1a8] sm:$0xff]  ;;  %v3185_v12 = vld [vmem:[#allocation7 + $0x5b8] sm:$0xff] }
 0x377   : > { %v6975_v29 = vmax.f32 %v2646_v54, %v2750_v58  ;;  %v2659_v18 = vpop.permute.xlu0 %2658  ;;  %v6986_v54 = vadd.f32 %v2621_v2, %v2558_v39  ;;  %3947 = vmatpush1.bf16.msra.mxu0 %v3946_v0  ;;  %v3179_v58 = vld [vmem:[#allocation7 + $0x588] sm:$0xff]  ;;  %v3824_v0 = vpack.c.bf16 %v3057_v34, %v3055_v30  ;;  %v3062_v30 = vld [vmem:[#allocation7 + $0x1e0] sm:$0xff] }
 0x378   : > { %v2675_v8 = vsel %vm929_vm3, %v6911_v23, %v2659_v18  ;;  %v2733_v23 = vrot.slane %v2693_v17, %v7752_v22  ;;  %3819 = vmatpush1.bf16.msra.mxu1 %v3818_v4  ;;  %v3822_v4 = vpack.c.bf16 %v3052_v36, %v3050_v45 }
 0x379   : > { %v2751_v5 = vadd.f32 %v2725_v57, %v2675_v8  ;;  %2766 = vrot.lane.b32.xlu0 %v6975_v29, %s4350_s21  ;;  %v2559_v57 = vsel %vm832_vm4, %v6855_v37, %v6920_v63  ;;  %v3181_v63 = vld [vmem:[#allocation7 + $0x598] sm:$0xff]  ;;  %v2649_v39 = vmax.f32 %v6760_v48, %v6986_v54  ;;  %3821 = vmatprep.subr.bf16.mxu1 %v3820_v50 }
 0x37a   : > { %v6988_v21 = vpop.permute.xlu1 %2668  ;;  %v7019_v28 = vadd.f32 %v6927_v24, %v2559_v57  ;;  %v3948_v25 = vpack.c.bf16 %v3181_v63, %v3179_v58  ;;  %v3950_v8 = vpack.c.bf16 %v3180_v6, %v3178_v44  ;;  %v3182_v24 = vld [vmem:[#allocation7 + $0x5a0] sm:$0xff]  ;;  %v3059_v57 = vld [vmem:[#allocation7 + $0x1c8] sm:$0xff]  ;;  %v3189_v58 = vld [vmem:[#allocation7 + $0x5d8] sm:$0xff] }
 0x37b   : > { %v7000_v42 = vmax.f32 %v2647_v61, %v2751_v5  ;;  %v2665_v2 = vpop.permute.xlu0 %2664  ;;  %v2677_v11 = vsel %vm929_vm3, %v6988_v21, %v2655_v46  ;;  %v3054_v61 = vld [vmem:[#allocation7 + $0x1a0] sm:$0xff]  ;;  %v3056_v5 = vld [vmem:[#allocation7 + $0x1b0] sm:$0xff]  ;;  %v3065_v50 = vld [vmem:[#allocation7 + $0x1f8] sm:$0xff] }
 0x37c   : > { %v2671_v60 = vsel %vm929_vm3, %v2665_v2, %v6965_v19  ;;  %v2672_v37 = vsel %vm929_vm3, %v6935_v32, %v2665_v2  ;;  %v2757_v43 = vadd.f32 %v2749_v9, %v2677_v11  ;;  %3949 = vmatprep.subr.bf16.mxu0 %v3948_v25  ;;  %3823 = vmatpush1.bf16.msra.mxu1 %v3822_v4  ;;  %v3061_v2 = vld [vmem:[#allocation7 + $0x1d8] sm:$0xff]  ;;  %v3191_v44 = vld [vmem:[#allocation7 + $0x5e8] sm:$0xff]  ;;  %v3192_v4 = vld [vmem:[#allocation7 + $0x5f0] sm:$0xff] }
 0x37d   : > { %v2754_v46 = vadd.f32 %v6938_v10, %v2672_v37  ;;  %v2755_v17 = vadd.f32 %v6941_v52, %v2671_v60  ;;  %2768 = vrot.lane.b32.xlu1 %v7000_v42, %s4350_s21  ;;  %v3183_v10 = vld [vmem:[#allocation7 + $0x5a8] sm:$0xff]  ;;  %v3826_v62 = vpack.c.bf16 %v3056_v5, %v3054_v61  ;;  %3951 = vmatpush1.bf16.msra.mxu0 %v3950_v8 }
 0x37e   : > { %v3952_v54 = vpack.c.bf16 %v3185_v12, %v3183_v10  ;;  %v7032_v11 = vmax.f32 %v2653_v47, %v2757_v43  ;;  %3825 = vmatprep.subr.bf16.mxu1 %v3824_v0  ;;  %v3828_v60 = vpack.c.bf16 %v3061_v2, %v3059_v57  ;;  %v2745_v37 = vrot.slane %v2705_v33, %v7752_v22  ;;  %v3067_v8 = vld [vmem:[#allocation7 + $0x208] sm:$0xff]  ;;  %v3069_v0 = vld [vmem:[#allocation7 + $0x218] sm:$0xff] }
 0x37f   : > { %v7023_v52 = vmax.f32 %v2650_v31, %v2754_v46  ;;  %v7025_v56 = vmax.f32 %v2651_v49, %v2755_v17  ;;  %v2661_v38 = vpop.permute.xlu0 %2660  ;;  %v3184_v31 = vld [vmem:[#allocation7 + $0x5b0] sm:$0xff]  ;;  %v3058_v49 = vld [vmem:[#allocation7 + $0x1c0] sm:$0xff]  ;;  %v2648_v33 = vmax.f32 %v6835_v16, %v7019_v28  ;;  %v3195_v61 = vld [vmem:[#allocation7 + $0x608] sm:$0xff]  ;;  %v3836_v5 = vpack.c.bf16 %v3069_v0, %v3067_v8 }
 0x380   : > { %v2673_v48 = vsel %vm929_vm3, %v2661_v38, %v6935_v32  ;;  %v2674_v9 = vsel %vm929_vm3, %v2659_v18, %v2661_v38  ;;  %v3187_v32 = vld [vmem:[#allocation7 + $0x5c8] sm:$0xff]  ;;  %v2555_v18 = vsel %vm832_vm4, %v6880_v35, %v6891_v20  ;;  %v3954_v47 = vpack.c.bf16 %v3184_v31, %v3182_v24  ;;  %3953 = vmatprep.subr.bf16.mxu0 %v3952_v54  ;;  %v3186_v46 = vld [vmem:[#allocation7 + $0x5c0] sm:$0xff]  ;;  %v3188_v17 = vld [vmem:[#allocation7 + $0x5d0] sm:$0xff] }
 0x381   : > { %v2753_v51 = vadd.f32 %v2733_v23, %v2673_v48  ;;  %2774 = vrot.lane.b32.xlu0 %v7023_v52, %s4350_s21  ;;  %2776 = vrot.lane.b32.xlu1 %v7025_v56, %s4350_s21  ;;  %v3060_v23 = vld [vmem:[#allocation7 + $0x1d0] sm:$0xff]  ;;  %v2752_v63 = vadd.f32 %v6991_v53, %v2674_v9  ;;  %v3956_v36 = vpack.c.bf16 %v3189_v58, %v3187_v32  ;;  %v3063_v53 = vld [vmem:[#allocation7 + $0x1e8] sm:$0xff]  ;;  %v3190_v28 = vld [vmem:[#allocation7 + $0x5e0] sm:$0xff]  ;;  %v7760_v54 = vmov 1  }
 0x382   : > { %v2670_v35 = vsel %vm929_vm3, %v6965_v19, %v6988_v21  ;;  %3827 = vmatpush1.bf16.msra.mxu1 %v3826_v62  ;;  %v3830_v20 = vpack.c.bf16 %v3060_v23, %v3058_v49  ;;  %v2644_v43 = vadd.f32 %v6923_v26, %v2555_v18  ;;  %3955 = vmatpush1.bf16.msra.mxu0 %v3954_v47  ;;  %v3193_v21 = vld [vmem:[#allocation7 + $0x5f8] sm:$0xff]  ;;  %v490_v48 = vld [vmem:[%s7318_s11] sm:$0xff]  ;;  %v7761_v31 = vmov 2  }
 0x383   : > { %v7047_v45 = vmax.f32 %v2649_v39, %v2753_v51  ;;  %3829 = vmatprep.subr.bf16.mxu1 %v3828_v60  ;;  %v3958_v6 = vpack.c.bf16 %v3188_v17, %v3186_v46  ;;  %v3832_v19 = vpack.c.bf16 %v3065_v50, %v3063_v53  ;;  %v3064_v39 = vld [vmem:[#allocation7 + $0x1f0] sm:$0xff]  ;;  %v2756_v26 = vadd.f32 %v2745_v37, %v2670_v35  ;;  %v3197_v24 = vld [vmem:[#allocation7 + $0x618] sm:$0xff]  ;;  %v489_v9 = vld [vmem:[%s7759_s12] sm:$0xff] }
 0x384   : > { %v7060_v25 = vmax.f32 %v2648_v33, %v2752_v63  ;;  %3957 = vmatprep.subr.bf16.mxu0 %v3956_v36  ;;  %v3960_v16 = vpack.c.bf16 %v3193_v21, %v3191_v44  ;;  %v3834_v34 = vpack.c.bf16 %v3064_v39, %v3062_v30  ;;  %v2652_v10 = vmax.f32 %v6830_v41, %v2644_v43 }
 0x385   : > { %2780 = vrot.lane.b32.xlu1 %v7032_v11, %s4350_s21  ;;  %2772 = vrot.lane.b32.xlu0 %v7047_v45, %s4350_s21  ;;  %v3962_v12 = vpack.c.bf16 %v3192_v4, %v3190_v28  ;;  %v3964_v41 = vpack.c.bf16 %v3197_v24, %v3195_v61  ;;  %v7762_v57 = vmov 3   ;;  %v2797_v62 = vrot.slane %v6866_v40, %v7755_v7 }
 0x386   : > { %3831 = vmatpush1.bf16.msra.mxu1 %v3830_v20  ;;  %3959 = vmatpush1.bf16.msra.mxu0 %v3958_v6  ;;  %v7067_v38 = vmax.f32 %v2652_v10, %v2756_v26  ;;  %v2813_v18 = vrot.slane %v6871_v13, %v7755_v7  ;;  %v2909_v47 = vrot.slane %v6866_v40, %v7758_v14 }
 0x387   : > { %3833 = vmatprep.subr.bf16.mxu1 %v3832_v19  ;;  %3961 = vmatprep.subr.bf16.mxu0 %v3960_v16  ;;  %v2837_v49 = vrot.slane %v2797_v62, %v7751_v27  ;;  %v2793_v23 = vrot.slane %v6866_v40, %v7751_v27  ;;  %v2809_v36 = vrot.slane %v6871_v13, %v7751_v27 }
 0x388   : > { %v2925_v46 = vrot.slane %v6871_v13, %v7758_v14  ;;  %v2853_v35 = vrot.slane %v2813_v18, %v7751_v27  ;;  %v2949_v20 = vrot.slane %v2909_v47, %v7754_v59  ;;  %v2921_v44 = vrot.slane %v6871_v13, %v7754_v59 }
 0x389   : > { %2882 = vrot.lane.b32.xlu1 %v7060_v25, %s4358_s13  ;;  %2880 = vrot.lane.b32.xlu0 %v7000_v42, %s4358_s13  ;;  %v2833_v33 = vrot.slane %v2793_v23, %v7751_v27  ;;  %v2905_v6 = vrot.slane %v6866_v40, %v7754_v59  ;;  %v2849_v19 = vrot.slane %v2809_v36, %v7751_v27 }
 0x38a   : > { %3835 = vmatpush1.bf16.msra.mxu1 %v3834_v34  ;;  %3963 = vmatpush1.bf16.msra.mxu0 %v3962_v12  ;;  %v2965_v30 = vrot.slane %v2925_v46, %v7754_v59  ;;  %v2817_v39 = vrot.slane %v6878_v55, %v7751_v27  ;;  %v2821_v13 = vrot.slane %v6878_v55, %v7755_v7 }
 0x38b   : > { %3837 = vmatprep.subr.bf16.mxu1 %v3836_v5  ;;  %3965 = vmatprep.subr.bf16.mxu0 %v3964_v41  ;;  %v2801_v34 = vrot.slane %v6885_v1, %v7751_v27  ;;  %v2805_v10 = vrot.slane %v6885_v1, %v7755_v7  ;;  %v2961_v0 = vrot.slane %v2921_v44, %v7754_v59  ;;  %v7155_v5 = vld [vmem:[#allocation7 + $0x200] sm:$0xff]  ;;  %v7165_v7 = vld [vmem:[#allocation7 + $0x610] sm:$0xff] }
 0x38c   : > { %v2945_v61 = vrot.slane %v2905_v6, %v7754_v59  ;;  %v2857_v41 = vrot.slane %v2817_v39, %v7751_v27 }
 0x38d   : > { %2890 = vrot.lane.b32.xlu1 %v7067_v38, %s4358_s13  ;;  %2888 = vrot.lane.b32.xlu0 %v7025_v56, %s4358_s13  ;;  %v2841_v18 = vrot.slane %v2801_v34, %v7751_v27  ;;  %v2845_v47 = vrot.slane %v2805_v10, %v7751_v27  ;;  %v7207_v34 = vld [vmem:[%s4602_s14 + $0x10] sm:$0xff] }
 0x391   : > { %2886 = vrot.lane.b32.xlu1 %v7023_v52, %s4358_s13  ;;  %2878 = vrot.lane.b32.xlu0 %v6975_v29, %s4358_s13 }
 0x395   : > { %2778 = vrot.lane.b32.xlu1 %v7067_v38, %s4350_s21  ;;  %2770 = vrot.lane.b32.xlu0 %v7060_v25, %s4350_s21  ;;  %s3771_s21 = sshll.u32 %s4450_s25, 8  ;;  %s4363_s25 = smov [#allocation8]  }
 0x396   : > { %s7263_s10 = scalar_lea.hbm %s7763_s30, %s3771_s21  ;;  %s4270_s15 = sshll.u32 %s4363_s25, 4  ;;  %s4271_s15 = int_to_ptr.vmem [resolvable:$false] %s4270_s15 }
 0x397   : > { %s4272_s12 = scalar_lea.vmem %s4271_s15, 512 }
 0x399   : > { %2892 = vrot.lane.b32.xlu1 %v7032_v11, %s4358_s13  ;;  %2884 = vrot.lane.b32.xlu0 %v7047_v45, %s4358_s13 }
 0x39d   : > { %3583 = vperm.xlu1 %4158, %v490_v48   ;;  %3568 = vperm.xlu0 %4157, %v489_v9   ;;  %v7161_v48 = vld [vmem:[#allocation7 + $0x210] sm:$0xff] }
 0x39e   : > { %v3838_v46 = vpack.c.bf16 %v7161_v48, %v7155_v5  ;;  %v3200_v5 = vld [vmem:[#allocation7 + $0x630] sm:$0xff]  ;;  %v3077_v48 = vld [vmem:[#allocation7 + $0x258] sm:$0xff] }
 0x3a1   : > { %4159 = vset.pattern.permute.xlu1 %v7760_v54  ;;  %4160 = vset.pattern.permute.xlu0 %v7761_v31  ;;  %v2929_v54 = vrot.slane %v6878_v55, %v7754_v59  ;;  %v2933_v31 = vrot.slane %v6878_v55, %v7758_v14 }
 0x3a2   : > { %3589 = vperm.xlu1 %4159, %v489_v9   ;;  %3605 = vperm.xlu0 %4160, %v489_v9  }
 0x3a3   : > { %v2969_v44 = vrot.slane %v2929_v54, %v7754_v59  ;;  %v2973_v6 = vrot.slane %v2933_v31, %v7754_v59 }
 0x3a6   : > { %4161 = vset.pattern.permute.xlu1 %v7762_v57  ;;  %4162 = vset.pattern.permute.xlu0 %v7762_v57 }
 0x3a7   : > { %3621 = vperm.xlu1 %4161, %v489_v9   ;;  %v7163_v9 = vld [vmem:[#allocation7 + $0x600] sm:$0xff] }
 0x3eb   : > { %v2767_v2 = vpop.permute.xlu0 %2766 }
 0x3ef   : > { %v7095_v51 = vpop.permute.xlu1 %2768 }
 0x3f0   : > { %v2788_v60 = vsel %vm638_vm1, %v2767_v2, %v7095_v51 }
 0x3f1   : > { %v2863_v17 = vadd.f32 %v2837_v49, %v2788_v60  ;;  %v2861_v49 = vrot.slane %v2821_v13, %v7751_v27  ;;  %v2913_v60 = vrot.slane %v6885_v1, %v7754_v59  ;;  %v3198_v13 = vld [vmem:[#allocation7 + $0x620] sm:$0xff] }
 0x3f3   : > { %v7099_v32 = vpop.permute.xlu1 %2776  ;;  %v2775_v58 = vpop.permute.xlu0 %2774  ;;  %v2871_v16 = vmax.f32 %v7000_v42, %v2863_v17  ;;  %v2917_v17 = vrot.slane %v6885_v1, %v7758_v14 }
 0x3f4   : > { %v2784_v43 = vsel %vm638_vm1, %v2775_v58, %v7099_v32 }
 0x3f5   : > { %v2867_v26 = vadd.f32 %v2853_v35, %v2784_v43  ;;  %v7187_v35 = vld [vmem:[#allocation7 + $0x228] sm:$0xff] }
 0x3f7   : > { %v7111_v37 = vpop.permute.xlu1 %2780  ;;  %v7113_v63 = vpop.permute.xlu0 %2772  ;;  %v2875_v62 = vmax.f32 %v7025_v56, %v2867_v26  ;;  %v3966_v56 = vpack.c.bf16 %v7165_v7, %v7163_v9  ;;  %v2953_v26 = vrot.slane %v2913_v60, %v7754_v59 }
 0x3f8   : > { %v2789_v40 = vsel %vm638_vm1, %v7111_v37, %v2767_v2  ;;  %v2785_v4 = vsel %vm638_vm1, %v7113_v63, %v2775_v58 }
 0x3f9   : > { %v2862_v57 = vadd.f32 %v2833_v33, %v2789_v40  ;;  %v2866_v2 = vadd.f32 %v2849_v19, %v2785_v4  ;;  %v3199_v19 = vld [vmem:[#allocation7 + $0x628] sm:$0xff]  ;;  %v7202_v40 = vld [vmem:[%s4602_s14] sm:$0xff] }
 0x3fa   : > { %v2994_v4 = vcombine.high %v7202_v40, %v7202_v40 }
 0x3fb   : > { %v7125_v53 = vpop.permute.xlu1 %2882  ;;  %v2881_v50 = vpop.permute.xlu0 %2880  ;;  %v2870_v14 = vmax.f32 %v6975_v29, %v2862_v57  ;;  %v2874_v1 = vmax.f32 %v7023_v52, %v2866_v2  ;;  %v2996_v29 = vcombine.high %v7207_v34, %v7207_v34  ;;  %v3203_v57 = vld [vmem:[#allocation7 + $0x648] sm:$0xff]  ;;  %v3205_v2 = vld [vmem:[#allocation7 + $0x658] sm:$0xff] }
 0x3fc   : > { %v2899_v21 = vsel %vm1123_vm6, %v2881_v50, %v7125_v53 }
 0x3fd   : > { %v2975_v28 = vadd.f32 %v2949_v20, %v2899_v21  ;;  %v3073_v20 = vld [vmem:[#allocation7 + $0x238] sm:$0xff] }
 0x3fe   : > { %v3201_v21 = vld [vmem:[#allocation7 + $0x638] sm:$0xff] }
 0x3ff   : > { %v7151_v12 = vpop.permute.xlu1 %2890  ;;  %v2889_v42 = vpop.permute.xlu0 %2888  ;;  %v2983_v8 = vmax.f32 %v2871_v16, %v2975_v28  ;;  %v3840_v16 = vpack.c.bf16 %v3073_v20, %v7187_v35  ;;  %v3070_v28 = vld [vmem:[#allocation7 + $0x220] sm:$0xff] }
 0x400   : > { %v2895_v24 = vsel %vm1123_vm6, %v2889_v42, %v7151_v12  ;;  %v3074_v35 = vld [vmem:[#allocation7 + $0x240] sm:$0xff] }
 0x401   : > { %3322 = vmatprep.mubr.f32.mxu1 %v2983_v8  ;;  %v2979_v58 = vadd.f32 %v2965_v30, %v2895_v24  ;;  %v3075_v24 = vld [vmem:[#allocation7 + $0x248] sm:$0xff] }
 0x403   : > { %v7177_v23 = vpop.permute.xlu1 %2886  ;;  %v7179_v36 = vpop.permute.xlu0 %2878  ;;  %v2987_v55 = vmax.f32 %v2875_v62, %v2979_v58 }
 0x404   : > { %v2896_v43 = vsel %vm1123_vm6, %v7177_v23, %v2889_v42  ;;  %v2900_v33 = vsel %vm1123_vm6, %v7179_v36, %v2881_v50  ;;  %v3072_v50 = vld [vmem:[#allocation7 + $0x230] sm:$0xff] }
 0x405   : > { %v2978_v30 = vadd.f32 %v2961_v0, %v2896_v43  ;;  %v2974_v39 = vadd.f32 %v2945_v61, %v2900_v33  ;;  %3476 = vmatprep.mubr.f32.mxu0 %v2987_v55  ;;  %v2957_v0 = vrot.slane %v2917_v17, %v7754_v59  ;;  %v3968_v61 = vpack.c.bf16 %v3201_v21, %v3199_v19  ;;  %v3204_v19 = vld [vmem:[#allocation7 + $0x650] sm:$0xff] }
 0x406   : > { %v3842_v55 = vpack.c.bf16 %v3072_v50, %v3070_v28  ;;  %v3970_v17 = vpack.c.bf16 %v3200_v5, %v3198_v13  ;;  %v3084_v5 = vld [vmem:[#allocation7 + $0x290] sm:$0xff] }
 0x407   : > { %v2779_v52 = vpop.permute.xlu1 %2778  ;;  %v2771_v10 = vpop.permute.xlu0 %2770  ;;  %v2982_v42 = vmax.f32 %v2870_v14, %v2974_v39  ;;  %v2986_v8 = vmax.f32 %v2874_v1, %v2978_v30  ;;  %v3207_v30 = vld [vmem:[#allocation7 + $0x668] sm:$0xff]  ;;  %v3209_v39 = vld [vmem:[#allocation7 + $0x678] sm:$0xff] }
 0x408   : > { %v2782_v9 = vsel %vm638_vm1, %v2779_v52, %v7111_v37  ;;  %v2783_v7 = vsel %vm638_vm1, %v7099_v32, %v2779_v52  ;;  %v2786_v54 = vsel %vm638_vm1, %v2771_v10, %v7113_v63  ;;  %v2787_v31 = vsel %vm638_vm1, %v7095_v51, %v2771_v10  ;;  %v3208_v52 = vld [vmem:[#allocation7 + $0x670] sm:$0xff]  ;;  %v3085_v10 = vld [vmem:[#allocation7 + $0x298] sm:$0xff] }
 0x409   : > { %v2868_v62 = vadd.f32 %v2857_v41, %v2783_v7  ;;  %v2864_v58 = vadd.f32 %v2841_v18, %v2787_v31  ;;  %v2865_v60 = vadd.f32 %v2845_v47, %v2786_v54  ;;  %3323 = vmatmul.mubr.f32.vlgmr.msra.gmra.mrb[0].mxu1 %v2982_v42  ;;  %v2869_v37 = vadd.f32 %v2861_v49, %v2782_v9  ;;  %v3076_v18 = vld [vmem:[#allocation7 + $0x250] sm:$0xff]  ;;  %v3202_v47 = vld [vmem:[#allocation7 + $0x640] sm:$0xff]  ;;  %v3211_v42 = vld [vmem:[#allocation7 + $0x688] sm:$0xff] }
 0x40a   : > { %3839 = vmatpush1.bf16.msra.mxu1 %v3838_v46  ;;  %3477 = vmatmul.mubr.f32.vlgmr.msra.gmra.mrb[0].mxu0 %v2986_v8  ;;  %v3844_v32 = vpack.c.bf16 %v3077_v48, %v3075_v24  ;;  %v3972_v41 = vpack.c.bf16 %v3205_v2, %v3203_v57  ;;  %v3846_v28 = vpack.c.bf16 %v3076_v18, %v3074_v35  ;;  %v3213_v8 = vld [vmem:[#allocation7 + $0x698] sm:$0xff]  ;;  %v3210_v24 = vld [vmem:[#allocation7 + $0x680] sm:$0xff]  ;;  %v3212_v9 = vld [vmem:[#allocation7 + $0x690] sm:$0xff] }
 0x40b   : > { %v2876_v20 = vmax.f32 %v7067_v38, %v2868_v62  ;;  %v2872_v63 = vmax.f32 %v7060_v25, %v2864_v58  ;;  %v2873_v43 = vmax.f32 %v7047_v45, %v2865_v60  ;;  %3967 = vmatpush1.bf16.msra.mxu0 %v3966_v56  ;;  %v2893_v51 = vpop.permute.xlu1 %2892  ;;  %v2885_v33 = vpop.permute.xlu0 %2884  ;;  %3841 = vmatprep.subr.bf16.mxu1 %v3840_v16  ;;  %v3079_v38 = vld [vmem:[#allocation7 + $0x268] sm:$0xff]  ;;  %v3089_v54 = vld [vmem:[#allocation7 + $0x2b8] sm:$0xff]  ;;  %v3086_v58 = vld [vmem:[#allocation7 + $0x2a0] sm:$0xff] }
 0x40c   : > { %v2894_v49 = vsel %vm1123_vm6, %v7151_v12, %v2893_v51  ;;  %v2901_v46 = vsel %vm1123_vm6, %v2893_v51, %v7179_v36  ;;  %v2897_v25 = vsel %vm1123_vm6, %v2885_v33, %v7177_v23  ;;  %v2898_v45 = vsel %vm1123_vm6, %v7125_v53, %v2885_v33  ;;  %3969 = vmatprep.subr.bf16.mxu0 %v3968_v61  ;;  %v3081_v12 = vld [vmem:[#allocation7 + $0x278] sm:$0xff]  ;;  %v3087_v7 = vld [vmem:[#allocation7 + $0x2a8] sm:$0xff]  ;;  %v3088_v60 = vld [vmem:[#allocation7 + $0x2b0] sm:$0xff] }
 0x40d   : > { %v2980_v56 = vadd.f32 %v2969_v44, %v2894_v49  ;;  %v2981_v21 = vadd.f32 %v2973_v6, %v2901_v46  ;;  %v2976_v14 = vadd.f32 %v2953_v26, %v2898_v45  ;;  %v2977_v1 = vadd.f32 %v2957_v0, %v2897_v25  ;;  %3328 = vmatprep.mubr.f32.mxu1 %v2994_v4  ;;  %v3078_v44 = vld [vmem:[#allocation7 + $0x260] sm:$0xff]  ;;  %v3080_v6 = vld [vmem:[#allocation7 + $0x270] sm:$0xff]  ;;  %v3083_v4 = vld [vmem:[#allocation7 + $0x288] sm:$0xff] }
 0x40e   : > { %v2877_v36 = vmax.f32 %v7032_v11, %v2869_v37  ;;  %3843 = vmatpush1.bf16.msra.mxu1 %v3842_v55  ;;  %v3974_v23 = vpack.c.bf16 %v3204_v19, %v3202_v47  ;;  %3482 = vmatprep.mubr.f32.mxu0 %v2996_v29  ;;  %v3206_v26 = vld [vmem:[#allocation7 + $0x660] sm:$0xff]  ;;  %v3848_v13 = vpack.c.bf16 %v3081_v12, %v3079_v38  ;;  %v3217_v31 = vld [vmem:[#allocation7 + $0x6b8] sm:$0xff]  ;;  %v3092_v18 = vld [vmem:[#allocation7 + $0x2d0] sm:$0xff] }
 0x40f   : > { %v7240_v50 = vmax.f32 %v2876_v20, %v2980_v56  ;;  %v7242_v15 = vmax.f32 %v2872_v63, %v2976_v14  ;;  %3971 = vmatpush1.bf16.msra.mxu0 %v3970_v17  ;;  %v2985_v53 = vmax.f32 %v2873_v43, %v2977_v1  ;;  %3329 = vmatmul.mubr.f32.gmra.mrb[2].mxu1 %v7202_v40  ;;  %v3082_v40 = vld [vmem:[#allocation7 + $0x280] sm:$0xff]  ;;  %v3216_v17 = vld [vmem:[#allocation7 + $0x6b0] sm:$0xff]  ;;  %v3093_v35 = vld [vmem:[#allocation7 + $0x2d8] sm:$0xff] }
 0x410   : > { %3845 = vmatprep.subr.bf16.mxu1 %v3844_v32  ;;  %v2989_v16 = vmax.f32 %v2877_v36, %v2981_v21  ;;  %v3976_v11 = vpack.c.bf16 %v3209_v39, %v3207_v30  ;;  %3483 = vmatmul.mubr.f32.gmra.mrb[2].mxu0 %v7207_v34  ;;  %v3850_v29 = vpack.c.bf16 %v3080_v6, %v3078_v44  ;;  %v3215_v34 = vld [vmem:[#allocation7 + $0x6a8] sm:$0xff]  ;;  %v3214_v55 = vld [vmem:[#allocation7 + $0x6a0] sm:$0xff]  ;;  %v3221_v63 = vld [vmem:[#allocation7 + $0x6d8] sm:$0xff] }
 0x411   : > { %3973 = vmatprep.subr.bf16.mxu0 %v3972_v41  ;;  %3399 = vmatprep.mubr.f32.mxu1 %v2985_v53  ;;  %v3978_v0 = vpack.c.bf16 %v3208_v52, %v3206_v26  ;;  %v3852_v61 = vpack.c.bf16 %v3085_v10, %v3083_v4  ;;  %v3980_v48 = vpack.c.bf16 %v3213_v8, %v3211_v42  ;;  %v3091_v32 = vld [vmem:[#allocation7 + $0x2c8] sm:$0xff]  ;;  %v3090_v41 = vld [vmem:[#allocation7 + $0x2c0] sm:$0xff]  ;;  %v3220_v49 = vld [vmem:[#allocation7 + $0x6d0] sm:$0xff] }
 0x412   : > { %3847 = vmatpush1.bf16.msra.mxu1 %v3846_v28  ;;  %3553 = vmatprep.mubr.f32.mxu0 %v2989_v16  ;;  %v3854_v57 = vpack.c.bf16 %v3084_v5, %v3082_v40  ;;  %v3982_v2 = vpack.c.bf16 %v3212_v9, %v3210_v24  ;;  %v3856_v62 = vpack.c.bf16 %v3089_v54, %v3087_v7  ;;  %v3219_v20 = vld [vmem:[#allocation7 + $0x6c8] sm:$0xff]  ;;  %v3218_v47 = vld [vmem:[#allocation7 + $0x6c0] sm:$0xff]  ;;  %v3097_v25 = vld [vmem:[#allocation7 + $0x2f8] sm:$0xff] }
 0x413   : > { %3975 = vmatpush1.bf16.msra.mxu0 %v3974_v23  ;;  %3849 = vmatprep.subr.bf16.mxu1 %v3848_v13  ;;  %v3984_v37 = vpack.c.bf16 %v3217_v31, %v3215_v34  ;;  %v3858_v43 = vpack.c.bf16 %v3088_v60, %v3086_v58  ;;  %v3986_v51 = vpack.c.bf16 %v3216_v17, %v3214_v55  ;;  %v3095_v46 = vld [vmem:[#allocation7 + $0x2e8] sm:$0xff]  ;;  %v3225_v38 = vld [vmem:[#allocation7 + $0x6f8] sm:$0xff]  ;;  %v3094_v1 = vld [vmem:[#allocation7 + $0x2e0] sm:$0xff] }
 0x414   : > { %3977 = vmatprep.subr.bf16.mxu0 %v3976_v11  ;;  %v3860_v33 = vpack.c.bf16 %v3093_v35, %v3091_v32  ;;  %v3988_v19 = vpack.c.bf16 %v3221_v63, %v3219_v20  ;;  %v3223_v45 = vld [vmem:[#allocation7 + $0x6e8] sm:$0xff]  ;;  %v3862_v56 = vpack.c.bf16 %v3092_v18, %v3090_v41  ;;  %v3990_v21 = vpack.c.bf16 %v3220_v49, %v3218_v47  ;;  %v3096_v12 = vld [vmem:[#allocation7 + $0x2f0] sm:$0xff]  ;;  %v3222_v30 = vld [vmem:[#allocation7 + $0x6e0] sm:$0xff] }
 0x415   : > { %v3864_v14 = vpack.c.bf16 %v3097_v25, %v3095_v46  ;;  %v3992_v39 = vpack.c.bf16 %v3225_v38, %v3223_v45  ;;  %v3224_v36 = vld [vmem:[#allocation7 + $0x6f0] sm:$0xff]  ;;  %v3099_v28 = vld [vmem:[#allocation7 + $0x308] sm:$0xff]  ;;  %v3101_v23 = vld [vmem:[#allocation7 + $0x318] sm:$0xff]  ;;  %v3866_v6 = vpack.c.bf16 %v3096_v12, %v3094_v1 }
 0x416   : > { %3851 = vmatpush1.bf16.msra.mxu1 %v3850_v29  ;;  %v3227_v53 = vld [vmem:[#allocation7 + $0x708] sm:$0xff]  ;;  %v3229_v44 = vld [vmem:[#allocation7 + $0x718] sm:$0xff]  ;;  %v3994_v26 = vpack.c.bf16 %v3224_v36, %v3222_v30  ;;  %v3868_v16 = vpack.c.bf16 %v3101_v23, %v3099_v28  ;;  %v3098_v13 = vld [vmem:[#allocation7 + $0x300] sm:$0xff] }
 0x417   : > { %3979 = vmatpush1.bf16.msra.mxu0 %v3978_v0  ;;  %3853 = vmatprep.subr.bf16.mxu1 %v3852_v61  ;;  %v3100_v11 = vld [vmem:[#allocation7 + $0x310] sm:$0xff]  ;;  %v3226_v52 = vld [vmem:[#allocation7 + $0x700] sm:$0xff]  ;;  %v3996_v4 = vpack.c.bf16 %v3229_v44, %v3227_v53  ;;  %v3103_v42 = vld [vmem:[#allocation7 + $0x328] sm:$0xff] }
 0x418   : > { %3981 = vmatprep.subr.bf16.mxu0 %v3980_v48  ;;  %v3228_v10 = vld [vmem:[#allocation7 + $0x710] sm:$0xff]  ;;  %v3105_v8 = vld [vmem:[#allocation7 + $0x338] sm:$0xff]  ;;  %v3231_v29 = vld [vmem:[#allocation7 + $0x728] sm:$0xff]  ;;  %v3870_v61 = vpack.c.bf16 %v3100_v11, %v3098_v13 }
 0x419   : > { %v3233_v0 = vld [vmem:[#allocation7 + $0x738] sm:$0xff]  ;;  %v3998_v40 = vpack.c.bf16 %v3228_v10, %v3226_v52  ;;  %v3872_v5 = vpack.c.bf16 %v3105_v8, %v3103_v42  ;;  %v3102_v24 = vld [vmem:[#allocation7 + $0x320] sm:$0xff]  ;;  %v3104_v48 = vld [vmem:[#allocation7 + $0x330] sm:$0xff] }
 0x41a   : > { %3855 = vmatpush1.bf16.msra.mxu1 %v3854_v57  ;;  %v3230_v9 = vld [vmem:[#allocation7 + $0x720] sm:$0xff]  ;;  %v4000_v7 = vpack.c.bf16 %v3233_v0, %v3231_v29  ;;  %v3232_v54 = vld [vmem:[#allocation7 + $0x730] sm:$0xff]  ;;  %v3107_v34 = vld [vmem:[#allocation7 + $0x348] sm:$0xff] }
 0x41b   : > { %3983 = vmatpush1.bf16.msra.mxu0 %v3982_v2  ;;  %3857 = vmatprep.subr.bf16.mxu1 %v3856_v62  ;;  %v3109_v31 = vld [vmem:[#allocation7 + $0x358] sm:$0xff]  ;;  %v3235_v57 = vld [vmem:[#allocation7 + $0x748] sm:$0xff]  ;;  %v3874_v62 = vpack.c.bf16 %v3104_v48, %v3102_v24  ;;  %v4002_v58 = vpack.c.bf16 %v3232_v54, %v3230_v9  ;;  %v3106_v55 = vld [vmem:[#allocation7 + $0x340] sm:$0xff] }
 0x41c   : > { %3985 = vmatprep.subr.bf16.mxu0 %v3984_v37  ;;  %v3237_v2 = vld [vmem:[#allocation7 + $0x758] sm:$0xff]  ;;  %v3876_v60 = vpack.c.bf16 %v3109_v31, %v3107_v34  ;;  %v3108_v37 = vld [vmem:[#allocation7 + $0x350] sm:$0xff]  ;;  %v3234_v17 = vld [vmem:[#allocation7 + $0x740] sm:$0xff] }
 0x41d   : > { %v4004_v32 = vpack.c.bf16 %v3237_v2, %v3235_v57  ;;  %v3236_v35 = vld [vmem:[#allocation7 + $0x750] sm:$0xff]  ;;  %v3111_v20 = vld [vmem:[#allocation7 + $0x368] sm:$0xff]  ;;  %v3113_v63 = vld [vmem:[#allocation7 + $0x378] sm:$0xff] }
 0x41e   : > { %3859 = vmatpush1.bf16.msra.mxu1 %v3858_v43  ;;  %v3239_v43 = vld [vmem:[#allocation7 + $0x768] sm:$0xff]  ;;  %v4006_v41 = vpack.c.bf16 %v3236_v35, %v3234_v17  ;;  %v3880_v18 = vpack.c.bf16 %v3113_v63, %v3111_v20  ;;  %v3110_v47 = vld [vmem:[#allocation7 + $0x360] sm:$0xff]  ;;  %v3240_v25 = vld [vmem:[#allocation7 + $0x770] sm:$0xff] }
 0x41f   : > { %3987 = vmatpush1.bf16.msra.mxu0 %v3986_v51  ;;  %3861 = vmatprep.subr.bf16.mxu1 %v3860_v33  ;;  %v3241_v51 = vld [vmem:[#allocation7 + $0x778] sm:$0xff]  ;;  %v3878_v33 = vpack.c.bf16 %v3108_v37, %v3106_v55  ;;  %v3238_v49 = vld [vmem:[#allocation7 + $0x760] sm:$0xff]  ;;  %v3115_v45 = vld [vmem:[#allocation7 + $0x388] sm:$0xff] }
 0x420   : > { %3989 = vmatprep.subr.bf16.mxu0 %v3988_v19  ;;  %v3112_v19 = vld [vmem:[#allocation7 + $0x370] sm:$0xff]  ;;  %v4008_v46 = vpack.c.bf16 %v3241_v51, %v3239_v43  ;;  %v3117_v38 = vld [vmem:[#allocation7 + $0x398] sm:$0xff]  ;;  %v4010_v1 = vpack.c.bf16 %v3240_v25, %v3238_v49  ;;  %v3114_v30 = vld [vmem:[#allocation7 + $0x380] sm:$0xff] }
 0x421   : > { %v3884_v12 = vpack.c.bf16 %v3117_v38, %v3115_v45  ;;  %v3242_v36 = vld [vmem:[#allocation7 + $0x780] sm:$0xff]  ;;  %v3244_v23 = vld [vmem:[#allocation7 + $0x790] sm:$0xff]  ;;  %v3119_v53 = vld [vmem:[#allocation7 + $0x3a8] sm:$0xff] }
 0x422   : > { %3863 = vmatpush1.bf16.msra.mxu1 %v3862_v56  ;;  %v3243_v56 = vld [vmem:[#allocation7 + $0x788] sm:$0xff]  ;;  %v3121_v44 = vld [vmem:[#allocation7 + $0x3b8] sm:$0xff]  ;;  %v4014_v13 = vpack.c.bf16 %v3244_v23, %v3242_v36  ;;  %v3118_v52 = vld [vmem:[#allocation7 + $0x3a0] sm:$0xff] }
 0x423   : > { %3991 = vmatpush1.bf16.msra.mxu0 %v3990_v21  ;;  %3865 = vmatprep.subr.bf16.mxu1 %v3864_v14  ;;  %v3245_v21 = vld [vmem:[#allocation7 + $0x798] sm:$0xff]  ;;  %v3882_v14 = vpack.c.bf16 %v3112_v19, %v3110_v47  ;;  %v3888_v11 = vpack.c.bf16 %v3121_v44, %v3119_v53  ;;  %v3246_v10 = vld [vmem:[#allocation7 + $0x7a0] sm:$0xff]  ;;  %v3248_v8 = vld [vmem:[#allocation7 + $0x7b0] sm:$0xff]  ;;  %v3584_v19 = vpop.permute.xlu1 %3583 }
 0x424   : > { %3993 = vmatprep.subr.bf16.mxu0 %v3992_v39  ;;  %v3116_v39 = vld [vmem:[#allocation7 + $0x390] sm:$0xff]  ;;  %v4012_v28 = vpack.c.bf16 %v3245_v21, %v3243_v56  ;;  %v3123_v29 = vld [vmem:[#allocation7 + $0x3c8] sm:$0xff]  ;;  %v3125_v0 = vld [vmem:[#allocation7 + $0x3d8] sm:$0xff]  ;;  %v4018_v24 = vpack.c.bf16 %v3248_v8, %v3246_v10 }
 0x425   : > { %v3892_v48 = vpack.c.bf16 %v3125_v0, %v3123_v29  ;;  %v3122_v9 = vld [vmem:[#allocation7 + $0x3c0] sm:$0xff]  ;;  %v3252_v31 = vld [vmem:[#allocation7 + $0x7d0] sm:$0xff]  ;;  %v3127_v57 = vld [vmem:[#allocation7 + $0x3e8] sm:$0xff] }
 0x426   : > { %3867 = vmatpush1.bf16.msra.mxu1 %v3866_v6  ;;  %v3247_v6 = vld [vmem:[#allocation7 + $0x7a8] sm:$0xff]  ;;  %v3250_v54 = vld [vmem:[#allocation7 + $0x7c0] sm:$0xff]  ;;  %v3129_v2 = vld [vmem:[#allocation7 + $0x3f8] sm:$0xff] }
 0x427   : > { %3995 = vmatpush1.bf16.msra.mxu0 %v3994_v26  ;;  %3869 = vmatprep.subr.bf16.mxu1 %v3868_v16  ;;  %v3249_v26 = vld [vmem:[#allocation7 + $0x7b8] sm:$0xff]  ;;  %v3886_v16 = vpack.c.bf16 %v3116_v39, %v3114_v30  ;;  %v4022_v55 = vpack.c.bf16 %v3252_v31, %v3250_v54  ;;  %v3896_v37 = vpack.c.bf16 %v3129_v2, %v3127_v57  ;;  %v3126_v17 = vld [vmem:[#allocation7 + $0x3e0] sm:$0xff]  ;;  %v3256_v63 = vld [vmem:[#allocation7 + $0x7f0] sm:$0xff]  ;;  %v3590_v39 = vpop.permute.xlu1 %3589 }
 0x428   : > { %3997 = vmatprep.subr.bf16.mxu0 %v3996_v4  ;;  %v3120_v4 = vld [vmem:[#allocation7 + $0x3b0] sm:$0xff]  ;;  %v4016_v42 = vpack.c.bf16 %v3249_v26, %v3247_v6  ;;  %v3254_v20 = vld [vmem:[#allocation7 + $0x7e0] sm:$0xff] }
 0x429   : > { %v4026_v51 = vpack.c.bf16 %v3256_v63, %v3254_v20 }
 0x42a   : > { %3871 = vmatpush1.bf16.msra.mxu1 %v3870_v61  ;;  %v3251_v61 = vld [vmem:[#allocation7 + $0x7c8] sm:$0xff] }
 0x42b   : > { %3999 = vmatpush1.bf16.msra.mxu0 %v3998_v40  ;;  %3873 = vmatprep.subr.bf16.mxu1 %v3872_v5  ;;  %v3253_v40 = vld [vmem:[#allocation7 + $0x7d8] sm:$0xff]  ;;  %v3890_v5 = vpack.c.bf16 %v3120_v4, %v3118_v52  ;;  %v3622_v10 = vpop.permute.xlu1 %3621 }
 0x42c   : > { %4001 = vmatprep.subr.bf16.mxu0 %v4000_v7  ;;  %v3124_v7 = vld [vmem:[#allocation7 + $0x3d0] sm:$0xff]  ;;  %v4020_v34 = vpack.c.bf16 %v3253_v40, %v3251_v61 }
 0x42e   : > { %3875 = vmatpush1.bf16.msra.mxu1 %v3874_v62  ;;  %v3255_v62 = vld [vmem:[#allocation7 + $0x7e8] sm:$0xff] }
 0x42f   : > { %4003 = vmatpush1.bf16.msra.mxu0 %v4002_v58  ;;  %3877 = vmatprep.subr.bf16.mxu1 %v3876_v60  ;;  %v3257_v58 = vld [vmem:[#allocation7 + $0x7f8] sm:$0xff]  ;;  %v3894_v60 = vpack.c.bf16 %v3124_v7, %v3122_v9 }
 0x430   : > { %4005 = vmatprep.subr.bf16.mxu0 %v4004_v32  ;;  %v3128_v32 = vld [vmem:[#allocation7 + $0x3f0] sm:$0xff]  ;;  %v4024_v35 = vpack.c.bf16 %v3257_v58, %v3255_v62 }
 0x431   : > { %v3898_v43 = vpack.c.bf16 %v3128_v32, %v3126_v17 }
 0x432   : > { %3879 = vmatpush1.bf16.msra.mxu1 %v3878_v33  ;;  %v4178_v33 = vld [vmem:[%s4602_s14 + $0x8] sm:$0xff] }
 0x433   : > { %4007 = vmatpush1.bf16.msra.mxu0 %v4006_v41  ;;  %3881 = vmatprep.subr.bf16.mxu1 %v3880_v18  ;;  %v2995_v41 = vcombine.high %v4178_v33, %v4178_v33  ;;  %v4179_v18 = vld [vmem:[%s4602_s14 + $0x18] sm:$0xff]  ;;  %s3756_s14 = sshll.u32 %s4598_s19, 4 }
 0x434   : > { %4009 = vmatprep.subr.bf16.mxu0 %v4008_v46  ;;  %v2997_v47 = vcombine.high %v4179_v18, %v4179_v18  ;;  %s458_s13 = scalar_lea.vmem [#allocation8], %s3756_s14 }
 0x435   : > { %s3655_s29 = sshll.u32 %s458_s13, 4  ;;  %s7265_s29 = int_to_ptr.vmem [resolvable:$true] %s3655_s29 }
 0x436   : > { %3883 = vmatpush1.bf16.msra.mxu1 %v3882_v14  ;;  %v3569_v14 = vpop.permute.xlu0 %3568  ;;  %s4266_s16 = scalar_lea.vmem %s7265_s29, 256  ;;  %p4273_p5 = scmp.lt.s32.totalorder %s7265_s29, %s4271_s15 }
 0x437   : > { %4011 = vmatpush1.bf16.msra.mxu0 %v4010_v1  ;;  %3885 = vmatprep.subr.bf16.mxu1 %v3884_v12  ;;  %p4267_p11 = scmp.ne.s32.totalorder %s7265_s29, %s4266_s16  ;;  %p4274_p9 = scmp.lt.s32.totalorder %s4272_s12, %s4266_s16 }
 0x438   : > { %4013 = vmatprep.subr.bf16.mxu0 %v4012_v28 }
 0x439   : > { %p4268_p1 = pnand %p4267_p11, %p7764_p0  ;;  %p4275_p12 = por %p4274_p9, %p4273_p5 }
 0x43a   : > { %3887 = vmatpush1.bf16.msra.mxu1 %v3886_v16 }
 0x43b   : > { %4015 = vmatpush1.bf16.msra.mxu0 %v4014_v13  ;;  %3889 = vmatprep.subr.bf16.mxu1 %v3888_v11  ;;  %v3606_v13 = vpop.permute.xlu0 %3605  ;;  %p4269_p3 = pneg %p4268_p1 }
 0x43c   : > { %4017 = vmatprep.subr.bf16.mxu0 %v4016_v42 }
 0x43d   : > { %p4276_p2 = pnand %p4275_p12, %p4269_p3 }
 0x43e   : > { %3891 = vmatpush1.bf16.msra.mxu1 %v3890_v5 }
 0x43f   : > { %4019 = vmatpush1.bf16.msra.mxu0 %v4018_v24  ;;  %3893 = vmatprep.subr.bf16.mxu1 %v3892_v48 }
 0x440   : > { %4021 = vmatprep.subr.bf16.mxu0 %v4020_v34 }
 0x442   : > { %3895 = vmatpush1.bf16.msra.mxu1 %v3894_v60 }
 0x443   : > { %4023 = vmatpush1.bf16.msra.mxu0 %v4022_v55  ;;  %3897 = vmatprep.subr.bf16.mxu1 %v3896_v37 }
 0x444   : > { %4025 = vmatprep.subr.bf16.mxu0 %v4024_v35 }
 0x446   : > { %3899 = vmatpush1.bf16.msra.mxu1 %v3898_v43 }
 0x447   : > { %4027 = vmatpush1.bf16.msra.mxu0 %v4026_v51 }
 0x449   : > { %3400 = vmatmul.mubr.f32.vlgmr.msra.gmra.mrb[0].mxu1 %v7242_v15 }
 0x44a   : > { %3554 = vmatmul.mubr.f32.vlgmr.msra.gmra.mrb[0].mxu0 %v7240_v50  ;;  %3405 = vmatprep.mubr.f32.mxu1 %v2995_v41 }
 0x44b   : > { %3559 = vmatprep.mubr.f32.mxu0 %v2997_v47 }
 0x44d   : > { %3406 = vmatmul.mubr.f32.gmra.mrb[2].mxu1 %v4178_v33 }
 0x44e   : > { %3560 = vmatmul.mubr.f32.gmra.mrb[2].mxu0 %v4179_v18 }
 0x51c   : > { %v3401_v49 = vpop.f32.mrb[0].mxu1 }
 0x51d   : > { %v3555_v46 = vpop.f32.mrb[0].mxu0  ;;  %v3403_v25 = vpop.f32.mrb[1].mxu1 }
 0x51e   : > { %v4028_v45 = vadd.f32 %v3555_v46, %v3401_v49  ;;  %v3557_v38 = vpop.f32.mrb[1].mxu0 }
 0x51f   : > { %v4029_v56 = vadd.f32 %v3557_v38, %v3403_v25 }
 0x520   : > { %v3407_v21 = vpop.f32.mrb[2].mxu1 }
 0x521   : > { %v3561_v1 = vpop.f32.mrb[2].mxu0  ;;  %v3409_v12 = vpop.f32.mrb[3].mxu1 }
 0x522   : > { %v4030_v30 = vadd.f32 %v3561_v1, %v3407_v21  ;;  %v3563_v15 = vpop.f32.mrb[3].mxu0 }
 0x523   : > { %v4031_v50 = vadd.f32 %v3563_v15, %v3409_v12 }
 0x524   : > { %v3574_v36 = vrot.slane %v4030_v30, %v7751_v27  ;;  %v3595_v28 = vrot.slane %v4030_v30, %v7753_v3  ;;  %v3611_v6 = vrot.slane %v4030_v30, %v7752_v22  ;;  %v3627_v52 = vrot.slane %v4030_v30, %v7754_v59 }
 0x525   : > { %v3578_v23 = vrot.slane %v4031_v50, %v7751_v27  ;;  %v3599_v53 = vrot.slane %v4031_v50, %v7753_v3  ;;  %v3615_v16 = vrot.slane %v4031_v50, %v7752_v22  ;;  %v3631_v42 = vrot.slane %v4031_v50, %v7754_v59 }
 0x526   : > { %v3579_v44 = vmul.f32 %v3574_v36, %v3569_v14  ;;  %v3600_v4 = vmul.f32 %v3595_v28, %v3590_v39  ;;  %v3616_v3 = vmul.f32 %v3611_v6, %v3606_v13  ;;  %v3632_v40 = vmul.f32 %v3627_v52, %v3622_v10 }
 0x527   : > { %v3580_v26 = vmul.f32 %v3578_v23, %v3569_v14  ;;  %v3601_v27 = vmul.f32 %v3599_v53, %v3590_v39  ;;  %v3617_v61 = vmul.f32 %v3615_v16, %v3606_v13  ;;  %v3633_v22 = vmul.f32 %v3631_v42, %v3622_v10 }
 0x528   : > { %v3586_v11 = vadd.f32 %v3584_v19, %v3579_v44 }
 0x529   : > { %v3587_v8 = vadd.f32 %v3584_v19, %v3580_v26 }
 0x52a   : > { %v3602_v29 = vadd.f32 %v3600_v4, %v3586_v11 }
 0x52b   : > { %v3603_v0 = vadd.f32 %v3601_v27, %v3587_v8 }
 0x52c   : > { %v3618_v5 = vadd.f32 %v3616_v3, %v3602_v29 }
 0x52d   : > { %v3619_v24 = vadd.f32 %v3617_v61, %v3603_v0 }
 0x52e   : > { %v3634_v48 = vadd.f32 %v3632_v40, %v3618_v5 }
 0x52f   : > { %v3635_v9 = vadd.f32 %v3633_v22, %v3619_v24 }
 0x530   : > { %v3636_v7 = vadd.f32 %v4028_v45, %v3634_v48 }
 0x531   : > { %v3637_v54 = vadd.f32 %v4029_v56, %v3635_v9 }
 0x532   : > { %3638 = vst [vmem:[%s458_s13] sm:$0xff] %v3636_v7 }
 0x533   : > { %3639 = vst [vmem:[%s458_s13 + $0x8] sm:$0xff] %v3637_v54 }
 0x534   : > { %4279 = shalt.err (!%p4276_p2)
}
 0x535   : > { %s4280_s19 = scalar_lea.hbm %s7263_s10, 256  ;;  %s4284_s13 = scalar_lea.hbm %s7763_s30, 512 }
 0x536   : > { %p4281_p13 = scmp.ne.s32.totalorder %s7263_s10, %s4280_s19  ;;  %p4285_p4 = scmp.lt.u32.totalorder %s7263_s10, %s7763_s30 }
 0x537   : > { %p4286_p7 = scmp.lt.u32.totalorder %s4284_s13, %s4280_s19  ;;  %p4288_p11 = scmp.lt.u32.totalorder %s4280_s19, %s7263_s10 }
 0x538   : > { %p4282_p6 = pnand %p4281_p13, %p7764_p0 }
 0x539   : > { %p4287_p8 = por %p4286_p7, %p4285_p4 }
 0x53a   : > { %p4283_p10 = pneg %p4282_p6 }
 0x53b   : > { %p4289_p1 = por %p4288_p11, %p4287_p8 }
 0x53d   : > { %p4290_p3 = pnand %p4289_p1, %p4283_p10 }
 0x53f   : > { %4293 = shalt.err (!%p4290_p3)
}
 0x540   : > { %4050 = dma.vmem_to_hbm [thread:$0]  (%p7764_p0), %s7265_s29, 256, %s7263_s10, %s3641_s18  }
 0x541 PF: > { %s7765_s16 = sld [smem:[#allocation12_spill]]  ;;  %s7766_s25 = sld [smem:[#allocation13_spill]] }
 0x542   : > { %p7768_p9 = scmp.ge.s32.totalorder %s4336_s24, 2 }
 0x547   : > { %s3667_s15 = sand.u32 1, %s7765_s16   ;;  %p7767_p5 = scmp.ne.s32.totalorder %s7766_s25, 0 }
 0x548   : > { %s3668_s12 = scalar_lea.sflag [#allocation4], %s3667_s15 }
 0x549   : > { %p4064_p12 = pnand %p7768_p9, %p7767_p5 }
 0x54b   : > { %4319 = dma.done.wait (!%p4064_p12), %s3668_s12, 256  }
 0x54c   : > { %4321 = vsyncadd (!%p4064_p12), %s3668_s12, 4294967040  ;;  %p26_p2 = scmp.ge.s32.totalorder %s4539_s17, 4   ;;  %s7769_s21 = smov %s4328_s22 }
 0x54d   : > { %s7770_s22 = smov %s4332_s23  ;;  %s7771_s23 = smov %s4548_s20 }
 0x54e   : > { %s7772_s24 = smov %s4539_s17  ;;  %28 = sbr.rel (!%p26_p2) target bundleno = 9 (0x9), region = 121 }
 0x555   :  { %3673 = vsyncpa [#allocation3], 1 }
 0x556   :  { %3675 = vsyncpa [#allocation3 + $0x1], 1 }
 0x557   :  { %3676 = vsyncpa [#allocation6], 1 }
 0x558   :  { %3677 = vsyncpa [#allocation4], 1 }
 0x559   :  { %3679 = vsyncpa [#allocation4 + $0x1], 1 }

</bundles_post_ra>
